<compile_context>
chip_gen: v6e
topology: v6e:2x2x1
jax: 0.10.0
libtpu: 0.0.40
codegen_flags: <defaults>
</compile_context>

<pallas_src>
import jax
import jax.numpy as jnp
from jax.experimental import pallas as pl
from jax.experimental.pallas import tpu as pltpu


# -----------------------------------------------------------------------------
# Small helpers
# -----------------------------------------------------------------------------
def _ceil_to(x, m):
    return ((x + m - 1) // m) * m


def _pick_t_chunk(T, Bt, Din_p, Hp, budget_bytes=6 << 20):
    """Largest divisor of T whose per-chunk VMEM footprint fits the budget."""
    # bf16 x (double buffered) + f32 gin scratch + bf16 y (double buffered), per timestep.
    per_step = Bt * (2 * Din_p * 2 + 4 * Hp * 4 + 2 * Hp * 2)
    cap = max(1, budget_bytes // per_step)
    tc = 1
    for d in range(1, T + 1):
        if T % d == 0 and d <= cap:
            tc = d
    # TODO(synk): support non-divisor T via an in-kernel valid-step mask instead of divisor search.
    return tc


def _vmem_limit_bytes(Tc, Bt, Din_p, Hp):
    est = (2 * Tc * Bt * Din_p * 2      # x chunk, double buffered, bf16
           + Din_p * 4 * Hp * 2         # W_ih resident, bf16
           + Hp * 4 * Hp * 2            # W_hh resident, bf16
           + 4 * Hp * 4                 # bias
           + Tc * Bt * 4 * Hp * 4       # gin scratch, f32
           + 2 * Tc * Bt * Hp * 2       # y chunk, double buffered, bf16
           + 8 * Bt * Hp * 4)           # h0/c0/hN/cN blocks + h/c scratch
    # 2x headroom, min = v5e default scoped limit, cap well under v7x's 64 MiB physical VMEM.
    return int(min(max(2 * est, 16 << 20), 48 << 20))


# -----------------------------------------------------------------------------
# Pallas kernels
# -----------------------------------------------------------------------------
def _lstm_chunk_body(x_ref, h0_ref, c0_ref, wih_ref, whh_ref, b_ref,
                     y_ref, gin_sc, h_sc, c_sc):
    """One (batch-block, time-chunk) grid step of an LSTM layer.

    x_ref:   (Tc, Bt, Din_p) bf16   input chunk (time-major)
    h0/c0:   (Bt, Hp) f32           initial state for this batch block
    wih:     (Din_p, 4Hp) bf16      gate order [i, f, o, g], lane-padded per gate
    whh:     (Hp, 4Hp) bf16
    b:       (1, 4Hp) f32           bias_ih + bias_hh
    y_ref:   (Tc, Bt, Hp) bf16 per-step outputs, or None (last layer)
    gin_sc:  (Tc, Bt, 4Hp) f32      hoisted input-projection scratch
    h_sc/c_sc: (Bt, Hp) f32         recurrent state carried across time chunks
    """
    Tc, Bt, Din = x_ref.shape
    Hp = h0_ref.shape[-1]

    # Initialize carried state at the first time chunk of this batch block.
    @pl.when(pl.program_id(1) == 0)
    def _():
        h_sc[...] = h0_ref[...].astype(jnp.float32)
        c_sc[...] = c0_ref[...].astype(jnp.float32)

    # Phase 1: hoisted per-chunk input projection, one (Tc*Bt, Din) @ (Din, 4Hp) MXU pass.
    # Bt is a multiple of 16 and Din a multiple of 128 -> the reshapes are layout no-ops.
    x_flat = x_ref[...].reshape(Tc * Bt, Din)
    gin = jnp.dot(x_flat, wih_ref[...], preferred_element_type=jnp.float32) + b_ref[...]
    gin_sc[...] = gin.reshape(Tc, Bt, 4 * Hp)

    # Phase 2: sequential recurrence; only h @ W_hh (bf16 MXU) sits on the critical path.
    whh = whh_ref[...]

    def step(t, carry):
        h = h_sc[...]
        c = c_sc[...]
        gates = gin_sc[t] + jnp.dot(h.astype(whh.dtype), whh,
                                    preferred_element_type=jnp.float32)
        # Gate columns are ordered [i, f, o, g]: one sigmoid slab + one tanh slab per step.
        sg = jax.nn.sigmoid(gates[:, 0:3 * Hp])
        i_g = sg[:, 0 * Hp:1 * Hp]
        f_g = sg[:, 1 * Hp:2 * Hp]
        o_g = sg[:, 2 * Hp:3 * Hp]
        g_g = jnp.tanh(gates[:, 3 * Hp:4 * Hp])
        c_new = f_g * c + i_g * g_g
        h_new = o_g * jnp.tanh(c_new)
        h_sc[...] = h_new
        c_sc[...] = c_new
        if y_ref is not None:
            y_ref[t] = h_new.astype(y_ref.dtype)
        return carry

    jax.lax.fori_loop(0, Tc, step, 0, unroll=min(Tc, 8))


def lstm_layer_kernel(x_ref, h0_ref, c0_ref, wih_ref, whh_ref, b_ref,
                      y_ref, hN_ref, cN_ref, gin_sc, h_sc, c_sc):
    """Intermediate LSTM layer: streams per-step outputs, carries final state."""
    _lstm_chunk_body(x_ref, h0_ref, c0_ref, wih_ref, whh_ref, b_ref,
                     y_ref, gin_sc, h_sc, c_sc)
    # Block index constant over the time axis -> only the last chunk's value reaches HBM.
    hN_ref[...] = h_sc[...]
    cN_ref[...] = c_sc[...]


def lstm_last_layer_kernel(x_ref, h0_ref, c0_ref, wih_ref, whh_ref, b_ref,
                           wfc_ref, bfc_ref,
                           sig_ref, hN_ref, cN_ref, gin_sc, h_sc, c_sc):
    """Last LSTM layer fused with fc + sigmoid on the final hidden state (no y output)."""
    _lstm_chunk_body(x_ref, h0_ref, c0_ref, wih_ref, whh_ref, b_ref,
                     None, gin_sc, h_sc, c_sc)
    h_fin = h_sc[...]
    hN_ref[...] = h_fin
    cN_ref[...] = c_sc[...]
    # fc as VPU multiply + lane reduction (avoids an N=1 MXU pass), then sigmoid.
    logit = jnp.sum(h_fin * wfc_ref[...], axis=-1, keepdims=True) + bfc_ref[...]
    sig_ref[...] = jax.nn.sigmoid(logit)


# -----------------------------------------------------------------------------
# Wrappers (one pallas_call per layer, grid = (batch_blocks, time_chunks))
# -----------------------------------------------------------------------------
def lstm_layer(x, h0, c0, w_ih, w_hh, bias, *, Bt):
    T, B_pad, Din_p = x.shape
    Hp = h0.shape[-1]
    Tc = _pick_t_chunk(T, Bt, Din_p, Hp)
    grid = (B_pad // Bt, T // Tc)
    return pl.pallas_call(
        lstm_layer_kernel,
        out_shape=(
            jax.ShapeDtypeStruct((T, B_pad, Hp), jnp.bfloat16),   # y (bf16 inter-layer)
            jax.ShapeDtypeStruct((B_pad, Hp), jnp.float32),       # hN
            jax.ShapeDtypeStruct((B_pad, Hp), jnp.float32),       # cN
        ),
        grid_spec=pltpu.PrefetchScalarGridSpec(
            num_scalar_prefetch=0,
            grid=grid,
            in_specs=[
                pl.BlockSpec((Tc, Bt, Din_p), lambda b, t: (t, b, 0)),
                pl.BlockSpec((Bt, Hp), lambda b, t: (b, 0)),
                pl.BlockSpec((Bt, Hp), lambda b, t: (b, 0)),
                pl.BlockSpec((Din_p, 4 * Hp), lambda b, t: (0, 0)),
                pl.BlockSpec((Hp, 4 * Hp), lambda b, t: (0, 0)),
                pl.BlockSpec((1, 4 * Hp), lambda b, t: (0, 0)),
            ],
            out_specs=(
                pl.BlockSpec((Tc, Bt, Hp), lambda b, t: (t, b, 0)),
                pl.BlockSpec((Bt, Hp), lambda b, t: (b, 0)),
                pl.BlockSpec((Bt, Hp), lambda b, t: (b, 0)),
            ),
            scratch_shapes=[
                pltpu.VMEM((Tc, Bt, 4 * Hp), jnp.float32),
                pltpu.VMEM((Bt, Hp), jnp.float32),
                pltpu.VMEM((Bt, Hp), jnp.float32),
            ],
        ),
        compiler_params=pltpu.CompilerParams(
            dimension_semantics=("parallel", "arbitrary"),
            vmem_limit_bytes=_vmem_limit_bytes(Tc, Bt, Din_p, Hp),
        ),
    )(x, h0, c0, w_ih, w_hh, bias)


def lstm_last_layer(x, h0, c0, w_ih, w_hh, bias, w_fc, b_fc, *, Bt):
    T, B_pad, Din_p = x.shape
    Hp = h0.shape[-1]
    Tc = _pick_t_chunk(T, Bt, Din_p, Hp)
    grid = (B_pad // Bt, T // Tc)
    return pl.pallas_call(
        lstm_last_layer_kernel,
        out_shape=(
            jax.ShapeDtypeStruct((B_pad, 1), jnp.float32),        # sigmoid(fc(h_T))
            jax.ShapeDtypeStruct((B_pad, Hp), jnp.float32),       # hN
            jax.ShapeDtypeStruct((B_pad, Hp), jnp.float32),       # cN
        ),
        grid_spec=pltpu.PrefetchScalarGridSpec(
            num_scalar_prefetch=0,
            grid=grid,
            in_specs=[
                pl.BlockSpec((Tc, Bt, Din_p), lambda b, t: (t, b, 0)),
                pl.BlockSpec((Bt, Hp), lambda b, t: (b, 0)),
                pl.BlockSpec((Bt, Hp), lambda b, t: (b, 0)),
                pl.BlockSpec((Din_p, 4 * Hp), lambda b, t: (0, 0)),
                pl.BlockSpec((Hp, 4 * Hp), lambda b, t: (0, 0)),
                pl.BlockSpec((1, 4 * Hp), lambda b, t: (0, 0)),
                pl.BlockSpec((1, Hp), lambda b, t: (0, 0)),
                pl.BlockSpec((1, 1), lambda b, t: (0, 0)),
            ],
            out_specs=(
                pl.BlockSpec((Bt, 1), lambda b, t: (b, 0)),
                pl.BlockSpec((Bt, Hp), lambda b, t: (b, 0)),
                pl.BlockSpec((Bt, Hp), lambda b, t: (b, 0)),
            ),
            scratch_shapes=[
                pltpu.VMEM((Tc, Bt, 4 * Hp), jnp.float32),
                pltpu.VMEM((Bt, Hp), jnp.float32),
                pltpu.VMEM((Bt, Hp), jnp.float32),
            ],
        ),
        compiler_params=pltpu.CompilerParams(
            dimension_semantics=("parallel", "arbitrary"),
            vmem_limit_bytes=_vmem_limit_bytes(Tc, Bt, Din_p, Hp),
        ),
    )(x, h0, c0, w_ih, w_hh, bias, w_fc, b_fc)


# -----------------------------------------------------------------------------
# Parameter preparation (canonical PyTorch-like params -> kernel layout)
# -----------------------------------------------------------------------------
def _reorder_pad_gate_cols(w, H, Hp):
    """(..., 4H) columns in PyTorch order [i,f,g,o] -> (..., 4Hp) in [i,f,o,g], per-gate padded."""
    i, f, g, o = (w[..., k * H:(k + 1) * H] for k in range(4))
    pad = [(0, 0)] * (w.ndim - 1) + [(0, Hp - H)]
    return jnp.concatenate([jnp.pad(p, pad) for p in (i, f, o, g)], axis=-1)


def prepare_params(params, Hp, Ep):
    """Pad H/E to 128 lanes, reorder gates, cast MXU operands to bf16."""
    H = params["lstm"][0]["w_hh"].shape[0]
    E = params["embedding"].shape[1]
    prep = {
        "embedding": jnp.pad(params["embedding"], ((0, 0), (0, Ep - E))).astype(jnp.bfloat16),
        "fc_w": jnp.pad(params["fc_w"], ((0, 0), (0, Hp - H))),        # f32, zeros in pad
        "fc_b": params["fc_b"],
        "lstm": [],
    }
    for l, p in enumerate(params["lstm"]):
        din = p["w_ih"].shape[0]
        din_p = Ep if l == 0 else Hp
        w_ih = _reorder_pad_gate_cols(p["w_ih"], H, Hp)
        w_ih = jnp.pad(w_ih, ((0, din_p - din), (0, 0))).astype(jnp.bfloat16)
        w_hh = _reorder_pad_gate_cols(p["w_hh"], H, Hp)
        w_hh = jnp.pad(w_hh, ((0, Hp - H), (0, 0))).astype(jnp.bfloat16)
        bias = _reorder_pad_gate_cols(p["bias"], H, Hp)                # f32
        prep["lstm"].append({"w_ih": w_ih, "w_hh": w_hh, "bias": bias})
    return prep


# -----------------------------------------------------------------------------
# Forward pass (mirrors LSTM_NN.forward in eval mode)
# -----------------------------------------------------------------------------
@jax.jit
def lstm_nn_forward(x_tokens, h0, c0, params):
    """x_tokens: (B, T) int32; h0, c0: (L, B, H); returns (sig_out (B,), (h_n, c_n))."""
    B, T = x_tokens.shape
    L, _, H = h0.shape
    E = params["embedding"].shape[1]
    Hp = _ceil_to(H, 128)
    Ep = _ceil_to(E, 128)

    # Batch padding / tiling: multiple of 16 sublanes (bf16 packing); 128-row blocks for large B.
    if B <= 128:
        Bt = _ceil_to(max(B, 1), 16)
        B_pad = Bt
    else:
        Bt = 128
        B_pad = _ceil_to(B, 128)
    pad_b = B_pad - B

    kp = prepare_params(params, Hp, Ep)

    x_tok = jnp.pad(x_tokens, ((0, pad_b), (0, 0))) if pad_b else x_tokens
    # Embedding gather kept in plain JAX (data-dependent gather; glue, not kernel work).
    emb = kp["embedding"][x_tok]                      # (B_pad, T, Ep) bf16
    x = jnp.transpose(emb, (1, 0, 2))                 # (T, B_pad, Ep) time-major

    h0_p = jnp.pad(h0, ((0, 0), (0, pad_b), (0, Hp - H)))
    c0_p = jnp.pad(c0, ((0, 0), (0, pad_b), (0, Hp - H)))

    h_fin, c_fin = [], []
    for l in range(L - 1):
        p = kp["lstm"][l]
        x, hN, cN = lstm_layer(x, h0_p[l], c0_p[l], p["w_ih"], p["w_hh"], p["bias"], Bt=Bt)
        h_fin.append(hN)
        c_fin.append(cN)

    p = kp["lstm"][-1]
    sig, hN, cN = lstm_last_layer(x, h0_p[-1], c0_p[-1], p["w_ih"], p["w_hh"], p["bias"],
                                  kp["fc_w"], kp["fc_b"], Bt=Bt)
    h_fin.append(hN)
    c_fin.append(cN)

    # TODO(synk): nn.Dropout(0.3) is identity in eval mode; training-mode dropout not implemented.
    sig_out = sig[:B, 0]                              # == sig_out.view(B, -1)[:, -1]
    hidden = (jnp.stack(h_fin, axis=0)[:, :B, :H],
              jnp.stack(c_fin, axis=0)[:, :B, :H])
    return sig_out, hidden


# -----------------------------------------------------------------------------
# Deterministic parameter init (canonical layout, shapes follow LSTM_NN.__init__)
# -----------------------------------------------------------------------------
def init_params(key, no_layers, vocab_size, hidden_dim, embedding_dim, output_dim=1):
    keys = jax.random.split(key, 3 + 4 * no_layers)
    k = 1.0 / jnp.sqrt(hidden_dim)
    params = {
        "embedding": jax.random.normal(keys[0], (vocab_size, embedding_dim), jnp.float32),
        "lstm": [],
        "fc_w": jax.random.uniform(keys[1], (output_dim, hidden_dim), jnp.float32, -k, k),
        "fc_b": jax.random.uniform(keys[2], (1, output_dim), jnp.float32, -k, k),
    }
    for l in range(no_layers):
        din = embedding_dim if l == 0 else hidden_dim
        kw = keys[3 + 4 * l: 3 + 4 * (l + 1)]
        # stored pre-transposed: (din, 4H) and (H, 4H); PyTorch gate order i, f, g, o.
        params["lstm"].append({
            "w_ih": jax.random.uniform(kw[0], (din, 4 * hidden_dim), jnp.float32, -k, k),
            "w_hh": jax.random.uniform(kw[1], (hidden_dim, 4 * hidden_dim), jnp.float32, -k, k),
            "bias": (jax.random.uniform(kw[2], (1, 4 * hidden_dim), jnp.float32, -k, k)
                     + jax.random.uniform(kw[3], (1, 4 * hidden_dim), jnp.float32, -k, k)),
        })
    return params


# -----------------------------------------------------------------------------
# Pure-JAX f32 reference (correctness check)
# -----------------------------------------------------------------------------
def reference_forward(x_tokens, h0, c0, params):
    x = jnp.transpose(params["embedding"][x_tokens], (1, 0, 2))   # (T, B, E)
    H = h0.shape[-1]
    h_fin, c_fin = [], []
    for l, p in enumerate(params["lstm"]):
        def step(carry, x_t, p=p):
            h, c = carry
            g = x_t @ p["w_ih"] + h @ p["w_hh"] + p["bias"]
            i = jax.nn.sigmoid(g[:, :H]); f = jax.nn.sigmoid(g[:, H:2 * H])
            gg = jnp.tanh(g[:, 2 * H:3 * H]); o = jax.nn.sigmoid(g[:, 3 * H:])
            c = f * c + i * gg
            h = o * jnp.tanh(c)
            return (h, c), h
        (hN, cN), ys = jax.lax.scan(step, (h0[l], c0[l]), x)
        x = ys
        h_fin.append(hN); c_fin.append(cN)
    sig = jax.nn.sigmoid(x[-1] @ params["fc_w"].T + params["fc_b"])
    return sig[:, 0], (jnp.stack(h_fin), jnp.stack(c_fin))


if __name__ == "__main__":
    NO_LAYERS, VOCAB, HIDDEN, EMB = 2, 50, 32, 64
    B, T = 2, 8

    key = jax.random.PRNGKey(0)
    k_param, k_tok = jax.random.split(key)
    params = init_params(k_param, NO_LAYERS, VOCAB, HIDDEN, EMB)

    x_tokens = jax.random.randint(k_tok, (B, T), 0, VOCAB, dtype=jnp.int32)
    h0 = jnp.zeros((NO_LAYERS, B, HIDDEN), jnp.float32)   # init_hidden
    c0 = jnp.zeros((NO_LAYERS, B, HIDDEN), jnp.float32)

    sig_out, (h_n, c_n) = lstm_nn_forward(x_tokens, h0, c0, params)
    jax.block_until_ready((sig_out, h_n, c_n))

    ref_out, (ref_h, ref_c) = reference_forward(x_tokens, h0, c0, params)
    assert sig_out.shape == (B,)
    assert h_n.shape == (NO_LAYERS, B, HIDDEN) and c_n.shape == (NO_LAYERS, B, HIDDEN)
    # bf16 MXU inputs + bf16 inter-layer activations -> loosened tolerance vs the f32 reference.
    assert jnp.allclose(sig_out, ref_out, atol=2e-2)
    assert jnp.allclose(h_n, ref_h, atol=2e-2)
    assert jnp.allclose(c_n, ref_c, atol=2e-2)

    print("KERNEL_OK")
</pallas_src>

<mosaic_0001>
module attributes {stable_mosaic.version = 11 : i64} {
  func.func @lstm_layer_kernel(%arg0: i32, %arg1: i32, %arg2: memref<8x16x128xbf16, #tpu.memory_space<vmem>>, %arg3: memref<16x128xf32, #tpu.memory_space<vmem>>, %arg4: memref<16x128xf32, #tpu.memory_space<vmem>>, %arg5: memref<128x512xbf16, #tpu.memory_space<vmem>>, %arg6: memref<128x512xbf16, #tpu.memory_space<vmem>>, %arg7: memref<1x512xf32, #tpu.memory_space<vmem>>, %arg8: memref<8x16x128xbf16, #tpu.memory_space<vmem>>, %arg9: memref<16x128xf32, #tpu.memory_space<vmem>>, %arg10: memref<16x128xf32, #tpu.memory_space<vmem>>, %arg11: memref<8x16x512xf32, #tpu.memory_space<vmem>>, %arg12: memref<16x128xf32, #tpu.memory_space<vmem>>, %arg13: memref<16x128xf32, #tpu.memory_space<vmem>>) attributes {dimension_semantics = [#tpu.dimension_semantics<parallel>, #tpu.dimension_semantics<arbitrary>], iteration_bounds = array<i64: 1, 1>, scalar_prefetch = 0 : i64, scratch_operands = 3 : i64, tpu.core_type = #tpu.core_type<tc>, window_params = [{transform_indices = @transform_0, window_bounds = array<i64: 8, 16, 128>}, {transform_indices = @transform_1, window_bounds = array<i64: 16, 128>}, {transform_indices = @transform_2, window_bounds = array<i64: 16, 128>}, {pipeline_mode = #tpu.pipeline_mode<synchronous>, transform_indices = @transform_3, window_bounds = array<i64: 128, 512>}, {pipeline_mode = #tpu.pipeline_mode<synchronous>, transform_indices = @transform_4, window_bounds = array<i64: 128, 512>}, {pipeline_mode = #tpu.pipeline_mode<synchronous>, transform_indices = @transform_5, window_bounds = array<i64: 1, 512>}, {transform_indices = @transform_6, window_bounds = array<i64: 8, 16, 128>}, {transform_indices = @transform_7, window_bounds = array<i64: 16, 128>}, {transform_indices = @transform_8, window_bounds = array<i64: 16, 128>}]} {
    %c0_i32 = arith.constant 0 : i32
    %0 = arith.cmpi eq, %arg1, %c0_i32 : i32
    %1 = arith.extui %0 : i1 to i32
    %c0_i32_0 = arith.constant 0 : i32
    %2 = arith.cmpi ne, %1, %c0_i32_0 : i32
    scf.if %2 {
      %c0_133 = arith.constant 0 : index
      %c0_134 = arith.constant 0 : index
      %265 = vector.load %arg3[%c0_133, %c0_134] : memref<16x128xf32, #tpu.memory_space<vmem>>, vector<16x128xf32>
      %c0_135 = arith.constant 0 : index
      %c0_136 = arith.constant 0 : index
      %266 = vector.load %arg12[%c0_135, %c0_136] : memref<16x128xf32, #tpu.memory_space<vmem>>, vector<16x128xf32>
      tpu.vector_store %arg12[%c0_135, %c0_136], %265 {strides = array<i32>} : memref<16x128xf32, #tpu.memory_space<vmem>>, vector<16x128xf32>,
      %c0_137 = arith.constant 0 : index
      %c0_138 = arith.constant 0 : index
      %267 = vector.load %arg4[%c0_137, %c0_138] : memref<16x128xf32, #tpu.memory_space<vmem>>, vector<16x128xf32>
      %c0_139 = arith.constant 0 : index
      %c0_140 = arith.constant 0 : index
      %268 = vector.load %arg13[%c0_139, %c0_140] : memref<16x128xf32, #tpu.memory_space<vmem>>, vector<16x128xf32>
      tpu.vector_store %arg13[%c0_139, %c0_140], %267 {strides = array<i32>} : memref<16x128xf32, #tpu.memory_space<vmem>>, vector<16x128xf32>,
    } else {
    }
    %c0 = arith.constant 0 : index
    %c0_1 = arith.constant 0 : index
    %c0_2 = arith.constant 0 : index
    %3 = vector.load %arg2[%c0, %c0_1, %c0_2] : memref<8x16x128xbf16, #tpu.memory_space<vmem>>, vector<8x16x128xbf16>
    %4 = vector.shape_cast %3 : vector<8x16x128xbf16> to vector<128x128xbf16>
    %c0_3 = arith.constant 0 : index
    %c0_4 = arith.constant 0 : index
    %5 = vector.load %arg5[%c0_3, %c0_4] : memref<128x512xbf16, #tpu.memory_space<vmem>>, vector<128x512xbf16>
    %cst = arith.constant dense<0.000000e+00> : vector<128x512xf32>
    %6 = tpu.matmul %4, %5, %cst {dimension_numbers = #tpu.dot_dimension_numbers<[1], [0], [0], [1], [0, 0, 1, 1], [], []>} : vector<128x128xbf16>, vector<128x512xbf16>, vector<128x512xf32> -> vector<128x512xf32>
    %c0_5 = arith.constant 0 : index
    %c0_6 = arith.constant 0 : index
    %7 = vector.load %arg7[%c0_5, %c0_6] : memref<1x512xf32, #tpu.memory_space<vmem>>, vector<1x512xf32>
    %8 = vector.broadcast %7 : vector<1x512xf32> to vector<128x512xf32>
    %9 = arith.addf %6, %8 : vector<128x512xf32>
    %10 = vector.shape_cast %9 : vector<128x512xf32> to vector<8x16x512xf32>
    %c0_7 = arith.constant 0 : index
    %c0_8 = arith.constant 0 : index
    %c0_9 = arith.constant 0 : index
    %11 = vector.load %arg11[%c0_7, %c0_8, %c0_9] : memref<8x16x512xf32, #tpu.memory_space<vmem>>, vector<8x16x512xf32>
    tpu.vector_store %arg11[%c0_7, %c0_8, %c0_9], %10 {strides = array<i32>} : memref<8x16x512xf32, #tpu.memory_space<vmem>>, vector<8x16x512xf32>,
    %c0_10 = arith.constant 0 : index
    %c0_11 = arith.constant 0 : index
    %12 = vector.load %arg6[%c0_10, %c0_11] : memref<128x512xbf16, #tpu.memory_space<vmem>>, vector<128x512xbf16>
    %c0_i32_12 = arith.constant 0 : i32
    %c0_13 = arith.constant 0 : index
    %c0_14 = arith.constant 0 : index
    %13 = vector.load %arg12[%c0_13, %c0_14] : memref<16x128xf32, #tpu.memory_space<vmem>>, vector<16x128xf32>
    %c0_15 = arith.constant 0 : index
    %c0_16 = arith.constant 0 : index
    %14 = vector.load %arg13[%c0_15, %c0_16] : memref<16x128xf32, #tpu.memory_space<vmem>>, vector<16x128xf32>
    %15 = arith.index_cast %c0_i32_12 : i32 to index
    %c0_17 = arith.constant 0 : index
    %c0_18 = arith.constant 0 : index
    %16 = vector.load %arg11[%15, %c0_17, %c0_18] : memref<8x16x512xf32, #tpu.memory_space<vmem>>, vector<1x16x512xf32>
    %17 = vector.shape_cast %16 : vector<1x16x512xf32> to vector<16x512xf32>
    %18 = arith.truncf %13 : vector<16x128xf32> to vector<16x128xbf16>
    %cst_19 = arith.constant dense<0.000000e+00> : vector<16x512xf32>
    %19 = tpu.matmul %18, %12, %cst_19 {dimension_numbers = #tpu.dot_dimension_numbers<[1], [0], [0], [1], [0, 0, 1, 1], [], []>} : vector<16x128xbf16>, vector<128x512xbf16>, vector<16x512xf32> -> vector<16x512xf32>
    %20 = arith.addf %17, %19 : vector<16x512xf32>
    %21 = vector.extract_strided_slice %20 {offsets = [0, 0], sizes = [16, 384], strides = [1, 1]} : vector<16x512xf32> to vector<16x384xf32>
    %22 = arith.negf %21 : vector<16x384xf32>
    %23 = math.exp %22 : vector<16x384xf32>
    %cst_20 = arith.constant 1.000000e+00 : f32
    %24 = vector.broadcast %cst_20 : f32 to vector<16x384xf32>
    %25 = arith.addf %24, %23 : vector<16x384xf32>
    %26 = arith.divf %24, %25 : vector<16x384xf32>
    %27 = vector.extract_strided_slice %26 {offsets = [0, 0], sizes = [16, 128], strides = [1, 1]} : vector<16x384xf32> to vector<16x128xf32>
    %28 = vector.extract_strided_slice %26 {offsets = [0, 128], sizes = [16, 128], strides = [1, 1]} : vector<16x384xf32> to vector<16x128xf32>
    %29 = vector.extract_strided_slice %26 {offsets = [0, 256], sizes = [16, 128], strides = [1, 1]} : vector<16x384xf32> to vector<16x128xf32>
    %30 = vector.extract_strided_slice %20 {offsets = [0, 384], sizes = [16, 128], strides = [1, 1]} : vector<16x512xf32> to vector<16x128xf32>
    %31 = math.tanh %30 : vector<16x128xf32>
    %32 = arith.mulf %28, %14 : vector<16x128xf32>
    %33 = arith.mulf %27, %31 : vector<16x128xf32>
    %34 = arith.addf %32, %33 : vector<16x128xf32>
    %35 = math.tanh %34 : vector<16x128xf32>
    %36 = arith.mulf %29, %35 : vector<16x128xf32>
    %c0_21 = arith.constant 0 : index
    %c0_22 = arith.constant 0 : index
    %37 = vector.load %arg12[%c0_21, %c0_22] : memref<16x128xf32, #tpu.memory_space<vmem>>, vector<16x128xf32>
    tpu.vector_store %arg12[%c0_21, %c0_22], %36 {strides = array<i32>} : memref<16x128xf32, #tpu.memory_space<vmem>>, vector<16x128xf32>,
    %c0_23 = arith.constant 0 : index
    %c0_24 = arith.constant 0 : index
    %38 = vector.load %arg13[%c0_23, %c0_24] : memref<16x128xf32, #tpu.memory_space<vmem>>, vector<16x128xf32>
    tpu.vector_store %arg13[%c0_23, %c0_24], %34 {strides = array<i32>} : memref<16x128xf32, #tpu.memory_space<vmem>>, vector<16x128xf32>,
    %39 = arith.truncf %36 : vector<16x128xf32> to vector<16x128xbf16>
    %40 = arith.index_cast %c0_i32_12 : i32 to index
    %c0_25 = arith.constant 0 : index
    %c0_26 = arith.constant 0 : index
    %41 = vector.load %arg8[%40, %c0_25, %c0_26] : memref<8x16x128xbf16, #tpu.memory_space<vmem>>, vector<1x16x128xbf16>
    %42 = vector.shape_cast %41 : vector<1x16x128xbf16> to vector<16x128xbf16>
    %43 = vector.shape_cast %39 : vector<16x128xbf16> to vector<1x16x128xbf16>
    tpu.vector_store %arg8[%40, %c0_25, %c0_26], %43 {strides = array<i32>} : memref<8x16x128xbf16, #tpu.memory_space<vmem>>, vector<1x16x128xbf16>,
    %c1_i32 = arith.constant 1 : i32
    %c0_27 = arith.constant 0 : index
    %c0_28 = arith.constant 0 : index
    %44 = vector.load %arg12[%c0_27, %c0_28] : memref<16x128xf32, #tpu.memory_space<vmem>>, vector<16x128xf32>
    %c0_29 = arith.constant 0 : index
    %c0_30 = arith.constant 0 : index
    %45 = vector.load %arg13[%c0_29, %c0_30] : memref<16x128xf32, #tpu.memory_space<vmem>>, vector<16x128xf32>
    %46 = arith.index_cast %c1_i32 : i32 to index
    %c0_31 = arith.constant 0 : index
    %c0_32 = arith.constant 0 : index
    %47 = vector.load %arg11[%46, %c0_31, %c0_32] : memref<8x16x512xf32, #tpu.memory_space<vmem>>, vector<1x16x512xf32>
    %48 = vector.shape_cast %47 : vector<1x16x512xf32> to vector<16x512xf32>
    %49 = arith.truncf %44 : vector<16x128xf32> to vector<16x128xbf16>
    %cst_33 = arith.constant dense<0.000000e+00> : vector<16x512xf32>
    %50 = tpu.matmul %49, %12, %cst_33 {dimension_numbers = #tpu.dot_dimension_numbers<[1], [0], [0], [1], [0, 0, 1, 1], [], []>} : vector<16x128xbf16>, vector<128x512xbf16>, vector<16x512xf32> -> vector<16x512xf32>
    %51 = arith.addf %48, %50 : vector<16x512xf32>
    %52 = vector.extract_strided_slice %51 {offsets = [0, 0], sizes = [16, 384], strides = [1, 1]} : vector<16x512xf32> to vector<16x384xf32>
    %53 = arith.negf %52 : vector<16x384xf32>
    %54 = math.exp %53 : vector<16x384xf32>
    %cst_34 = arith.constant 1.000000e+00 : f32
    %55 = vector.broadcast %cst_34 : f32 to vector<16x384xf32>
    %56 = arith.addf %55, %54 : vector<16x384xf32>
    %57 = arith.divf %55, %56 : vector<16x384xf32>
    %58 = vector.extract_strided_slice %57 {offsets = [0, 0], sizes = [16, 128], strides = [1, 1]} : vector<16x384xf32> to vector<16x128xf32>
    %59 = vector.extract_strided_slice %57 {offsets = [0, 128], sizes = [16, 128], strides = [1, 1]} : vector<16x384xf32> to vector<16x128xf32>
    %60 = vector.extract_strided_slice %57 {offsets = [0, 256], sizes = [16, 128], strides = [1, 1]} : vector<16x384xf32> to vector<16x128xf32>
    %61 = vector.extract_strided_slice %51 {offsets = [0, 384], sizes = [16, 128], strides = [1, 1]} : vector<16x512xf32> to vector<16x128xf32>
    %62 = math.tanh %61 : vector<16x128xf32>
    %63 = arith.mulf %59, %45 : vector<16x128xf32>
    %64 = arith.mulf %58, %62 : vector<16x128xf32>
    %65 = arith.addf %63, %64 : vector<16x128xf32>
    %66 = math.tanh %65 : vector<16x128xf32>
    %67 = arith.mulf %60, %66 : vector<16x128xf32>
    %c0_35 = arith.constant 0 : index
    %c0_36 = arith.constant 0 : index
    %68 = vector.load %arg12[%c0_35, %c0_36] : memref<16x128xf32, #tpu.memory_space<vmem>>, vector<16x128xf32>
    tpu.vector_store %arg12[%c0_35, %c0_36], %67 {strides = array<i32>} : memref<16x128xf32, #tpu.memory_space<vmem>>, vector<16x128xf32>,
    %c0_37 = arith.constant 0 : index
    %c0_38 = arith.constant 0 : index
    %69 = vector.load %arg13[%c0_37, %c0_38] : memref<16x128xf32, #tpu.memory_space<vmem>>, vector<16x128xf32>
    tpu.vector_store %arg13[%c0_37, %c0_38], %65 {strides = array<i32>} : memref<16x128xf32, #tpu.memory_space<vmem>>, vector<16x128xf32>,
    %70 = arith.truncf %67 : vector<16x128xf32> to vector<16x128xbf16>
    %71 = arith.index_cast %c1_i32 : i32 to index
    %c0_39 = arith.constant 0 : index
    %c0_40 = arith.constant 0 : index
    %72 = vector.load %arg8[%71, %c0_39, %c0_40] : memref<8x16x128xbf16, #tpu.memory_space<vmem>>, vector<1x16x128xbf16>
    %73 = vector.shape_cast %72 : vector<1x16x128xbf16> to vector<16x128xbf16>
    %74 = vector.shape_cast %70 : vector<16x128xbf16> to vector<1x16x128xbf16>
    tpu.vector_store %arg8[%71, %c0_39, %c0_40], %74 {strides = array<i32>} : memref<8x16x128xbf16, #tpu.memory_space<vmem>>, vector<1x16x128xbf16>,
    %c2_i32 = arith.constant 2 : i32
    %c0_41 = arith.constant 0 : index
    %c0_42 = arith.constant 0 : index
    %75 = vector.load %arg12[%c0_41, %c0_42] : memref<16x128xf32, #tpu.memory_space<vmem>>, vector<16x128xf32>
    %c0_43 = arith.constant 0 : index
    %c0_44 = arith.constant 0 : index
    %76 = vector.load %arg13[%c0_43, %c0_44] : memref<16x128xf32, #tpu.memory_space<vmem>>, vector<16x128xf32>
    %77 = arith.index_cast %c2_i32 : i32 to index
    %c0_45 = arith.constant 0 : index
    %c0_46 = arith.constant 0 : index
    %78 = vector.load %arg11[%77, %c0_45, %c0_46] : memref<8x16x512xf32, #tpu.memory_space<vmem>>, vector<1x16x512xf32>
    %79 = vector.shape_cast %78 : vector<1x16x512xf32> to vector<16x512xf32>
    %80 = arith.truncf %75 : vector<16x128xf32> to vector<16x128xbf16>
    %cst_47 = arith.constant dense<0.000000e+00> : vector<16x512xf32>
    %81 = tpu.matmul %80, %12, %cst_47 {dimension_numbers = #tpu.dot_dimension_numbers<[1], [0], [0], [1], [0, 0, 1, 1], [], []>} : vector<16x128xbf16>, vector<128x512xbf16>, vector<16x512xf32> -> vector<16x512xf32>
    %82 = arith.addf %79, %81 : vector<16x512xf32>
    %83 = vector.extract_strided_slice %82 {offsets = [0, 0], sizes = [16, 384], strides = [1, 1]} : vector<16x512xf32> to vector<16x384xf32>
    %84 = arith.negf %83 : vector<16x384xf32>
    %85 = math.exp %84 : vector<16x384xf32>
    %cst_48 = arith.constant 1.000000e+00 : f32
    %86 = vector.broadcast %cst_48 : f32 to vector<16x384xf32>
    %87 = arith.addf %86, %85 : vector<16x384xf32>
    %88 = arith.divf %86, %87 : vector<16x384xf32>
    %89 = vector.extract_strided_slice %88 {offsets = [0, 0], sizes = [16, 128], strides = [1, 1]} : vector<16x384xf32> to vector<16x128xf32>
    %90 = vector.extract_strided_slice %88 {offsets = [0, 128], sizes = [16, 128], strides = [1, 1]} : vector<16x384xf32> to vector<16x128xf32>
    %91 = vector.extract_strided_slice %88 {offsets = [0, 256], sizes = [16, 128], strides = [1, 1]} : vector<16x384xf32> to vector<16x128xf32>
    %92 = vector.extract_strided_slice %82 {offsets = [0, 384], sizes = [16, 128], strides = [1, 1]} : vector<16x512xf32> to vector<16x128xf32>
    %93 = math.tanh %92 : vector<16x128xf32>
    %94 = arith.mulf %90, %76 : vector<16x128xf32>
    %95 = arith.mulf %89, %93 : vector<16x128xf32>
    %96 = arith.addf %94, %95 : vector<16x128xf32>
    %97 = math.tanh %96 : vector<16x128xf32>
    %98 = arith.mulf %91, %97 : vector<16x128xf32>
    %c0_49 = arith.constant 0 : index
    %c0_50 = arith.constant 0 : index
    %99 = vector.load %arg12[%c0_49, %c0_50] : memref<16x128xf32, #tpu.memory_space<vmem>>, vector<16x128xf32>
    tpu.vector_store %arg12[%c0_49, %c0_50], %98 {strides = array<i32>} : memref<16x128xf32, #tpu.memory_space<vmem>>, vector<16x128xf32>,
    %c0_51 = arith.constant 0 : index
    %c0_52 = arith.constant 0 : index
    %100 = vector.load %arg13[%c0_51, %c0_52] : memref<16x128xf32, #tpu.memory_space<vmem>>, vector<16x128xf32>
    tpu.vector_store %arg13[%c0_51, %c0_52], %96 {strides = array<i32>} : memref<16x128xf32, #tpu.memory_space<vmem>>, vector<16x128xf32>,
    %101 = arith.truncf %98 : vector<16x128xf32> to vector<16x128xbf16>
    %102 = arith.index_cast %c2_i32 : i32 to index
    %c0_53 = arith.constant 0 : index
    %c0_54 = arith.constant 0 : index
    %103 = vector.load %arg8[%102, %c0_53, %c0_54] : memref<8x16x128xbf16, #tpu.memory_space<vmem>>, vector<1x16x128xbf16>
    %104 = vector.shape_cast %103 : vector<1x16x128xbf16> to vector<16x128xbf16>
    %105 = vector.shape_cast %101 : vector<16x128xbf16> to vector<1x16x128xbf16>
    tpu.vector_store %arg8[%102, %c0_53, %c0_54], %105 {strides = array<i32>} : memref<8x16x128xbf16, #tpu.memory_space<vmem>>, vector<1x16x128xbf16>,
    %c3_i32 = arith.constant 3 : i32
    %c0_55 = arith.constant 0 : index
    %c0_56 = arith.constant 0 : index
    %106 = vector.load %arg12[%c0_55, %c0_56] : memref<16x128xf32, #tpu.memory_space<vmem>>, vector<16x128xf32>
    %c0_57 = arith.constant 0 : index
    %c0_58 = arith.constant 0 : index
    %107 = vector.load %arg13[%c0_57, %c0_58] : memref<16x128xf32, #tpu.memory_space<vmem>>, vector<16x128xf32>
    %108 = arith.index_cast %c3_i32 : i32 to index
    %c0_59 = arith.constant 0 : index
    %c0_60 = arith.constant 0 : index
    %109 = vector.load %arg11[%108, %c0_59, %c0_60] : memref<8x16x512xf32, #tpu.memory_space<vmem>>, vector<1x16x512xf32>
    %110 = vector.shape_cast %109 : vector<1x16x512xf32> to vector<16x512xf32>
    %111 = arith.truncf %106 : vector<16x128xf32> to vector<16x128xbf16>
    %cst_61 = arith.constant dense<0.000000e+00> : vector<16x512xf32>
    %112 = tpu.matmul %111, %12, %cst_61 {dimension_numbers = #tpu.dot_dimension_numbers<[1], [0], [0], [1], [0, 0, 1, 1], [], []>} : vector<16x128xbf16>, vector<128x512xbf16>, vector<16x512xf32> -> vector<16x512xf32>
    %113 = arith.addf %110, %112 : vector<16x512xf32>
    %114 = vector.extract_strided_slice %113 {offsets = [0, 0], sizes = [16, 384], strides = [1, 1]} : vector<16x512xf32> to vector<16x384xf32>
    %115 = arith.negf %114 : vector<16x384xf32>
    %116 = math.exp %115 : vector<16x384xf32>
    %cst_62 = arith.constant 1.000000e+00 : f32
    %117 = vector.broadcast %cst_62 : f32 to vector<16x384xf32>
    %118 = arith.addf %117, %116 : vector<16x384xf32>
    %119 = arith.divf %117, %118 : vector<16x384xf32>
    %120 = vector.extract_strided_slice %119 {offsets = [0, 0], sizes = [16, 128], strides = [1, 1]} : vector<16x384xf32> to vector<16x128xf32>
    %121 = vector.extract_strided_slice %119 {offsets = [0, 128], sizes = [16, 128], strides = [1, 1]} : vector<16x384xf32> to vector<16x128xf32>
    %122 = vector.extract_strided_slice %119 {offsets = [0, 256], sizes = [16, 128], strides = [1, 1]} : vector<16x384xf32> to vector<16x128xf32>
    %123 = vector.extract_strided_slice %113 {offsets = [0, 384], sizes = [16, 128], strides = [1, 1]} : vector<16x512xf32> to vector<16x128xf32>
    %124 = math.tanh %123 : vector<16x128xf32>
    %125 = arith.mulf %121, %107 : vector<16x128xf32>
    %126 = arith.mulf %120, %124 : vector<16x128xf32>
    %127 = arith.addf %125, %126 : vector<16x128xf32>
    %128 = math.tanh %127 : vector<16x128xf32>
    %129 = arith.mulf %122, %128 : vector<16x128xf32>
    %c0_63 = arith.constant 0 : index
    %c0_64 = arith.constant 0 : index
    %130 = vector.load %arg12[%c0_63, %c0_64] : memref<16x128xf32, #tpu.memory_space<vmem>>, vector<16x128xf32>
    tpu.vector_store %arg12[%c0_63, %c0_64], %129 {strides = array<i32>} : memref<16x128xf32, #tpu.memory_space<vmem>>, vector<16x128xf32>,
    %c0_65 = arith.constant 0 : index
    %c0_66 = arith.constant 0 : index
    %131 = vector.load %arg13[%c0_65, %c0_66] : memref<16x128xf32, #tpu.memory_space<vmem>>, vector<16x128xf32>
    tpu.vector_store %arg13[%c0_65, %c0_66], %127 {strides = array<i32>} : memref<16x128xf32, #tpu.memory_space<vmem>>, vector<16x128xf32>,
    %132 = arith.truncf %129 : vector<16x128xf32> to vector<16x128xbf16>
    %133 = arith.index_cast %c3_i32 : i32 to index
    %c0_67 = arith.constant 0 : index
    %c0_68 = arith.constant 0 : index
    %134 = vector.load %arg8[%133, %c0_67, %c0_68] : memref<8x16x128xbf16, #tpu.memory_space<vmem>>, vector<1x16x128xbf16>
    %135 = vector.shape_cast %134 : vector<1x16x128xbf16> to vector<16x128xbf16>
    %136 = vector.shape_cast %132 : vector<16x128xbf16> to vector<1x16x128xbf16>
    tpu.vector_store %arg8[%133, %c0_67, %c0_68], %136 {strides = array<i32>} : memref<8x16x128xbf16, #tpu.memory_space<vmem>>, vector<1x16x128xbf16>,
    %c4_i32 = arith.constant 4 : i32
    %c0_69 = arith.constant 0 : index
    %c0_70 = arith.constant 0 : index
    %137 = vector.load %arg12[%c0_69, %c0_70] : memref<16x128xf32, #tpu.memory_space<vmem>>, vector<16x128xf32>
    %c0_71 = arith.constant 0 : index
    %c0_72 = arith.constant 0 : index
    %138 = vector.load %arg13[%c0_71, %c0_72] : memref<16x128xf32, #tpu.memory_space<vmem>>, vector<16x128xf32>
    %139 = arith.index_cast %c4_i32 : i32 to index
    %c0_73 = arith.constant 0 : index
    %c0_74 = arith.constant 0 : index
    %140 = vector.load %arg11[%139, %c0_73, %c0_74] : memref<8x16x512xf32, #tpu.memory_space<vmem>>, vector<1x16x512xf32>
    %141 = vector.shape_cast %140 : vector<1x16x512xf32> to vector<16x512xf32>
    %142 = arith.truncf %137 : vector<16x128xf32> to vector<16x128xbf16>
    %cst_75 = arith.constant dense<0.000000e+00> : vector<16x512xf32>
    %143 = tpu.matmul %142, %12, %cst_75 {dimension_numbers = #tpu.dot_dimension_numbers<[1], [0], [0], [1], [0, 0, 1, 1], [], []>} : vector<16x128xbf16>, vector<128x512xbf16>, vector<16x512xf32> -> vector<16x512xf32>
    %144 = arith.addf %141, %143 : vector<16x512xf32>
    %145 = vector.extract_strided_slice %144 {offsets = [0, 0], sizes = [16, 384], strides = [1, 1]} : vector<16x512xf32> to vector<16x384xf32>
    %146 = arith.negf %145 : vector<16x384xf32>
    %147 = math.exp %146 : vector<16x384xf32>
    %cst_76 = arith.constant 1.000000e+00 : f32
    %148 = vector.broadcast %cst_76 : f32 to vector<16x384xf32>
    %149 = arith.addf %148, %147 : vector<16x384xf32>
    %150 = arith.divf %148, %149 : vector<16x384xf32>
    %151 = vector.extract_strided_slice %150 {offsets = [0, 0], sizes = [16, 128], strides = [1, 1]} : vector<16x384xf32> to vector<16x128xf32>
    %152 = vector.extract_strided_slice %150 {offsets = [0, 128], sizes = [16, 128], strides = [1, 1]} : vector<16x384xf32> to vector<16x128xf32>
    %153 = vector.extract_strided_slice %150 {offsets = [0, 256], sizes = [16, 128], strides = [1, 1]} : vector<16x384xf32> to vector<16x128xf32>
    %154 = vector.extract_strided_slice %144 {offsets = [0, 384], sizes = [16, 128], strides = [1, 1]} : vector<16x512xf32> to vector<16x128xf32>
    %155 = math.tanh %154 : vector<16x128xf32>
    %156 = arith.mulf %152, %138 : vector<16x128xf32>
    %157 = arith.mulf %151, %155 : vector<16x128xf32>
    %158 = arith.addf %156, %157 : vector<16x128xf32>
    %159 = math.tanh %158 : vector<16x128xf32>
    %160 = arith.mulf %153, %159 : vector<16x128xf32>
    %c0_77 = arith.constant 0 : index
    %c0_78 = arith.constant 0 : index
    %161 = vector.load %arg12[%c0_77, %c0_78] : memref<16x128xf32, #tpu.memory_space<vmem>>, vector<16x128xf32>
    tpu.vector_store %arg12[%c0_77, %c0_78], %160 {strides = array<i32>} : memref<16x128xf32, #tpu.memory_space<vmem>>, vector<16x128xf32>,
    %c0_79 = arith.constant 0 : index
    %c0_80 = arith.constant 0 : index
    %162 = vector.load %arg13[%c0_79, %c0_80] : memref<16x128xf32, #tpu.memory_space<vmem>>, vector<16x128xf32>
    tpu.vector_store %arg13[%c0_79, %c0_80], %158 {strides = array<i32>} : memref<16x128xf32, #tpu.memory_space<vmem>>, vector<16x128xf32>,
    %163 = arith.truncf %160 : vector<16x128xf32> to vector<16x128xbf16>
    %164 = arith.index_cast %c4_i32 : i32 to index
    %c0_81 = arith.constant 0 : index
    %c0_82 = arith.constant 0 : index
    %165 = vector.load %arg8[%164, %c0_81, %c0_82] : memref<8x16x128xbf16, #tpu.memory_space<vmem>>, vector<1x16x128xbf16>
    %166 = vector.shape_cast %165 : vector<1x16x128xbf16> to vector<16x128xbf16>
    %167 = vector.shape_cast %163 : vector<16x128xbf16> to vector<1x16x128xbf16>
    tpu.vector_store %arg8[%164, %c0_81, %c0_82], %167 {strides = array<i32>} : memref<8x16x128xbf16, #tpu.memory_space<vmem>>, vector<1x16x128xbf16>,
    %c5_i32 = arith.constant 5 : i32
    %c0_83 = arith.constant 0 : index
    %c0_84 = arith.constant 0 : index
    %168 = vector.load %arg12[%c0_83, %c0_84] : memref<16x128xf32, #tpu.memory_space<vmem>>, vector<16x128xf32>
    %c0_85 = arith.constant 0 : index
    %c0_86 = arith.constant 0 : index
    %169 = vector.load %arg13[%c0_85, %c0_86] : memref<16x128xf32, #tpu.memory_space<vmem>>, vector<16x128xf32>
    %170 = arith.index_cast %c5_i32 : i32 to index
    %c0_87 = arith.constant 0 : index
    %c0_88 = arith.constant 0 : index
    %171 = vector.load %arg11[%170, %c0_87, %c0_88] : memref<8x16x512xf32, #tpu.memory_space<vmem>>, vector<1x16x512xf32>
    %172 = vector.shape_cast %171 : vector<1x16x512xf32> to vector<16x512xf32>
    %173 = arith.truncf %168 : vector<16x128xf32> to vector<16x128xbf16>
    %cst_89 = arith.constant dense<0.000000e+00> : vector<16x512xf32>
    %174 = tpu.matmul %173, %12, %cst_89 {dimension_numbers = #tpu.dot_dimension_numbers<[1], [0], [0], [1], [0, 0, 1, 1], [], []>} : vector<16x128xbf16>, vector<128x512xbf16>, vector<16x512xf32> -> vector<16x512xf32>
    %175 = arith.addf %172, %174 : vector<16x512xf32>
    %176 = vector.extract_strided_slice %175 {offsets = [0, 0], sizes = [16, 384], strides = [1, 1]} : vector<16x512xf32> to vector<16x384xf32>
    %177 = arith.negf %176 : vector<16x384xf32>
    %178 = math.exp %177 : vector<16x384xf32>
    %cst_90 = arith.constant 1.000000e+00 : f32
    %179 = vector.broadcast %cst_90 : f32 to vector<16x384xf32>
    %180 = arith.addf %179, %178 : vector<16x384xf32>
    %181 = arith.divf %179, %180 : vector<16x384xf32>
    %182 = vector.extract_strided_slice %181 {offsets = [0, 0], sizes = [16, 128], strides = [1, 1]} : vector<16x384xf32> to vector<16x128xf32>
    %183 = vector.extract_strided_slice %181 {offsets = [0, 128], sizes = [16, 128], strides = [1, 1]} : vector<16x384xf32> to vector<16x128xf32>
    %184 = vector.extract_strided_slice %181 {offsets = [0, 256], sizes = [16, 128], strides = [1, 1]} : vector<16x384xf32> to vector<16x128xf32>
    %185 = vector.extract_strided_slice %175 {offsets = [0, 384], sizes = [16, 128], strides = [1, 1]} : vector<16x512xf32> to vector<16x128xf32>
    %186 = math.tanh %185 : vector<16x128xf32>
    %187 = arith.mulf %183, %169 : vector<16x128xf32>
    %188 = arith.mulf %182, %186 : vector<16x128xf32>
    %189 = arith.addf %187, %188 : vector<16x128xf32>
    %190 = math.tanh %189 : vector<16x128xf32>
    %191 = arith.mulf %184, %190 : vector<16x128xf32>
    %c0_91 = arith.constant 0 : index
    %c0_92 = arith.constant 0 : index
    %192 = vector.load %arg12[%c0_91, %c0_92] : memref<16x128xf32, #tpu.memory_space<vmem>>, vector<16x128xf32>
    tpu.vector_store %arg12[%c0_91, %c0_92], %191 {strides = array<i32>} : memref<16x128xf32, #tpu.memory_space<vmem>>, vector<16x128xf32>,
    %c0_93 = arith.constant 0 : index
    %c0_94 = arith.constant 0 : index
    %193 = vector.load %arg13[%c0_93, %c0_94] : memref<16x128xf32, #tpu.memory_space<vmem>>, vector<16x128xf32>
    tpu.vector_store %arg13[%c0_93, %c0_94], %189 {strides = array<i32>} : memref<16x128xf32, #tpu.memory_space<vmem>>, vector<16x128xf32>,
    %194 = arith.truncf %191 : vector<16x128xf32> to vector<16x128xbf16>
    %195 = arith.index_cast %c5_i32 : i32 to index
    %c0_95 = arith.constant 0 : index
    %c0_96 = arith.constant 0 : index
    %196 = vector.load %arg8[%195, %c0_95, %c0_96] : memref<8x16x128xbf16, #tpu.memory_space<vmem>>, vector<1x16x128xbf16>
    %197 = vector.shape_cast %196 : vector<1x16x128xbf16> to vector<16x128xbf16>
    %198 = vector.shape_cast %194 : vector<16x128xbf16> to vector<1x16x128xbf16>
    tpu.vector_store %arg8[%195, %c0_95, %c0_96], %198 {strides = array<i32>} : memref<8x16x128xbf16, #tpu.memory_space<vmem>>, vector<1x16x128xbf16>,
    %c6_i32 = arith.constant 6 : i32
    %c0_97 = arith.constant 0 : index
    %c0_98 = arith.constant 0 : index
    %199 = vector.load %arg12[%c0_97, %c0_98] : memref<16x128xf32, #tpu.memory_space<vmem>>, vector<16x128xf32>
    %c0_99 = arith.constant 0 : index
    %c0_100 = arith.constant 0 : index
    %200 = vector.load %arg13[%c0_99, %c0_100] : memref<16x128xf32, #tpu.memory_space<vmem>>, vector<16x128xf32>
    %201 = arith.index_cast %c6_i32 : i32 to index
    %c0_101 = arith.constant 0 : index
    %c0_102 = arith.constant 0 : index
    %202 = vector.load %arg11[%201, %c0_101, %c0_102] : memref<8x16x512xf32, #tpu.memory_space<vmem>>, vector<1x16x512xf32>
    %203 = vector.shape_cast %202 : vector<1x16x512xf32> to vector<16x512xf32>
    %204 = arith.truncf %199 : vector<16x128xf32> to vector<16x128xbf16>
    %cst_103 = arith.constant dense<0.000000e+00> : vector<16x512xf32>
    %205 = tpu.matmul %204, %12, %cst_103 {dimension_numbers = #tpu.dot_dimension_numbers<[1], [0], [0], [1], [0, 0, 1, 1], [], []>} : vector<16x128xbf16>, vector<128x512xbf16>, vector<16x512xf32> -> vector<16x512xf32>
    %206 = arith.addf %203, %205 : vector<16x512xf32>
    %207 = vector.extract_strided_slice %206 {offsets = [0, 0], sizes = [16, 384], strides = [1, 1]} : vector<16x512xf32> to vector<16x384xf32>
    %208 = arith.negf %207 : vector<16x384xf32>
    %209 = math.exp %208 : vector<16x384xf32>
    %cst_104 = arith.constant 1.000000e+00 : f32
    %210 = vector.broadcast %cst_104 : f32 to vector<16x384xf32>
    %211 = arith.addf %210, %209 : vector<16x384xf32>
    %212 = arith.divf %210, %211 : vector<16x384xf32>
    %213 = vector.extract_strided_slice %212 {offsets = [0, 0], sizes = [16, 128], strides = [1, 1]} : vector<16x384xf32> to vector<16x128xf32>
    %214 = vector.extract_strided_slice %212 {offsets = [0, 128], sizes = [16, 128], strides = [1, 1]} : vector<16x384xf32> to vector<16x128xf32>
    %215 = vector.extract_strided_slice %212 {offsets = [0, 256], sizes = [16, 128], strides = [1, 1]} : vector<16x384xf32> to vector<16x128xf32>
    %216 = vector.extract_strided_slice %206 {offsets = [0, 384], sizes = [16, 128], strides = [1, 1]} : vector<16x512xf32> to vector<16x128xf32>
    %217 = math.tanh %216 : vector<16x128xf32>
    %218 = arith.mulf %214, %200 : vector<16x128xf32>
    %219 = arith.mulf %213, %217 : vector<16x128xf32>
    %220 = arith.addf %218, %219 : vector<16x128xf32>
    %221 = math.tanh %220 : vector<16x128xf32>
    %222 = arith.mulf %215, %221 : vector<16x128xf32>
    %c0_105 = arith.constant 0 : index
    %c0_106 = arith.constant 0 : index
    %223 = vector.load %arg12[%c0_105, %c0_106] : memref<16x128xf32, #tpu.memory_space<vmem>>, vector<16x128xf32>
    tpu.vector_store %arg12[%c0_105, %c0_106], %222 {strides = array<i32>} : memref<16x128xf32, #tpu.memory_space<vmem>>, vector<16x128xf32>,
    %c0_107 = arith.constant 0 : index
    %c0_108 = arith.constant 0 : index
    %224 = vector.load %arg13[%c0_107, %c0_108] : memref<16x128xf32, #tpu.memory_space<vmem>>, vector<16x128xf32>
    tpu.vector_store %arg13[%c0_107, %c0_108], %220 {strides = array<i32>} : memref<16x128xf32, #tpu.memory_space<vmem>>, vector<16x128xf32>,
    %225 = arith.truncf %222 : vector<16x128xf32> to vector<16x128xbf16>
    %226 = arith.index_cast %c6_i32 : i32 to index
    %c0_109 = arith.constant 0 : index
    %c0_110 = arith.constant 0 : index
    %227 = vector.load %arg8[%226, %c0_109, %c0_110] : memref<8x16x128xbf16, #tpu.memory_space<vmem>>, vector<1x16x128xbf16>
    %228 = vector.shape_cast %227 : vector<1x16x128xbf16> to vector<16x128xbf16>
    %229 = vector.shape_cast %225 : vector<16x128xbf16> to vector<1x16x128xbf16>
    tpu.vector_store %arg8[%226, %c0_109, %c0_110], %229 {strides = array<i32>} : memref<8x16x128xbf16, #tpu.memory_space<vmem>>, vector<1x16x128xbf16>,
    %c7_i32 = arith.constant 7 : i32
    %c0_111 = arith.constant 0 : index
    %c0_112 = arith.constant 0 : index
    %230 = vector.load %arg12[%c0_111, %c0_112] : memref<16x128xf32, #tpu.memory_space<vmem>>, vector<16x128xf32>
    %c0_113 = arith.constant 0 : index
    %c0_114 = arith.constant 0 : index
    %231 = vector.load %arg13[%c0_113, %c0_114] : memref<16x128xf32, #tpu.memory_space<vmem>>, vector<16x128xf32>
    %232 = arith.index_cast %c7_i32 : i32 to index
    %c0_115 = arith.constant 0 : index
    %c0_116 = arith.constant 0 : index
    %233 = vector.load %arg11[%232, %c0_115, %c0_116] : memref<8x16x512xf32, #tpu.memory_space<vmem>>, vector<1x16x512xf32>
    %234 = vector.shape_cast %233 : vector<1x16x512xf32> to vector<16x512xf32>
    %235 = arith.truncf %230 : vector<16x128xf32> to vector<16x128xbf16>
    %cst_117 = arith.constant dense<0.000000e+00> : vector<16x512xf32>
    %236 = tpu.matmul %235, %12, %cst_117 {dimension_numbers = #tpu.dot_dimension_numbers<[1], [0], [0], [1], [0, 0, 1, 1], [], []>} : vector<16x128xbf16>, vector<128x512xbf16>, vector<16x512xf32> -> vector<16x512xf32>
    %237 = arith.addf %234, %236 : vector<16x512xf32>
    %238 = vector.extract_strided_slice %237 {offsets = [0, 0], sizes = [16, 384], strides = [1, 1]} : vector<16x512xf32> to vector<16x384xf32>
    %239 = arith.negf %238 : vector<16x384xf32>
    %240 = math.exp %239 : vector<16x384xf32>
    %cst_118 = arith.constant 1.000000e+00 : f32
    %241 = vector.broadcast %cst_118 : f32 to vector<16x384xf32>
    %242 = arith.addf %241, %240 : vector<16x384xf32>
    %243 = arith.divf %241, %242 : vector<16x384xf32>
    %244 = vector.extract_strided_slice %243 {offsets = [0, 0], sizes = [16, 128], strides = [1, 1]} : vector<16x384xf32> to vector<16x128xf32>
    %245 = vector.extract_strided_slice %243 {offsets = [0, 128], sizes = [16, 128], strides = [1, 1]} : vector<16x384xf32> to vector<16x128xf32>
    %246 = vector.extract_strided_slice %243 {offsets = [0, 256], sizes = [16, 128], strides = [1, 1]} : vector<16x384xf32> to vector<16x128xf32>
    %247 = vector.extract_strided_slice %237 {offsets = [0, 384], sizes = [16, 128], strides = [1, 1]} : vector<16x512xf32> to vector<16x128xf32>
    %248 = math.tanh %247 : vector<16x128xf32>
    %249 = arith.mulf %245, %231 : vector<16x128xf32>
    %250 = arith.mulf %244, %248 : vector<16x128xf32>
    %251 = arith.addf %249, %250 : vector<16x128xf32>
    %252 = math.tanh %251 : vector<16x128xf32>
    %253 = arith.mulf %246, %252 : vector<16x128xf32>
    %c0_119 = arith.constant 0 : index
    %c0_120 = arith.constant 0 : index
    %254 = vector.load %arg12[%c0_119, %c0_120] : memref<16x128xf32, #tpu.memory_space<vmem>>, vector<16x128xf32>
    tpu.vector_store %arg12[%c0_119, %c0_120], %253 {strides = array<i32>} : memref<16x128xf32, #tpu.memory_space<vmem>>, vector<16x128xf32>,
    %c0_121 = arith.constant 0 : index
    %c0_122 = arith.constant 0 : index
    %255 = vector.load %arg13[%c0_121, %c0_122] : memref<16x128xf32, #tpu.memory_space<vmem>>, vector<16x128xf32>
    tpu.vector_store %arg13[%c0_121, %c0_122], %251 {strides = array<i32>} : memref<16x128xf32, #tpu.memory_space<vmem>>, vector<16x128xf32>,
    %256 = arith.truncf %253 : vector<16x128xf32> to vector<16x128xbf16>
    %257 = arith.index_cast %c7_i32 : i32 to index
    %c0_123 = arith.constant 0 : index
    %c0_124 = arith.constant 0 : index
    %258 = vector.load %arg8[%257, %c0_123, %c0_124] : memref<8x16x128xbf16, #tpu.memory_space<vmem>>, vector<1x16x128xbf16>
    %259 = vector.shape_cast %258 : vector<1x16x128xbf16> to vector<16x128xbf16>
    %260 = vector.shape_cast %256 : vector<16x128xbf16> to vector<1x16x128xbf16>
    tpu.vector_store %arg8[%257, %c0_123, %c0_124], %260 {strides = array<i32>} : memref<8x16x128xbf16, #tpu.memory_space<vmem>>, vector<1x16x128xbf16>,
    %c8_i32 = arith.constant 8 : i32
    %c0_125 = arith.constant 0 : index
    %c0_126 = arith.constant 0 : index
    %261 = vector.load %arg12[%c0_125, %c0_126] : memref<16x128xf32, #tpu.memory_space<vmem>>, vector<16x128xf32>
    %c0_127 = arith.constant 0 : index
    %c0_128 = arith.constant 0 : index
    %262 = vector.load %arg9[%c0_127, %c0_128] : memref<16x128xf32, #tpu.memory_space<vmem>>, vector<16x128xf32>
    tpu.vector_store %arg9[%c0_127, %c0_128], %261 {strides = array<i32>} : memref<16x128xf32, #tpu.memory_space<vmem>>, vector<16x128xf32>,
    %c0_129 = arith.constant 0 : index
    %c0_130 = arith.constant 0 : index
    %263 = vector.load %arg13[%c0_129, %c0_130] : memref<16x128xf32, #tpu.memory_space<vmem>>, vector<16x128xf32>
    %c0_131 = arith.constant 0 : index
    %c0_132 = arith.constant 0 : index
    %264 = vector.load %arg10[%c0_131, %c0_132] : memref<16x128xf32, #tpu.memory_space<vmem>>, vector<16x128xf32>
    tpu.vector_store %arg10[%c0_131, %c0_132], %263 {strides = array<i32>} : memref<16x128xf32, #tpu.memory_space<vmem>>, vector<16x128xf32>,
    return
  }
  func.func @transform_0(%arg0: i32, %arg1: i32) -> (i32, i32, i32) {
    %c0_i32 = arith.constant 0 : i32
    %c0_i32_0 = arith.constant 0 : i32
    return %arg1, %arg0, %c0_i32 : i32, i32, i32
  }
  func.func @transform_1(%arg0: i32, %arg1: i32) -> (i32, i32) {
    %c0_i32 = arith.constant 0 : i32
    %c0_i32_0 = arith.constant 0 : i32
    return %arg0, %c0_i32 : i32, i32
  }
  func.func @transform_2(%arg0: i32, %arg1: i32) -> (i32, i32) {
    %c0_i32 = arith.constant 0 : i32
    %c0_i32_0 = arith.constant 0 : i32
    return %arg0, %c0_i32 : i32, i32
  }
  func.func @transform_3(%arg0: i32, %arg1: i32) -> (i32, i32) {
    %c0_i32 = arith.constant 0 : i32
    %c0_i32_0 = arith.constant 0 : i32
    %c0_i32_1 = arith.constant 0 : i32
    return %c0_i32, %c0_i32_0 : i32, i32
  }
  func.func @transform_4(%arg0: i32, %arg1: i32) -> (i32, i32) {
    %c0_i32 = arith.constant 0 : i32
    %c0_i32_0 = arith.constant 0 : i32
    %c0_i32_1 = arith.constant 0 : i32
    return %c0_i32, %c0_i32_0 : i32, i32
  }
  func.func @transform_5(%arg0: i32, %arg1: i32) -> (i32, i32) {
    %c0_i32 = arith.constant 0 : i32
    %c0_i32_0 = arith.constant 0 : i32
    %c0_i32_1 = arith.constant 0 : i32
    return %c0_i32, %c0_i32_0 : i32, i32
  }
  func.func @transform_6(%arg0: i32, %arg1: i32) -> (i32, i32, i32) {
    %c0_i32 = arith.constant 0 : i32
    %c0_i32_0 = arith.constant 0 : i32
    return %arg1, %arg0, %c0_i32 : i32, i32, i32
  }
  func.func @transform_7(%arg0: i32, %arg1: i32) -> (i32, i32) {
    %c0_i32 = arith.constant 0 : i32
    %c0_i32_0 = arith.constant 0 : i32
    return %arg0, %c0_i32 : i32, i32
  }
  func.func @transform_8(%arg0: i32, %arg1: i32) -> (i32, i32) {
    %c0_i32 = arith.constant 0 : i32
    %c0_i32_0 = arith.constant 0 : i32
    return %arg0, %c0_i32 : i32, i32
  }
}

module attributes {stable_mosaic.version = 11 : i64} {
  func.func @lstm_last_layer_kernel(%arg0: i32, %arg1: i32, %arg2: memref<8x16x128xbf16, #tpu.memory_space<vmem>>, %arg3: memref<16x128xf32, #tpu.memory_space<vmem>>, %arg4: memref<16x128xf32, #tpu.memory_space<vmem>>, %arg5: memref<128x512xbf16, #tpu.memory_space<vmem>>, %arg6: memref<128x512xbf16, #tpu.memory_space<vmem>>, %arg7: memref<1x512xf32, #tpu.memory_space<vmem>>, %arg8: memref<1x128xf32, #tpu.memory_space<vmem>>, %arg9: memref<1x1xf32, #tpu.memory_space<vmem>>, %arg10: memref<16x1xf32, #tpu.memory_space<vmem>>, %arg11: memref<16x128xf32, #tpu.memory_space<vmem>>, %arg12: memref<16x128xf32, #tpu.memory_space<vmem>>, %arg13: memref<8x16x512xf32, #tpu.memory_space<vmem>>, %arg14: memref<16x128xf32, #tpu.memory_space<vmem>>, %arg15: memref<16x128xf32, #tpu.memory_space<vmem>>) attributes {dimension_semantics = [#tpu.dimension_semantics<parallel>, #tpu.dimension_semantics<arbitrary>], iteration_bounds = array<i64: 1, 1>, scalar_prefetch = 0 : i64, scratch_operands = 3 : i64, tpu.core_type = #tpu.core_type<tc>, window_params = [{transform_indices = @transform_0, window_bounds = array<i64: 8, 16, 128>}, {transform_indices = @transform_1, window_bounds = array<i64: 16, 128>}, {transform_indices = @transform_2, window_bounds = array<i64: 16, 128>}, {pipeline_mode = #tpu.pipeline_mode<synchronous>, transform_indices = @transform_3, window_bounds = array<i64: 128, 512>}, {pipeline_mode = #tpu.pipeline_mode<synchronous>, transform_indices = @transform_4, window_bounds = array<i64: 128, 512>}, {pipeline_mode = #tpu.pipeline_mode<synchronous>, transform_indices = @transform_5, window_bounds = array<i64: 1, 512>}, {pipeline_mode = #tpu.pipeline_mode<synchronous>, transform_indices = @transform_6, window_bounds = array<i64: 1, 128>}, {pipeline_mode = #tpu.pipeline_mode<synchronous>, transform_indices = @transform_7, window_bounds = array<i64: 1, 1>}, {transform_indices = @transform_8, window_bounds = array<i64: 16, 1>}, {transform_indices = @transform_9, window_bounds = array<i64: 16, 128>}, {transform_indices = @transform_10, window_bounds = array<i64: 16, 128>}]} {
    %c0_i32 = arith.constant 0 : i32
    %0 = arith.cmpi eq, %arg1, %c0_i32 : i32
    %1 = arith.extui %0 : i1 to i32
    %c0_i32_0 = arith.constant 0 : i32
    %2 = arith.cmpi ne, %1, %c0_i32_0 : i32
    scf.if %2 {
      %c0_125 = arith.constant 0 : index
      %c0_126 = arith.constant 0 : index
      %239 = vector.load %arg3[%c0_125, %c0_126] : memref<16x128xf32, #tpu.memory_space<vmem>>, vector<16x128xf32>
      %c0_127 = arith.constant 0 : index
      %c0_128 = arith.constant 0 : index
      %240 = vector.load %arg14[%c0_127, %c0_128] : memref<16x128xf32, #tpu.memory_space<vmem>>, vector<16x128xf32>
      tpu.vector_store %arg14[%c0_127, %c0_128], %239 {strides = array<i32>} : memref<16x128xf32, #tpu.memory_space<vmem>>, vector<16x128xf32>,
      %c0_129 = arith.constant 0 : index
      %c0_130 = arith.constant 0 : index
      %241 = vector.load %arg4[%c0_129, %c0_130] : memref<16x128xf32, #tpu.memory_space<vmem>>, vector<16x128xf32>
      %c0_131 = arith.constant 0 : index
      %c0_132 = arith.constant 0 : index
      %242 = vector.load %arg15[%c0_131, %c0_132] : memref<16x128xf32, #tpu.memory_space<vmem>>, vector<16x128xf32>
      tpu.vector_store %arg15[%c0_131, %c0_132], %241 {strides = array<i32>} : memref<16x128xf32, #tpu.memory_space<vmem>>, vector<16x128xf32>,
    } else {
    }
    %c0 = arith.constant 0 : index
    %c0_1 = arith.constant 0 : index
    %c0_2 = arith.constant 0 : index
    %3 = vector.load %arg2[%c0, %c0_1, %c0_2] : memref<8x16x128xbf16, #tpu.memory_space<vmem>>, vector<8x16x128xbf16>
    %4 = vector.shape_cast %3 : vector<8x16x128xbf16> to vector<128x128xbf16>
    %c0_3 = arith.constant 0 : index
    %c0_4 = arith.constant 0 : index
    %5 = vector.load %arg5[%c0_3, %c0_4] : memref<128x512xbf16, #tpu.memory_space<vmem>>, vector<128x512xbf16>
    %cst = arith.constant dense<0.000000e+00> : vector<128x512xf32>
    %6 = tpu.matmul %4, %5, %cst {dimension_numbers = #tpu.dot_dimension_numbers<[1], [0], [0], [1], [0, 0, 1, 1], [], []>} : vector<128x128xbf16>, vector<128x512xbf16>, vector<128x512xf32> -> vector<128x512xf32>
    %c0_5 = arith.constant 0 : index
    %c0_6 = arith.constant 0 : index
    %7 = vector.load %arg7[%c0_5, %c0_6] : memref<1x512xf32, #tpu.memory_space<vmem>>, vector<1x512xf32>
    %8 = vector.broadcast %7 : vector<1x512xf32> to vector<128x512xf32>
    %9 = arith.addf %6, %8 : vector<128x512xf32>
    %10 = vector.shape_cast %9 : vector<128x512xf32> to vector<8x16x512xf32>
    %c0_7 = arith.constant 0 : index
    %c0_8 = arith.constant 0 : index
    %c0_9 = arith.constant 0 : index
    %11 = vector.load %arg13[%c0_7, %c0_8, %c0_9] : memref<8x16x512xf32, #tpu.memory_space<vmem>>, vector<8x16x512xf32>
    tpu.vector_store %arg13[%c0_7, %c0_8, %c0_9], %10 {strides = array<i32>} : memref<8x16x512xf32, #tpu.memory_space<vmem>>, vector<8x16x512xf32>,
    %c0_10 = arith.constant 0 : index
    %c0_11 = arith.constant 0 : index
    %12 = vector.load %arg6[%c0_10, %c0_11] : memref<128x512xbf16, #tpu.memory_space<vmem>>, vector<128x512xbf16>
    %c0_i32_12 = arith.constant 0 : i32
    %c0_13 = arith.constant 0 : index
    %c0_14 = arith.constant 0 : index
    %13 = vector.load %arg14[%c0_13, %c0_14] : memref<16x128xf32, #tpu.memory_space<vmem>>, vector<16x128xf32>
    %c0_15 = arith.constant 0 : index
    %c0_16 = arith.constant 0 : index
    %14 = vector.load %arg15[%c0_15, %c0_16] : memref<16x128xf32, #tpu.memory_space<vmem>>, vector<16x128xf32>
    %15 = arith.index_cast %c0_i32_12 : i32 to index
    %c0_17 = arith.constant 0 : index
    %c0_18 = arith.constant 0 : index
    %16 = vector.load %arg13[%15, %c0_17, %c0_18] : memref<8x16x512xf32, #tpu.memory_space<vmem>>, vector<1x16x512xf32>
    %17 = vector.shape_cast %16 : vector<1x16x512xf32> to vector<16x512xf32>
    %18 = arith.truncf %13 : vector<16x128xf32> to vector<16x128xbf16>
    %cst_19 = arith.constant dense<0.000000e+00> : vector<16x512xf32>
    %19 = tpu.matmul %18, %12, %cst_19 {dimension_numbers = #tpu.dot_dimension_numbers<[1], [0], [0], [1], [0, 0, 1, 1], [], []>} : vector<16x128xbf16>, vector<128x512xbf16>, vector<16x512xf32> -> vector<16x512xf32>
    %20 = arith.addf %17, %19 : vector<16x512xf32>
    %21 = vector.extract_strided_slice %20 {offsets = [0, 0], sizes = [16, 384], strides = [1, 1]} : vector<16x512xf32> to vector<16x384xf32>
    %22 = arith.negf %21 : vector<16x384xf32>
    %23 = math.exp %22 : vector<16x384xf32>
    %cst_20 = arith.constant 1.000000e+00 : f32
    %24 = vector.broadcast %cst_20 : f32 to vector<16x384xf32>
    %25 = arith.addf %24, %23 : vector<16x384xf32>
    %26 = arith.divf %24, %25 : vector<16x384xf32>
    %27 = vector.extract_strided_slice %26 {offsets = [0, 0], sizes = [16, 128], strides = [1, 1]} : vector<16x384xf32> to vector<16x128xf32>
    %28 = vector.extract_strided_slice %26 {offsets = [0, 128], sizes = [16, 128], strides = [1, 1]} : vector<16x384xf32> to vector<16x128xf32>
    %29 = vector.extract_strided_slice %26 {offsets = [0, 256], sizes = [16, 128], strides = [1, 1]} : vector<16x384xf32> to vector<16x128xf32>
    %30 = vector.extract_strided_slice %20 {offsets = [0, 384], sizes = [16, 128], strides = [1, 1]} : vector<16x512xf32> to vector<16x128xf32>
    %31 = math.tanh %30 : vector<16x128xf32>
    %32 = arith.mulf %28, %14 : vector<16x128xf32>
    %33 = arith.mulf %27, %31 : vector<16x128xf32>
    %34 = arith.addf %32, %33 : vector<16x128xf32>
    %35 = math.tanh %34 : vector<16x128xf32>
    %36 = arith.mulf %29, %35 : vector<16x128xf32>
    %c0_21 = arith.constant 0 : index
    %c0_22 = arith.constant 0 : index
    %37 = vector.load %arg14[%c0_21, %c0_22] : memref<16x128xf32, #tpu.memory_space<vmem>>, vector<16x128xf32>
    tpu.vector_store %arg14[%c0_21, %c0_22], %36 {strides = array<i32>} : memref<16x128xf32, #tpu.memory_space<vmem>>, vector<16x128xf32>,
    %c0_23 = arith.constant 0 : index
    %c0_24 = arith.constant 0 : index
    %38 = vector.load %arg15[%c0_23, %c0_24] : memref<16x128xf32, #tpu.memory_space<vmem>>, vector<16x128xf32>
    tpu.vector_store %arg15[%c0_23, %c0_24], %34 {strides = array<i32>} : memref<16x128xf32, #tpu.memory_space<vmem>>, vector<16x128xf32>,
    %c1_i32 = arith.constant 1 : i32
    %c0_25 = arith.constant 0 : index
    %c0_26 = arith.constant 0 : index
    %39 = vector.load %arg14[%c0_25, %c0_26] : memref<16x128xf32, #tpu.memory_space<vmem>>, vector<16x128xf32>
    %c0_27 = arith.constant 0 : index
    %c0_28 = arith.constant 0 : index
    %40 = vector.load %arg15[%c0_27, %c0_28] : memref<16x128xf32, #tpu.memory_space<vmem>>, vector<16x128xf32>
    %41 = arith.index_cast %c1_i32 : i32 to index
    %c0_29 = arith.constant 0 : index
    %c0_30 = arith.constant 0 : index
    %42 = vector.load %arg13[%41, %c0_29, %c0_30] : memref<8x16x512xf32, #tpu.memory_space<vmem>>, vector<1x16x512xf32>
    %43 = vector.shape_cast %42 : vector<1x16x512xf32> to vector<16x512xf32>
    %44 = arith.truncf %39 : vector<16x128xf32> to vector<16x128xbf16>
    %cst_31 = arith.constant dense<0.000000e+00> : vector<16x512xf32>
    %45 = tpu.matmul %44, %12, %cst_31 {dimension_numbers = #tpu.dot_dimension_numbers<[1], [0], [0], [1], [0, 0, 1, 1], [], []>} : vector<16x128xbf16>, vector<128x512xbf16>, vector<16x512xf32> -> vector<16x512xf32>
    %46 = arith.addf %43, %45 : vector<16x512xf32>
    %47 = vector.extract_strided_slice %46 {offsets = [0, 0], sizes = [16, 384], strides = [1, 1]} : vector<16x512xf32> to vector<16x384xf32>
    %48 = arith.negf %47 : vector<16x384xf32>
    %49 = math.exp %48 : vector<16x384xf32>
    %cst_32 = arith.constant 1.000000e+00 : f32
    %50 = vector.broadcast %cst_32 : f32 to vector<16x384xf32>
    %51 = arith.addf %50, %49 : vector<16x384xf32>
    %52 = arith.divf %50, %51 : vector<16x384xf32>
    %53 = vector.extract_strided_slice %52 {offsets = [0, 0], sizes = [16, 128], strides = [1, 1]} : vector<16x384xf32> to vector<16x128xf32>
    %54 = vector.extract_strided_slice %52 {offsets = [0, 128], sizes = [16, 128], strides = [1, 1]} : vector<16x384xf32> to vector<16x128xf32>
    %55 = vector.extract_strided_slice %52 {offsets = [0, 256], sizes = [16, 128], strides = [1, 1]} : vector<16x384xf32> to vector<16x128xf32>
    %56 = vector.extract_strided_slice %46 {offsets = [0, 384], sizes = [16, 128], strides = [1, 1]} : vector<16x512xf32> to vector<16x128xf32>
    %57 = math.tanh %56 : vector<16x128xf32>
    %58 = arith.mulf %54, %40 : vector<16x128xf32>
    %59 = arith.mulf %53, %57 : vector<16x128xf32>
    %60 = arith.addf %58, %59 : vector<16x128xf32>
    %61 = math.tanh %60 : vector<16x128xf32>
    %62 = arith.mulf %55, %61 : vector<16x128xf32>
    %c0_33 = arith.constant 0 : index
    %c0_34 = arith.constant 0 : index
    %63 = vector.load %arg14[%c0_33, %c0_34] : memref<16x128xf32, #tpu.memory_space<vmem>>, vector<16x128xf32>
    tpu.vector_store %arg14[%c0_33, %c0_34], %62 {strides = array<i32>} : memref<16x128xf32, #tpu.memory_space<vmem>>, vector<16x128xf32>,
    %c0_35 = arith.constant 0 : index
    %c0_36 = arith.constant 0 : index
    %64 = vector.load %arg15[%c0_35, %c0_36] : memref<16x128xf32, #tpu.memory_space<vmem>>, vector<16x128xf32>
    tpu.vector_store %arg15[%c0_35, %c0_36], %60 {strides = array<i32>} : memref<16x128xf32, #tpu.memory_space<vmem>>, vector<16x128xf32>,
    %c2_i32 = arith.constant 2 : i32
    %c0_37 = arith.constant 0 : index
    %c0_38 = arith.constant 0 : index
    %65 = vector.load %arg14[%c0_37, %c0_38] : memref<16x128xf32, #tpu.memory_space<vmem>>, vector<16x128xf32>
    %c0_39 = arith.constant 0 : index
    %c0_40 = arith.constant 0 : index
    %66 = vector.load %arg15[%c0_39, %c0_40] : memref<16x128xf32, #tpu.memory_space<vmem>>, vector<16x128xf32>
    %67 = arith.index_cast %c2_i32 : i32 to index
    %c0_41 = arith.constant 0 : index
    %c0_42 = arith.constant 0 : index
    %68 = vector.load %arg13[%67, %c0_41, %c0_42] : memref<8x16x512xf32, #tpu.memory_space<vmem>>, vector<1x16x512xf32>
    %69 = vector.shape_cast %68 : vector<1x16x512xf32> to vector<16x512xf32>
    %70 = arith.truncf %65 : vector<16x128xf32> to vector<16x128xbf16>
    %cst_43 = arith.constant dense<0.000000e+00> : vector<16x512xf32>
    %71 = tpu.matmul %70, %12, %cst_43 {dimension_numbers = #tpu.dot_dimension_numbers<[1], [0], [0], [1], [0, 0, 1, 1], [], []>} : vector<16x128xbf16>, vector<128x512xbf16>, vector<16x512xf32> -> vector<16x512xf32>
    %72 = arith.addf %69, %71 : vector<16x512xf32>
    %73 = vector.extract_strided_slice %72 {offsets = [0, 0], sizes = [16, 384], strides = [1, 1]} : vector<16x512xf32> to vector<16x384xf32>
    %74 = arith.negf %73 : vector<16x384xf32>
    %75 = math.exp %74 : vector<16x384xf32>
    %cst_44 = arith.constant 1.000000e+00 : f32
    %76 = vector.broadcast %cst_44 : f32 to vector<16x384xf32>
    %77 = arith.addf %76, %75 : vector<16x384xf32>
    %78 = arith.divf %76, %77 : vector<16x384xf32>
    %79 = vector.extract_strided_slice %78 {offsets = [0, 0], sizes = [16, 128], strides = [1, 1]} : vector<16x384xf32> to vector<16x128xf32>
    %80 = vector.extract_strided_slice %78 {offsets = [0, 128], sizes = [16, 128], strides = [1, 1]} : vector<16x384xf32> to vector<16x128xf32>
    %81 = vector.extract_strided_slice %78 {offsets = [0, 256], sizes = [16, 128], strides = [1, 1]} : vector<16x384xf32> to vector<16x128xf32>
    %82 = vector.extract_strided_slice %72 {offsets = [0, 384], sizes = [16, 128], strides = [1, 1]} : vector<16x512xf32> to vector<16x128xf32>
    %83 = math.tanh %82 : vector<16x128xf32>
    %84 = arith.mulf %80, %66 : vector<16x128xf32>
    %85 = arith.mulf %79, %83 : vector<16x128xf32>
    %86 = arith.addf %84, %85 : vector<16x128xf32>
    %87 = math.tanh %86 : vector<16x128xf32>
    %88 = arith.mulf %81, %87 : vector<16x128xf32>
    %c0_45 = arith.constant 0 : index
    %c0_46 = arith.constant 0 : index
    %89 = vector.load %arg14[%c0_45, %c0_46] : memref<16x128xf32, #tpu.memory_space<vmem>>, vector<16x128xf32>
    tpu.vector_store %arg14[%c0_45, %c0_46], %88 {strides = array<i32>} : memref<16x128xf32, #tpu.memory_space<vmem>>, vector<16x128xf32>,
    %c0_47 = arith.constant 0 : index
    %c0_48 = arith.constant 0 : index
    %90 = vector.load %arg15[%c0_47, %c0_48] : memref<16x128xf32, #tpu.memory_space<vmem>>, vector<16x128xf32>
    tpu.vector_store %arg15[%c0_47, %c0_48], %86 {strides = array<i32>} : memref<16x128xf32, #tpu.memory_space<vmem>>, vector<16x128xf32>,
    %c3_i32 = arith.constant 3 : i32
    %c0_49 = arith.constant 0 : index
    %c0_50 = arith.constant 0 : index
    %91 = vector.load %arg14[%c0_49, %c0_50] : memref<16x128xf32, #tpu.memory_space<vmem>>, vector<16x128xf32>
    %c0_51 = arith.constant 0 : index
    %c0_52 = arith.constant 0 : index
    %92 = vector.load %arg15[%c0_51, %c0_52] : memref<16x128xf32, #tpu.memory_space<vmem>>, vector<16x128xf32>
    %93 = arith.index_cast %c3_i32 : i32 to index
    %c0_53 = arith.constant 0 : index
    %c0_54 = arith.constant 0 : index
    %94 = vector.load %arg13[%93, %c0_53, %c0_54] : memref<8x16x512xf32, #tpu.memory_space<vmem>>, vector<1x16x512xf32>
    %95 = vector.shape_cast %94 : vector<1x16x512xf32> to vector<16x512xf32>
    %96 = arith.truncf %91 : vector<16x128xf32> to vector<16x128xbf16>
    %cst_55 = arith.constant dense<0.000000e+00> : vector<16x512xf32>
    %97 = tpu.matmul %96, %12, %cst_55 {dimension_numbers = #tpu.dot_dimension_numbers<[1], [0], [0], [1], [0, 0, 1, 1], [], []>} : vector<16x128xbf16>, vector<128x512xbf16>, vector<16x512xf32> -> vector<16x512xf32>
    %98 = arith.addf %95, %97 : vector<16x512xf32>
    %99 = vector.extract_strided_slice %98 {offsets = [0, 0], sizes = [16, 384], strides = [1, 1]} : vector<16x512xf32> to vector<16x384xf32>
    %100 = arith.negf %99 : vector<16x384xf32>
    %101 = math.exp %100 : vector<16x384xf32>
    %cst_56 = arith.constant 1.000000e+00 : f32
    %102 = vector.broadcast %cst_56 : f32 to vector<16x384xf32>
    %103 = arith.addf %102, %101 : vector<16x384xf32>
    %104 = arith.divf %102, %103 : vector<16x384xf32>
    %105 = vector.extract_strided_slice %104 {offsets = [0, 0], sizes = [16, 128], strides = [1, 1]} : vector<16x384xf32> to vector<16x128xf32>
    %106 = vector.extract_strided_slice %104 {offsets = [0, 128], sizes = [16, 128], strides = [1, 1]} : vector<16x384xf32> to vector<16x128xf32>
    %107 = vector.extract_strided_slice %104 {offsets = [0, 256], sizes = [16, 128], strides = [1, 1]} : vector<16x384xf32> to vector<16x128xf32>
    %108 = vector.extract_strided_slice %98 {offsets = [0, 384], sizes = [16, 128], strides = [1, 1]} : vector<16x512xf32> to vector<16x128xf32>
    %109 = math.tanh %108 : vector<16x128xf32>
    %110 = arith.mulf %106, %92 : vector<16x128xf32>
    %111 = arith.mulf %105, %109 : vector<16x128xf32>
    %112 = arith.addf %110, %111 : vector<16x128xf32>
    %113 = math.tanh %112 : vector<16x128xf32>
    %114 = arith.mulf %107, %113 : vector<16x128xf32>
    %c0_57 = arith.constant 0 : index
    %c0_58 = arith.constant 0 : index
    %115 = vector.load %arg14[%c0_57, %c0_58] : memref<16x128xf32, #tpu.memory_space<vmem>>, vector<16x128xf32>
    tpu.vector_store %arg14[%c0_57, %c0_58], %114 {strides = array<i32>} : memref<16x128xf32, #tpu.memory_space<vmem>>, vector<16x128xf32>,
    %c0_59 = arith.constant 0 : index
    %c0_60 = arith.constant 0 : index
    %116 = vector.load %arg15[%c0_59, %c0_60] : memref<16x128xf32, #tpu.memory_space<vmem>>, vector<16x128xf32>
    tpu.vector_store %arg15[%c0_59, %c0_60], %112 {strides = array<i32>} : memref<16x128xf32, #tpu.memory_space<vmem>>, vector<16x128xf32>,
    %c4_i32 = arith.constant 4 : i32
    %c0_61 = arith.constant 0 : index
    %c0_62 = arith.constant 0 : index
    %117 = vector.load %arg14[%c0_61, %c0_62] : memref<16x128xf32, #tpu.memory_space<vmem>>, vector<16x128xf32>
    %c0_63 = arith.constant 0 : index
    %c0_64 = arith.constant 0 : index
    %118 = vector.load %arg15[%c0_63, %c0_64] : memref<16x128xf32, #tpu.memory_space<vmem>>, vector<16x128xf32>
    %119 = arith.index_cast %c4_i32 : i32 to index
    %c0_65 = arith.constant 0 : index
    %c0_66 = arith.constant 0 : index
    %120 = vector.load %arg13[%119, %c0_65, %c0_66] : memref<8x16x512xf32, #tpu.memory_space<vmem>>, vector<1x16x512xf32>
    %121 = vector.shape_cast %120 : vector<1x16x512xf32> to vector<16x512xf32>
    %122 = arith.truncf %117 : vector<16x128xf32> to vector<16x128xbf16>
    %cst_67 = arith.constant dense<0.000000e+00> : vector<16x512xf32>
    %123 = tpu.matmul %122, %12, %cst_67 {dimension_numbers = #tpu.dot_dimension_numbers<[1], [0], [0], [1], [0, 0, 1, 1], [], []>} : vector<16x128xbf16>, vector<128x512xbf16>, vector<16x512xf32> -> vector<16x512xf32>
    %124 = arith.addf %121, %123 : vector<16x512xf32>
    %125 = vector.extract_strided_slice %124 {offsets = [0, 0], sizes = [16, 384], strides = [1, 1]} : vector<16x512xf32> to vector<16x384xf32>
    %126 = arith.negf %125 : vector<16x384xf32>
    %127 = math.exp %126 : vector<16x384xf32>
    %cst_68 = arith.constant 1.000000e+00 : f32
    %128 = vector.broadcast %cst_68 : f32 to vector<16x384xf32>
    %129 = arith.addf %128, %127 : vector<16x384xf32>
    %130 = arith.divf %128, %129 : vector<16x384xf32>
    %131 = vector.extract_strided_slice %130 {offsets = [0, 0], sizes = [16, 128], strides = [1, 1]} : vector<16x384xf32> to vector<16x128xf32>
    %132 = vector.extract_strided_slice %130 {offsets = [0, 128], sizes = [16, 128], strides = [1, 1]} : vector<16x384xf32> to vector<16x128xf32>
    %133 = vector.extract_strided_slice %130 {offsets = [0, 256], sizes = [16, 128], strides = [1, 1]} : vector<16x384xf32> to vector<16x128xf32>
    %134 = vector.extract_strided_slice %124 {offsets = [0, 384], sizes = [16, 128], strides = [1, 1]} : vector<16x512xf32> to vector<16x128xf32>
    %135 = math.tanh %134 : vector<16x128xf32>
    %136 = arith.mulf %132, %118 : vector<16x128xf32>
    %137 = arith.mulf %131, %135 : vector<16x128xf32>
    %138 = arith.addf %136, %137 : vector<16x128xf32>
    %139 = math.tanh %138 : vector<16x128xf32>
    %140 = arith.mulf %133, %139 : vector<16x128xf32>
    %c0_69 = arith.constant 0 : index
    %c0_70 = arith.constant 0 : index
    %141 = vector.load %arg14[%c0_69, %c0_70] : memref<16x128xf32, #tpu.memory_space<vmem>>, vector<16x128xf32>
    tpu.vector_store %arg14[%c0_69, %c0_70], %140 {strides = array<i32>} : memref<16x128xf32, #tpu.memory_space<vmem>>, vector<16x128xf32>,
    %c0_71 = arith.constant 0 : index
    %c0_72 = arith.constant 0 : index
    %142 = vector.load %arg15[%c0_71, %c0_72] : memref<16x128xf32, #tpu.memory_space<vmem>>, vector<16x128xf32>
    tpu.vector_store %arg15[%c0_71, %c0_72], %138 {strides = array<i32>} : memref<16x128xf32, #tpu.memory_space<vmem>>, vector<16x128xf32>,
    %c5_i32 = arith.constant 5 : i32
    %c0_73 = arith.constant 0 : index
    %c0_74 = arith.constant 0 : index
    %143 = vector.load %arg14[%c0_73, %c0_74] : memref<16x128xf32, #tpu.memory_space<vmem>>, vector<16x128xf32>
    %c0_75 = arith.constant 0 : index
    %c0_76 = arith.constant 0 : index
    %144 = vector.load %arg15[%c0_75, %c0_76] : memref<16x128xf32, #tpu.memory_space<vmem>>, vector<16x128xf32>
    %145 = arith.index_cast %c5_i32 : i32 to index
    %c0_77 = arith.constant 0 : index
    %c0_78 = arith.constant 0 : index
    %146 = vector.load %arg13[%145, %c0_77, %c0_78] : memref<8x16x512xf32, #tpu.memory_space<vmem>>, vector<1x16x512xf32>
    %147 = vector.shape_cast %146 : vector<1x16x512xf32> to vector<16x512xf32>
    %148 = arith.truncf %143 : vector<16x128xf32> to vector<16x128xbf16>
    %cst_79 = arith.constant dense<0.000000e+00> : vector<16x512xf32>
    %149 = tpu.matmul %148, %12, %cst_79 {dimension_numbers = #tpu.dot_dimension_numbers<[1], [0], [0], [1], [0, 0, 1, 1], [], []>} : vector<16x128xbf16>, vector<128x512xbf16>, vector<16x512xf32> -> vector<16x512xf32>
    %150 = arith.addf %147, %149 : vector<16x512xf32>
    %151 = vector.extract_strided_slice %150 {offsets = [0, 0], sizes = [16, 384], strides = [1, 1]} : vector<16x512xf32> to vector<16x384xf32>
    %152 = arith.negf %151 : vector<16x384xf32>
    %153 = math.exp %152 : vector<16x384xf32>
    %cst_80 = arith.constant 1.000000e+00 : f32
    %154 = vector.broadcast %cst_80 : f32 to vector<16x384xf32>
    %155 = arith.addf %154, %153 : vector<16x384xf32>
    %156 = arith.divf %154, %155 : vector<16x384xf32>
    %157 = vector.extract_strided_slice %156 {offsets = [0, 0], sizes = [16, 128], strides = [1, 1]} : vector<16x384xf32> to vector<16x128xf32>
    %158 = vector.extract_strided_slice %156 {offsets = [0, 128], sizes = [16, 128], strides = [1, 1]} : vector<16x384xf32> to vector<16x128xf32>
    %159 = vector.extract_strided_slice %156 {offsets = [0, 256], sizes = [16, 128], strides = [1, 1]} : vector<16x384xf32> to vector<16x128xf32>
    %160 = vector.extract_strided_slice %150 {offsets = [0, 384], sizes = [16, 128], strides = [1, 1]} : vector<16x512xf32> to vector<16x128xf32>
    %161 = math.tanh %160 : vector<16x128xf32>
    %162 = arith.mulf %158, %144 : vector<16x128xf32>
    %163 = arith.mulf %157, %161 : vector<16x128xf32>
    %164 = arith.addf %162, %163 : vector<16x128xf32>
    %165 = math.tanh %164 : vector<16x128xf32>
    %166 = arith.mulf %159, %165 : vector<16x128xf32>
    %c0_81 = arith.constant 0 : index
    %c0_82 = arith.constant 0 : index
    %167 = vector.load %arg14[%c0_81, %c0_82] : memref<16x128xf32, #tpu.memory_space<vmem>>, vector<16x128xf32>
    tpu.vector_store %arg14[%c0_81, %c0_82], %166 {strides = array<i32>} : memref<16x128xf32, #tpu.memory_space<vmem>>, vector<16x128xf32>,
    %c0_83 = arith.constant 0 : index
    %c0_84 = arith.constant 0 : index
    %168 = vector.load %arg15[%c0_83, %c0_84] : memref<16x128xf32, #tpu.memory_space<vmem>>, vector<16x128xf32>
    tpu.vector_store %arg15[%c0_83, %c0_84], %164 {strides = array<i32>} : memref<16x128xf32, #tpu.memory_space<vmem>>, vector<16x128xf32>,
    %c6_i32 = arith.constant 6 : i32
    %c0_85 = arith.constant 0 : index
    %c0_86 = arith.constant 0 : index
    %169 = vector.load %arg14[%c0_85, %c0_86] : memref<16x128xf32, #tpu.memory_space<vmem>>, vector<16x128xf32>
    %c0_87 = arith.constant 0 : index
    %c0_88 = arith.constant 0 : index
    %170 = vector.load %arg15[%c0_87, %c0_88] : memref<16x128xf32, #tpu.memory_space<vmem>>, vector<16x128xf32>
    %171 = arith.index_cast %c6_i32 : i32 to index
    %c0_89 = arith.constant 0 : index
    %c0_90 = arith.constant 0 : index
    %172 = vector.load %arg13[%171, %c0_89, %c0_90] : memref<8x16x512xf32, #tpu.memory_space<vmem>>, vector<1x16x512xf32>
    %173 = vector.shape_cast %172 : vector<1x16x512xf32> to vector<16x512xf32>
    %174 = arith.truncf %169 : vector<16x128xf32> to vector<16x128xbf16>
    %cst_91 = arith.constant dense<0.000000e+00> : vector<16x512xf32>
    %175 = tpu.matmul %174, %12, %cst_91 {dimension_numbers = #tpu.dot_dimension_numbers<[1], [0], [0], [1], [0, 0, 1, 1], [], []>} : vector<16x128xbf16>, vector<128x512xbf16>, vector<16x512xf32> -> vector<16x512xf32>
    %176 = arith.addf %173, %175 : vector<16x512xf32>
    %177 = vector.extract_strided_slice %176 {offsets = [0, 0], sizes = [16, 384], strides = [1, 1]} : vector<16x512xf32> to vector<16x384xf32>
    %178 = arith.negf %177 : vector<16x384xf32>
    %179 = math.exp %178 : vector<16x384xf32>
    %cst_92 = arith.constant 1.000000e+00 : f32
    %180 = vector.broadcast %cst_92 : f32 to vector<16x384xf32>
    %181 = arith.addf %180, %179 : vector<16x384xf32>
    %182 = arith.divf %180, %181 : vector<16x384xf32>
    %183 = vector.extract_strided_slice %182 {offsets = [0, 0], sizes = [16, 128], strides = [1, 1]} : vector<16x384xf32> to vector<16x128xf32>
    %184 = vector.extract_strided_slice %182 {offsets = [0, 128], sizes = [16, 128], strides = [1, 1]} : vector<16x384xf32> to vector<16x128xf32>
    %185 = vector.extract_strided_slice %182 {offsets = [0, 256], sizes = [16, 128], strides = [1, 1]} : vector<16x384xf32> to vector<16x128xf32>
    %186 = vector.extract_strided_slice %176 {offsets = [0, 384], sizes = [16, 128], strides = [1, 1]} : vector<16x512xf32> to vector<16x128xf32>
    %187 = math.tanh %186 : vector<16x128xf32>
    %188 = arith.mulf %184, %170 : vector<16x128xf32>
    %189 = arith.mulf %183, %187 : vector<16x128xf32>
    %190 = arith.addf %188, %189 : vector<16x128xf32>
    %191 = math.tanh %190 : vector<16x128xf32>
    %192 = arith.mulf %185, %191 : vector<16x128xf32>
    %c0_93 = arith.constant 0 : index
    %c0_94 = arith.constant 0 : index
    %193 = vector.load %arg14[%c0_93, %c0_94] : memref<16x128xf32, #tpu.memory_space<vmem>>, vector<16x128xf32>
    tpu.vector_store %arg14[%c0_93, %c0_94], %192 {strides = array<i32>} : memref<16x128xf32, #tpu.memory_space<vmem>>, vector<16x128xf32>,
    %c0_95 = arith.constant 0 : index
    %c0_96 = arith.constant 0 : index
    %194 = vector.load %arg15[%c0_95, %c0_96] : memref<16x128xf32, #tpu.memory_space<vmem>>, vector<16x128xf32>
    tpu.vector_store %arg15[%c0_95, %c0_96], %190 {strides = array<i32>} : memref<16x128xf32, #tpu.memory_space<vmem>>, vector<16x128xf32>,
    %c7_i32 = arith.constant 7 : i32
    %c0_97 = arith.constant 0 : index
    %c0_98 = arith.constant 0 : index
    %195 = vector.load %arg14[%c0_97, %c0_98] : memref<16x128xf32, #tpu.memory_space<vmem>>, vector<16x128xf32>
    %c0_99 = arith.constant 0 : index
    %c0_100 = arith.constant 0 : index
    %196 = vector.load %arg15[%c0_99, %c0_100] : memref<16x128xf32, #tpu.memory_space<vmem>>, vector<16x128xf32>
    %197 = arith.index_cast %c7_i32 : i32 to index
    %c0_101 = arith.constant 0 : index
    %c0_102 = arith.constant 0 : index
    %198 = vector.load %arg13[%197, %c0_101, %c0_102] : memref<8x16x512xf32, #tpu.memory_space<vmem>>, vector<1x16x512xf32>
    %199 = vector.shape_cast %198 : vector<1x16x512xf32> to vector<16x512xf32>
    %200 = arith.truncf %195 : vector<16x128xf32> to vector<16x128xbf16>
    %cst_103 = arith.constant dense<0.000000e+00> : vector<16x512xf32>
    %201 = tpu.matmul %200, %12, %cst_103 {dimension_numbers = #tpu.dot_dimension_numbers<[1], [0], [0], [1], [0, 0, 1, 1], [], []>} : vector<16x128xbf16>, vector<128x512xbf16>, vector<16x512xf32> -> vector<16x512xf32>
    %202 = arith.addf %199, %201 : vector<16x512xf32>
    %203 = vector.extract_strided_slice %202 {offsets = [0, 0], sizes = [16, 384], strides = [1, 1]} : vector<16x512xf32> to vector<16x384xf32>
    %204 = arith.negf %203 : vector<16x384xf32>
    %205 = math.exp %204 : vector<16x384xf32>
    %cst_104 = arith.constant 1.000000e+00 : f32
    %206 = vector.broadcast %cst_104 : f32 to vector<16x384xf32>
    %207 = arith.addf %206, %205 : vector<16x384xf32>
    %208 = arith.divf %206, %207 : vector<16x384xf32>
    %209 = vector.extract_strided_slice %208 {offsets = [0, 0], sizes = [16, 128], strides = [1, 1]} : vector<16x384xf32> to vector<16x128xf32>
    %210 = vector.extract_strided_slice %208 {offsets = [0, 128], sizes = [16, 128], strides = [1, 1]} : vector<16x384xf32> to vector<16x128xf32>
    %211 = vector.extract_strided_slice %208 {offsets = [0, 256], sizes = [16, 128], strides = [1, 1]} : vector<16x384xf32> to vector<16x128xf32>
    %212 = vector.extract_strided_slice %202 {offsets = [0, 384], sizes = [16, 128], strides = [1, 1]} : vector<16x512xf32> to vector<16x128xf32>
    %213 = math.tanh %212 : vector<16x128xf32>
    %214 = arith.mulf %210, %196 : vector<16x128xf32>
    %215 = arith.mulf %209, %213 : vector<16x128xf32>
    %216 = arith.addf %214, %215 : vector<16x128xf32>
    %217 = math.tanh %216 : vector<16x128xf32>
    %218 = arith.mulf %211, %217 : vector<16x128xf32>
    %c0_105 = arith.constant 0 : index
    %c0_106 = arith.constant 0 : index
    %219 = vector.load %arg14[%c0_105, %c0_106] : memref<16x128xf32, #tpu.memory_space<vmem>>, vector<16x128xf32>
    tpu.vector_store %arg14[%c0_105, %c0_106], %218 {strides = array<i32>} : memref<16x128xf32, #tpu.memory_space<vmem>>, vector<16x128xf32>,
    %c0_107 = arith.constant 0 : index
    %c0_108 = arith.constant 0 : index
    %220 = vector.load %arg15[%c0_107, %c0_108] : memref<16x128xf32, #tpu.memory_space<vmem>>, vector<16x128xf32>
    tpu.vector_store %arg15[%c0_107, %c0_108], %216 {strides = array<i32>} : memref<16x128xf32, #tpu.memory_space<vmem>>, vector<16x128xf32>,
    %c8_i32 = arith.constant 8 : i32
    %c0_109 = arith.constant 0 : index
    %c0_110 = arith.constant 0 : index
    %221 = vector.load %arg14[%c0_109, %c0_110] : memref<16x128xf32, #tpu.memory_space<vmem>>, vector<16x128xf32>
    %c0_111 = arith.constant 0 : index
    %c0_112 = arith.constant 0 : index
    %222 = vector.load %arg11[%c0_111, %c0_112] : memref<16x128xf32, #tpu.memory_space<vmem>>, vector<16x128xf32>
    tpu.vector_store %arg11[%c0_111, %c0_112], %221 {strides = array<i32>} : memref<16x128xf32, #tpu.memory_space<vmem>>, vector<16x128xf32>,
    %c0_113 = arith.constant 0 : index
    %c0_114 = arith.constant 0 : index
    %223 = vector.load %arg15[%c0_113, %c0_114] : memref<16x128xf32, #tpu.memory_space<vmem>>, vector<16x128xf32>
    %c0_115 = arith.constant 0 : index
    %c0_116 = arith.constant 0 : index
    %224 = vector.load %arg12[%c0_115, %c0_116] : memref<16x128xf32, #tpu.memory_space<vmem>>, vector<16x128xf32>
    tpu.vector_store %arg12[%c0_115, %c0_116], %223 {strides = array<i32>} : memref<16x128xf32, #tpu.memory_space<vmem>>, vector<16x128xf32>,
    %c0_117 = arith.constant 0 : index
    %c0_118 = arith.constant 0 : index
    %225 = vector.load %arg8[%c0_117, %c0_118] : memref<1x128xf32, #tpu.memory_space<vmem>>, vector<1x128xf32>
    %226 = vector.broadcast %225 : vector<1x128xf32> to vector<16x128xf32>
    %227 = arith.mulf %221, %226 : vector<16x128xf32>
    %cst_119 = arith.constant dense<0.000000e+00> : vector<16xf32>
    %228 = vector.multi_reduction <add>, %227, %cst_119 [1] : vector<16x128xf32> to vector<16xf32>
    %229 = vector.shape_cast %228 : vector<16xf32> to vector<16x1xf32>
    %c0_120 = arith.constant 0 : index
    %c0_121 = arith.constant 0 : index
    %230 = vector.load %arg9[%c0_120, %c0_121] : memref<1x1xf32, #tpu.memory_space<vmem>>, vector<1x1xf32>
    %231 = vector.broadcast %230 : vector<1x1xf32> to vector<16x1xf32>
    %232 = arith.addf %229, %231 : vector<16x1xf32>
    %233 = arith.negf %232 : vector<16x1xf32>
    %234 = math.exp %233 : vector<16x1xf32>
    %cst_122 = arith.constant 1.000000e+00 : f32
    %235 = vector.broadcast %cst_122 : f32 to vector<16x1xf32>
    %236 = arith.addf %235, %234 : vector<16x1xf32>
    %237 = arith.divf %235, %236 : vector<16x1xf32>
    %c0_123 = arith.constant 0 : index
    %c0_124 = arith.constant 0 : index
    %238 = vector.load %arg10[%c0_123, %c0_124] : memref<16x1xf32, #tpu.memory_space<vmem>>, vector<16x1xf32>
    tpu.vector_store %arg10[%c0_123, %c0_124], %237 {strides = array<i32>} : memref<16x1xf32, #tpu.memory_space<vmem>>, vector<16x1xf32>,
    return
  }
  func.func @transform_0(%arg0: i32, %arg1: i32) -> (i32, i32, i32) {
    %c0_i32 = arith.constant 0 : i32
    %c0_i32_0 = arith.constant 0 : i32
    return %arg1, %arg0, %c0_i32 : i32, i32, i32
  }
  func.func @transform_1(%arg0: i32, %arg1: i32) -> (i32, i32) {
    %c0_i32 = arith.constant 0 : i32
    %c0_i32_0 = arith.constant 0 : i32
    return %arg0, %c0_i32 : i32, i32
  }
  func.func @transform_2(%arg0: i32, %arg1: i32) -> (i32, i32) {
    %c0_i32 = arith.constant 0 : i32
    %c0_i32_0 = arith.constant 0 : i32
    return %arg0, %c0_i32 : i32, i32
  }
  func.func @transform_3(%arg0: i32, %arg1: i32) -> (i32, i32) {
    %c0_i32 = arith.constant 0 : i32
    %c0_i32_0 = arith.constant 0 : i32
    %c0_i32_1 = arith.constant 0 : i32
    return %c0_i32, %c0_i32_0 : i32, i32
  }
  func.func @transform_4(%arg0: i32, %arg1: i32) -> (i32, i32) {
    %c0_i32 = arith.constant 0 : i32
    %c0_i32_0 = arith.constant 0 : i32
    %c0_i32_1 = arith.constant 0 : i32
    return %c0_i32, %c0_i32_0 : i32, i32
  }
  func.func @transform_5(%arg0: i32, %arg1: i32) -> (i32, i32) {
    %c0_i32 = arith.constant 0 : i32
    %c0_i32_0 = arith.constant 0 : i32
    %c0_i32_1 = arith.constant 0 : i32
    return %c0_i32, %c0_i32_0 : i32, i32
  }
  func.func @transform_6(%arg0: i32, %arg1: i32) -> (i32, i32) {
    %c0_i32 = arith.constant 0 : i32
    %c0_i32_0 = arith.constant 0 : i32
    %c0_i32_1 = arith.constant 0 : i32
    return %c0_i32, %c0_i32_0 : i32, i32
  }
  func.func @transform_7(%arg0: i32, %arg1: i32) -> (i32, i32) {
    %c0_i32 = arith.constant 0 : i32
    %c0_i32_0 = arith.constant 0 : i32
    %c0_i32_1 = arith.constant 0 : i32
    return %c0_i32, %c0_i32_0 : i32, i32
  }
  func.func @transform_8(%arg0: i32, %arg1: i32) -> (i32, i32) {
    %c0_i32 = arith.constant 0 : i32
    %c0_i32_0 = arith.constant 0 : i32
    return %arg0, %c0_i32 : i32, i32
  }
  func.func @transform_9(%arg0: i32, %arg1: i32) -> (i32, i32) {
    %c0_i32 = arith.constant 0 : i32
    %c0_i32_0 = arith.constant 0 : i32
    return %arg0, %c0_i32 : i32, i32
  }
  func.func @transform_10(%arg0: i32, %arg1: i32) -> (i32, i32) {
    %c0_i32 = arith.constant 0 : i32
    %c0_i32_0 = arith.constant 0 : i32
    return %arg0, %c0_i32 : i32, i32
  }
}

</mosaic_0001>

<bundles_post_ra>
// kernel: lstm_nn_forward.2
= control target key start
LH: loop header
LB: loop body
LE: loop exit
PB: predicated region body
PF: predicated region fallthrough
CT: control target
= control target key end

     0   :  { %v3945_v1 = vmov 0   ;;  %s3936_s3 = inlined_call_operand.vmem [shape: bf16[128,512], index: 3, kind: input, shape index: {}]   ;;  %s3937_s0 = inlined_call_operand.vmem [shape: bf16[8,16,128], index: 0, kind: input, shape index: {}]   ;;  %s3938_s4 = inlined_call_operand.vmem [shape: bf16[128,512], index: 4, kind: input, shape index: {}]   ;;  %s3939_s1 = inlined_call_operand.vmem [shape: f32[16,128], index: 1, kind: input, shape index: {}]   ;;  %s3940_s5 = inlined_call_operand.vmem [shape: f32[1,512], index: 5, kind: input, shape index: {}]   ;;  %s3941_s2 = inlined_call_operand.vmem [shape: f32[16,128], index: 2, kind: input, shape index: {}]   ;;  %s3942_s6 = inlined_call_operand.vmem [shape: bf16[8,16,128], index: 6, kind: output, shape index: {0}]   ;;  %s3943_s8 = inlined_call_operand.vmem [shape: f32[16,128], index: 8, kind: output, shape index: {2}]   ;;  %s3944_s7 = inlined_call_operand.vmem [shape: f32[16,128], index: 7, kind: output, shape index: {1}]  }
   0x1   :  { %v2399_v0 = vld [vmem:[%s3936_s3 + $0xe4] ss:$16 sps:$4 sm:$0xff]   ;;  %349 = vmatprep.mubr.bf16.mxu0 %v3945_v1  ;;  %462 = vmatprep.mubr.bf16.mxu1 %v3945_v1  ;;  %v2401_v2 = vld [vmem:[%s3936_s3 + $0xec] ss:$16 sps:$4 sm:$0xff]   ;;  %v2403_v3 = vld [vmem:[%s3936_s3 + $0xe0] ss:$16 sps:$4 sm:$0xff]  }
   0x2   :  { %317 = vmatprep.subr.bf16.mxu0 %v2399_v0  ;;  %v2404_v4 = vld [vmem:[%s3936_s3 + $0xe8] ss:$16 sps:$4 sm:$0xff]   ;;  %430 = vmatprep.subr.bf16.mxu1 %v2401_v2  ;;  %v2405_v5 = vld [vmem:[%s3936_s3 + $0xc4] ss:$16 sps:$4 sm:$0xff]   ;;  %v2407_v6 = vld [vmem:[%s3936_s3 + $0xcc] ss:$16 sps:$4 sm:$0xff]  }
   0x3   :  { %318 = vmatpush1.bf16.msra.mxu0 %v2403_v3  ;;  %431 = vmatpush1.bf16.msra.mxu1 %v2404_v4  ;;  %v2409_v7 = vld [vmem:[%s3936_s3 + $0xc0] ss:$16 sps:$4 sm:$0xff]   ;;  %v2410_v8 = vld [vmem:[%s3936_s3 + $0xc8] ss:$16 sps:$4 sm:$0xff]   ;;  %v2411_v9 = vld [vmem:[%s3936_s3 + $0xa4] ss:$16 sps:$4 sm:$0xff]  }
   0x4   :  { %319 = vmatprep.subr.bf16.mxu0 %v2405_v5  ;;  %432 = vmatprep.subr.bf16.mxu1 %v2407_v6  ;;  %v2413_v10 = vld [vmem:[%s3936_s3 + $0xac] ss:$16 sps:$4 sm:$0xff]   ;;  %v2415_v11 = vld [vmem:[%s3936_s3 + $0xa0] ss:$16 sps:$4 sm:$0xff]   ;;  %v2416_v12 = vld [vmem:[%s3936_s3 + $0xa8] ss:$16 sps:$4 sm:$0xff]  }
   0x5   :  { %v2417_v13 = vld [vmem:[%s3936_s3 + $0x84] ss:$16 sps:$4 sm:$0xff]   ;;  %v2419_v14 = vld [vmem:[%s3936_s3 + $0x8c] ss:$16 sps:$4 sm:$0xff]   ;;  %v2421_v15 = vld [vmem:[%s3936_s3 + $0x80] ss:$16 sps:$4 sm:$0xff]  }
   0x6   :  { %v2422_v16 = vld [vmem:[%s3936_s3 + $0x88] ss:$16 sps:$4 sm:$0xff]   ;;  %v2423_v17 = vld [vmem:[%s3936_s3 + $0x64] ss:$16 sps:$4 sm:$0xff]   ;;  %v2425_v18 = vld [vmem:[%s3936_s3 + $0x6c] ss:$16 sps:$4 sm:$0xff]  }
   0x7   :  { %320 = vmatpush1.bf16.msra.mxu0 %v2409_v7  ;;  %433 = vmatpush1.bf16.msra.mxu1 %v2410_v8  ;;  %v2427_v19 = vld [vmem:[%s3936_s3 + $0x60] ss:$16 sps:$4 sm:$0xff]   ;;  %v2428_v20 = vld [vmem:[%s3936_s3 + $0x68] ss:$16 sps:$4 sm:$0xff]   ;;  %v2429_v21 = vld [vmem:[%s3936_s3 + $0x44] ss:$16 sps:$4 sm:$0xff]  }
   0x8   :  { %321 = vmatprep.subr.bf16.mxu0 %v2411_v9  ;;  %434 = vmatprep.subr.bf16.mxu1 %v2413_v10  ;;  %v2431_v22 = vld [vmem:[%s3936_s3 + $0x4c] ss:$16 sps:$4 sm:$0xff]   ;;  %v2433_v23 = vld [vmem:[%s3936_s3 + $0x40] ss:$16 sps:$4 sm:$0xff]   ;;  %v2434_v24 = vld [vmem:[%s3936_s3 + $0x48] ss:$16 sps:$4 sm:$0xff]  }
   0x9   :  { %v2435_v25 = vld [vmem:[%s3936_s3 + $0x24] ss:$16 sps:$4 sm:$0xff]   ;;  %v2437_v26 = vld [vmem:[%s3936_s3 + $0x2c] ss:$16 sps:$4 sm:$0xff]   ;;  %v2439_v27 = vld [vmem:[%s3936_s3 + $0x20] ss:$16 sps:$4 sm:$0xff]  }
   0xa   :  { %v2440_v28 = vld [vmem:[%s3936_s3 + $0x28] ss:$16 sps:$4 sm:$0xff]   ;;  %v2441_v29 = vld [vmem:[%s3936_s3 + $0x4] ss:$16 sps:$4 sm:$0xff]   ;;  %v2443_v30 = vld [vmem:[%s3936_s3 + $0xc] ss:$16 sps:$4 sm:$0xff]  }
   0xb   :  { %322 = vmatpush1.bf16.msra.mxu0 %v2415_v11  ;;  %435 = vmatpush1.bf16.msra.mxu1 %v2416_v12  ;;  %v2445_v31 = vld [vmem:[%s3936_s3] ss:$16 sps:$4 sm:$0xff]   ;;  %v2446_v32 = vld [vmem:[%s3936_s3 + $0x8] ss:$16 sps:$4 sm:$0xff]   ;;  %v2938_v33 = vld [vmem:[%s3938_s4 + $0xe4] ss:$16 sps:$4 sm:$0xff]  }
   0xc   :  { %323 = vmatprep.subr.bf16.mxu0 %v2417_v13  ;;  %436 = vmatprep.subr.bf16.mxu1 %v2419_v14  ;;  %v2943_v34 = vld [vmem:[%s3938_s4 + $0xec] ss:$16 sps:$4 sm:$0xff]   ;;  %v2447_v35 = vld [vmem:[%s3937_s0] sm:$0xff]   ;;  %v2963_v38 = vld [vmem:[%s3938_s4 + $0xe8] ss:$16 sps:$4 sm:$0xff]   ;;  %v89_v13 = vlaneseq }
   0xd   :  { %v2951_v36 = vld [vmem:[%s3938_s4 + $0xe0] ss:$16 sps:$4 sm:$0xff]   ;;  %v2957_v37 = vld [vmem:[%s3938_s4 + $0xc4] ss:$16 sps:$4 sm:$0xff]   ;;  %v2968_v39 = vld [vmem:[%s3938_s4 + $0xcc] ss:$16 sps:$4 sm:$0xff]  }
   0xe   :  { %v2975_v40 = vld [vmem:[%s3938_s4 + $0xc0] ss:$16 sps:$4 sm:$0xff]   ;;  %v2982_v41 = vld [vmem:[%s3938_s4 + $0xa4] ss:$16 sps:$4 sm:$0xff]   ;;  %v2988_v42 = vld [vmem:[%s3938_s4 + $0xc8] ss:$16 sps:$4 sm:$0xff]  }
   0xf   :  { %324 = vmatpush1.bf16.msra.mxu0 %v2421_v15  ;;  %437 = vmatpush1.bf16.msra.mxu1 %v2422_v16  ;;  %v2451_v43 = vld [vmem:[%s3937_s0 + $0x8] sm:$0xff]   ;;  %v2998_v44 = vld [vmem:[%s3938_s4 + $0xa0] ss:$16 sps:$4 sm:$0xff]   ;;  %v3003_v45 = vld [vmem:[%s3938_s4 + $0x84] ss:$16 sps:$4 sm:$0xff]   ;;  %v90_v14 = vshrl.u32 %v89_v13, 7 }
  0x10   :  { %325 = vmatprep.subr.bf16.mxu0 %v2423_v17  ;;  %438 = vmatprep.subr.bf16.mxu1 %v2425_v18  ;;  %v3009_v46 = vld [vmem:[%s3938_s4 + $0xac] ss:$16 sps:$4 sm:$0xff]   ;;  %v3015_v47 = vld [vmem:[%s3938_s4 + $0xa8] ss:$16 sps:$4 sm:$0xff]   ;;  %v3028_v49 = vld [vmem:[%s3938_s4 + $0x80] ss:$16 sps:$4 sm:$0xff]  }
  0x11   :  { %v3020_v48 = vld [vmem:[%s3938_s4 + $0x8c] ss:$16 sps:$4 sm:$0xff]   ;;  %v3033_v50 = vld [vmem:[%s3938_s4 + $0x64] ss:$16 sps:$4 sm:$0xff]   ;;  %v3041_v51 = vld [vmem:[%s3938_s4 + $0x88] ss:$16 sps:$4 sm:$0xff]  }
  0x12   :  { %v2455_v52 = vld [vmem:[%s3937_s0 + $0x10] sm:$0xff]   ;;  %v3056_v54 = vld [vmem:[%s3938_s4 + $0x6c] ss:$16 sps:$4 sm:$0xff]   ;;  %v3068_v56 = vld [vmem:[%s3938_s4 + $0x68] ss:$16 sps:$4 sm:$0xff]  }
  0x13   :  { %326 = vmatpush1.bf16.msra.mxu0 %v2427_v19  ;;  %439 = vmatpush1.bf16.msra.mxu1 %v2428_v20  ;;  %v3050_v53 = vld [vmem:[%s3938_s4 + $0x60] ss:$16 sps:$4 sm:$0xff]   ;;  %v3062_v55 = vld [vmem:[%s3938_s4 + $0x44] ss:$16 sps:$4 sm:$0xff]   ;;  %v3073_v57 = vld [vmem:[%s3938_s4 + $0x4c] ss:$16 sps:$4 sm:$0xff]  }
  0x14   :  { %327 = vmatprep.subr.bf16.mxu0 %v2429_v21  ;;  %440 = vmatprep.subr.bf16.mxu1 %v2431_v22  ;;  %v3081_v58 = vld [vmem:[%s3938_s4 + $0x40] ss:$16 sps:$4 sm:$0xff]   ;;  %v3088_v59 = vld [vmem:[%s3938_s4 + $0x24] ss:$16 sps:$4 sm:$0xff]   ;;  %v3094_v60 = vld [vmem:[%s3938_s4 + $0x48] ss:$16 sps:$4 sm:$0xff]  }
  0x15   :  { %v2462_v61 = vld [vmem:[%s3937_s0 + $0x18] sm:$0xff]   ;;  %v3104_v62 = vld [vmem:[%s3938_s4 + $0x20] ss:$16 sps:$4 sm:$0xff]   ;;  %v3116_v0 = vld [vmem:[%s3938_s4 + $0x4] ss:$16 sps:$4 sm:$0xff]   ;;  %v91_v19 = vsub.s32 0, %v90_v14 }
  0x16   :  { %v3109_v63 = vld [vmem:[%s3938_s4 + $0x2c] ss:$16 sps:$4 sm:$0xff]   ;;  %v3121_v2 = vld [vmem:[%s3938_s4 + $0x28] ss:$16 sps:$4 sm:$0xff]   ;;  %v3135_v4 = vld [vmem:[%s3938_s4] ss:$16 sps:$4 sm:$0xff]  }
  0x17   :  { %328 = vmatpush1.bf16.msra.mxu0 %v2433_v23  ;;  %441 = vmatpush1.bf16.msra.mxu1 %v2434_v24  ;;  %v3126_v3 = vld [vmem:[%s3938_s4 + $0xc] ss:$16 sps:$4 sm:$0xff]   ;;  %v3142_v5 = vld [vmem:[%s3938_s4 + $0x8] ss:$16 sps:$4 sm:$0xff]   ;;  %v2469_v6 = vld [vmem:[%s3937_s0 + $0x20] sm:$0xff]   ;;  %v99_v20 = vsub.s32 2, %v90_v14 }
  0x18   :  { %329 = vmatprep.subr.bf16.mxu0 %v2435_v25  ;;  %442 = vmatprep.subr.bf16.mxu1 %v2437_v26  ;;  %v2476_v7 = vld [vmem:[%s3937_s0 + $0x28] sm:$0xff]   ;;  %v2483_v8 = vld [vmem:[%s3937_s0 + $0x30] sm:$0xff]   ;;  %v2493_v9 = vld [vmem:[%s3937_s0 + $0x38] sm:$0xff]   ;;  %v95_v24 = vsub.s32 1, %v90_v14  ;;  %v103_v25 = vsub.s32 3, %v90_v14 }
  0x19   :  { %v31_v10 = vld [vmem:[%s3939_s1] sm:$0xff]  ;;  %v32_v11 = vld [vmem:[%s3939_s1 + $0x8] sm:$0xff] }
  0x1a   :  { %v651_v12 = vpack.c.bf16 %v32_v11, %v31_v10  ;;  %v87_v21 = vld [vmem:[%s3940_s5] sm:$0xf] }
  0x1b   :  { %330 = vmatpush1.bf16.msra.mxu0 %v2439_v27  ;;  %443 = vmatpush1.bf16.msra.mxu1 %v2440_v28  ;;  %v3228_v28 = vrot.slane %v87_v21, %v91_v19 }
  0x1c   :  { %331 = vmatprep.subr.bf16.mxu0 %v2441_v29  ;;  %444 = vmatprep.subr.bf16.mxu1 %v2443_v30  ;;  %v3230_v29 = vrot.slane %v87_v21, %v99_v20 }
  0x1f   :  { %332 = vmatpush1.bf16.msra.mxu0 %v2445_v31  ;;  %445 = vmatpush1.bf16.msra.mxu1 %v2446_v32  ;;  %v3232_v32 = vrot.slane %v87_v21, %v95_v24 }
  0x20   :  { %812 = vmatprep.subr.bf16.mxu0 %v2938_v33  ;;  %855 = vmatprep.subr.bf16.mxu1 %v2943_v34 }
  0x22   :  { %350 = vmatmul.mubr.bf16.vlgmr.msra.gmra.mxu0 %v2447_v35  ;;  %463 = vmatmul.mubr.bf16.vlgmr.msra.gmra.mxu1 %v2447_v35  ;;  %v3234_v35 = vrot.slane %v87_v21, %v103_v25 }
  0x23   :  { %813 = vmatpush1.bf16.msra.mxu0 %v2951_v36  ;;  %359 = vmatprep.mubr.bf16.mxu0 %v3945_v1 }
  0x24   :  { %472 = vmatprep.mubr.bf16.mxu1 %v3945_v1  ;;  %814 = vmatprep.subr.bf16.mxu0 %v2957_v37 }
  0x25   :  { %856 = vmatpush1.bf16.msra.mxu1 %v2963_v38 }
  0x26   :  { %857 = vmatprep.subr.bf16.mxu1 %v2968_v39 }
  0x27   :  { %815 = vmatpush1.bf16.msra.mxu0 %v2975_v40 }
  0x28   :  { %816 = vmatprep.subr.bf16.mxu0 %v2982_v41 }
  0x29   :  { %858 = vmatpush1.bf16.msra.mxu1 %v2988_v42 }
  0x2a   :  { %360 = vmatmul.mubr.bf16.gmra.mxu0 %v2451_v43  ;;  %473 = vmatmul.mubr.bf16.gmra.mxu1 %v2451_v43 }
  0x2b   :  { %369 = vmatprep.mubr.bf16.mxu0 %v3945_v1  ;;  %482 = vmatprep.mubr.bf16.mxu1 %v3945_v1 }
  0x2c   :  { %817 = vmatpush1.bf16.msra.mxu0 %v2998_v44  ;;  %859 = vmatprep.subr.bf16.mxu1 %v3009_v46 }
  0x2d   :  { %818 = vmatprep.subr.bf16.mxu0 %v3003_v45  ;;  %860 = vmatpush1.bf16.msra.mxu1 %v3015_v47 }
  0x2e   :  { %861 = vmatprep.subr.bf16.mxu1 %v3020_v48 }
  0x30   :  { %819 = vmatpush1.bf16.msra.mxu0 %v3028_v49 }
  0x31   :  { %820 = vmatprep.subr.bf16.mxu0 %v3033_v50  ;;  %862 = vmatpush1.bf16.msra.mxu1 %v3041_v51 }
  0x32   :  { %370 = vmatmul.mubr.bf16.gmra.mxu0 %v2455_v52  ;;  %483 = vmatmul.mubr.bf16.gmra.mxu1 %v2455_v52 }
  0x33   :  { %379 = vmatprep.mubr.bf16.mxu0 %v3945_v1  ;;  %492 = vmatprep.mubr.bf16.mxu1 %v3945_v1 }
  0x34   :  { %821 = vmatpush1.bf16.msra.mxu0 %v3050_v53  ;;  %863 = vmatprep.subr.bf16.mxu1 %v3056_v54 }
  0x35   :  { %822 = vmatprep.subr.bf16.mxu0 %v3062_v55  ;;  %864 = vmatpush1.bf16.msra.mxu1 %v3068_v56 }
  0x36   :  { %865 = vmatprep.subr.bf16.mxu1 %v3073_v57 }
  0x38   :  { %823 = vmatpush1.bf16.msra.mxu0 %v3081_v58 }
  0x39   :  { %824 = vmatprep.subr.bf16.mxu0 %v3088_v59  ;;  %866 = vmatpush1.bf16.msra.mxu1 %v3094_v60 }
  0x3a   :  { %380 = vmatmul.mubr.bf16.gmra.mxu0 %v2462_v61  ;;  %493 = vmatmul.mubr.bf16.gmra.mxu1 %v2462_v61 }
  0x3b   :  { %389 = vmatprep.mubr.bf16.mxu0 %v3945_v1  ;;  %502 = vmatprep.mubr.bf16.mxu1 %v3945_v1 }
  0x3c   :  { %825 = vmatpush1.bf16.msra.mxu0 %v3104_v62  ;;  %867 = vmatprep.subr.bf16.mxu1 %v3109_v63 }
  0x3d   :  { %826 = vmatprep.subr.bf16.mxu0 %v3116_v0  ;;  %868 = vmatpush1.bf16.msra.mxu1 %v3121_v2 }
  0x3e   :  { %869 = vmatprep.subr.bf16.mxu1 %v3126_v3 }
  0x40   :  { %827 = vmatpush1.bf16.msra.mxu0 %v3135_v4 }
  0x41   :  { %870 = vmatpush1.bf16.msra.mxu1 %v3142_v5  ;;  %982 = vmatprep.subr.bf16.mxu0 %v2938_v33 }
  0x42   :  { %390 = vmatmul.mubr.bf16.gmra.mxu0 %v2469_v6  ;;  %503 = vmatmul.mubr.bf16.gmra.mxu1 %v2469_v6 }
  0x43   :  { %399 = vmatprep.mubr.bf16.mxu0 %v3945_v1  ;;  %512 = vmatprep.mubr.bf16.mxu1 %v3945_v1 }
  0x44   :  { %1025 = vmatprep.subr.bf16.mxu1 %v2943_v34 }
  0x4a   :  { %400 = vmatmul.mubr.bf16.gmra.mxu0 %v2476_v7  ;;  %513 = vmatmul.mubr.bf16.gmra.mxu1 %v2476_v7 }
  0x4b   :  { %409 = vmatprep.mubr.bf16.mxu0 %v3945_v1  ;;  %522 = vmatprep.mubr.bf16.mxu1 %v3945_v1 }
  0x52   :  { %410 = vmatmul.mubr.bf16.gmra.mxu0 %v2483_v8  ;;  %523 = vmatmul.mubr.bf16.gmra.mxu1 %v2483_v8 }
  0x53   :  { %419 = vmatprep.mubr.bf16.mxu0 %v3945_v1  ;;  %532 = vmatprep.mubr.bf16.mxu1 %v3945_v1 }
  0x5a   :  { %420 = vmatmul.mubr.bf16.gmra.mxu0 %v2493_v9  ;;  %533 = vmatmul.mubr.bf16.gmra.mxu1 %v2493_v9 }
  0x5b   :  { %844 = vmatprep.mubr.bf16.mxu0 %v3945_v1  ;;  %887 = vmatprep.mubr.bf16.mxu1 %v3945_v1 }
  0x62   :  { %845 = vmatmul.mubr.bf16.vlgmr.msra.gmra.mxu0 %v651_v12  ;;  %888 = vmatmul.mubr.bf16.vlgmr.msra.gmra.mxu1 %v651_v12 }
  0x63   :  { %983 = vmatpush1.bf16.msra.mxu0 %v2951_v36  ;;  %1026 = vmatpush1.bf16.msra.mxu1 %v2963_v38 }
  0x64   :  { %984 = vmatprep.subr.bf16.mxu0 %v2957_v37  ;;  %1027 = vmatprep.subr.bf16.mxu1 %v2968_v39 }
  0x65   :  { %1014 = vmatprep.mubr.bf16.mxu0 %v3945_v1  ;;  %1057 = vmatprep.mubr.bf16.mxu1 %v3945_v1 }
  0x67   :  { %985 = vmatpush1.bf16.msra.mxu0 %v2975_v40  ;;  %1028 = vmatpush1.bf16.msra.mxu1 %v2988_v42 }
  0x68   :  { %986 = vmatprep.subr.bf16.mxu0 %v2982_v41  ;;  %1029 = vmatprep.subr.bf16.mxu1 %v3009_v46 }
  0x6b   :  { %987 = vmatpush1.bf16.msra.mxu0 %v2998_v44  ;;  %1030 = vmatpush1.bf16.msra.mxu1 %v3015_v47 }
  0x6c   :  { %988 = vmatprep.subr.bf16.mxu0 %v3003_v45  ;;  %1031 = vmatprep.subr.bf16.mxu1 %v3020_v48 }
  0x6f   :  { %989 = vmatpush1.bf16.msra.mxu0 %v3028_v49  ;;  %1032 = vmatpush1.bf16.msra.mxu1 %v3041_v51 }
  0x70   :  { %990 = vmatprep.subr.bf16.mxu0 %v3033_v50  ;;  %1033 = vmatprep.subr.bf16.mxu1 %v3056_v54 }
  0x73   :  { %991 = vmatpush1.bf16.msra.mxu0 %v3050_v53  ;;  %1034 = vmatpush1.bf16.msra.mxu1 %v3068_v56 }
  0x74   :  { %992 = vmatprep.subr.bf16.mxu0 %v3062_v55  ;;  %1035 = vmatprep.subr.bf16.mxu1 %v3073_v57 }
  0x77   :  { %993 = vmatpush1.bf16.msra.mxu0 %v3081_v58  ;;  %1036 = vmatpush1.bf16.msra.mxu1 %v3094_v60 }
  0x78   :  { %994 = vmatprep.subr.bf16.mxu0 %v3088_v59  ;;  %1037 = vmatprep.subr.bf16.mxu1 %v3109_v63 }
  0x7b   :  { %995 = vmatpush1.bf16.msra.mxu0 %v3104_v62  ;;  %1038 = vmatpush1.bf16.msra.mxu1 %v3121_v2 }
  0x7c   :  { %996 = vmatprep.subr.bf16.mxu0 %v3116_v0  ;;  %1039 = vmatprep.subr.bf16.mxu1 %v3126_v3 }
  0x7f   :  { %997 = vmatpush1.bf16.msra.mxu0 %v3135_v4  ;;  %1040 = vmatpush1.bf16.msra.mxu1 %v3142_v5 }
  0x80   :  { %1153 = vmatprep.subr.bf16.mxu0 %v2938_v33  ;;  %1196 = vmatprep.subr.bf16.mxu1 %v2943_v34 }
  0xe2   :  { %v3209_v15 = vpop.f32.mrf.mxu0  ;;  %v3211_v16 = vpop.f32.mrf.mxu1 }
  0xe4   :  { %v3213_v17 = vpop.f32.mrf.mxu0  ;;  %v3215_v18 = vpop.f32.mrf.mxu1 }
  0xe6   :  { %v3220_v22 = vpop.f32.mrf.mxu0  ;;  %v3222_v23 = vpop.f32.mrf.mxu1 }
  0xe8   :  { %v3224_v26 = vpop.f32.mrf.mxu0  ;;  %v3226_v27 = vpop.f32.mrf.mxu1 }
  0xea   :  { %v361_v30 = vpop.f32.mrf.mxu0  ;;  %v474_v31 = vpop.f32.mrf.mxu1 }
  0xeb   :  { %v3237_v43 = vadd.f32 %v361_v30, %v3228_v28  ;;  %v3240_v52 = vadd.f32 %v474_v31, %v3230_v29 }
  0xec   :  { %v363_v61 = vpop.f32.mrf.mxu0  ;;  %v476_v6 = vpop.f32.mrf.mxu1 }
  0xed   :  { %v3243_v7 = vadd.f32 %v363_v61, %v3232_v32  ;;  %v3246_v8 = vadd.f32 %v476_v6, %v3234_v35 }
  0xee   :  { %v365_v9 = vpop.f32.mrf.mxu0  ;;  %v478_v10 = vpop.f32.mrf.mxu1 }
  0xef   :  { %3947 = vst [vmem:[#allocation5_spill] sm:$0xff] %v3246_v8  ;;  %v3249_v11 = vadd.f32 %v365_v9, %v3228_v28  ;;  %v3252_v12 = vadd.f32 %v478_v10, %v3230_v29 }
  0xf0   :  { %v367_v13 = vpop.f32.mrf.mxu0  ;;  %v480_v14 = vpop.f32.mrf.mxu1 }
  0xf1   :  { %3948 = vst [vmem:[#allocation6_spill] sm:$0xff] %v3252_v12  ;;  %v3255_v19 = vadd.f32 %v367_v13, %v3232_v32  ;;  %v3258_v20 = vadd.f32 %v480_v14, %v3234_v35 }
  0xf2   :  { %v371_v21 = vpop.f32.mrf.mxu0  ;;  %v484_v24 = vpop.f32.mrf.mxu1 }
  0xf3   :  { %3949 = vst [vmem:[#allocation7_spill] sm:$0xff] %v3258_v20  ;;  %v3261_v25 = vadd.f32 %v371_v21, %v3228_v28  ;;  %v3264_v30 = vadd.f32 %v484_v24, %v3230_v29 }
  0xf4   :  { %v373_v31 = vpop.f32.mrf.mxu0  ;;  %v486_v61 = vpop.f32.mrf.mxu1 }
  0xf5   :  { %3950 = vst [vmem:[#allocation8_spill] sm:$0xff] %v3261_v25  ;;  %3951 = vst [vmem:[#allocation9_spill] sm:$0xff] %v3264_v30  ;;  %v3267_v6 = vadd.f32 %v373_v31, %v3232_v32  ;;  %v3270_v9 = vadd.f32 %v486_v61, %v3234_v35 }
  0xf6   :  { %v375_v10 = vpop.f32.mrf.mxu0  ;;  %v488_v13 = vpop.f32.mrf.mxu1 }
  0xf7   :  { %3952 = vst [vmem:[#allocation10_spill] sm:$0xff] %v3267_v6  ;;  %3953 = vst [vmem:[#allocation11_spill] sm:$0xff] %v3270_v9  ;;  %v3273_v14 = vadd.f32 %v375_v10, %v3228_v28  ;;  %v3276_v1 = vadd.f32 %v488_v13, %v3230_v29 }
  0xf8   :  { %v377_v21 = vpop.f32.mrf.mxu0  ;;  %v490_v25 = vpop.f32.mrf.mxu1 }
  0xf9   :  { %3954 = vst [vmem:[#allocation12_spill] sm:$0xff] %v3273_v14  ;;  %3955 = vst [vmem:[#allocation13_spill] sm:$0xff] %v3276_v1  ;;  %v3279_v24 = vadd.f32 %v377_v21, %v3232_v32  ;;  %v3282_v30 = vadd.f32 %v490_v25, %v3234_v35 }
  0xfa   :  { %v381_v31 = vpop.f32.mrf.mxu0  ;;  %v494_v6 = vpop.f32.mrf.mxu1 }
  0xfb   :  { %3956 = vst [vmem:[#allocation14_spill] sm:$0xff] %v3279_v24  ;;  %3957 = vst [vmem:[#allocation15_spill] sm:$0xff] %v3282_v30  ;;  %v3285_v61 = vadd.f32 %v381_v31, %v3228_v28  ;;  %v3288_v9 = vadd.f32 %v494_v6, %v3230_v29 }
  0xfc   :  { %v383_v10 = vpop.f32.mrf.mxu0  ;;  %v496_v14 = vpop.f32.mrf.mxu1 }
  0xfd   :  { %3958 = vst [vmem:[#allocation16_spill] sm:$0xff] %v3285_v61  ;;  %3959 = vst [vmem:[#allocation17_spill] sm:$0xff] %v3288_v9  ;;  %v3291_v13 = vadd.f32 %v383_v10, %v3232_v32  ;;  %v3294_v1 = vadd.f32 %v496_v14, %v3234_v35 }
  0xfe   :  { %v385_v21 = vpop.f32.mrf.mxu0  ;;  %v498_v24 = vpop.f32.mrf.mxu1 }
  0xff   :  { %3960 = vst [vmem:[#allocation18_spill] sm:$0xff] %v3291_v13  ;;  %3961 = vst [vmem:[#allocation19_spill] sm:$0xff] %v3294_v1  ;;  %v3297_v25 = vadd.f32 %v385_v21, %v3228_v28  ;;  %v3300_v30 = vadd.f32 %v498_v24, %v3230_v29 }
 0x100   :  { %v387_v31 = vpop.f32.mrf.mxu0  ;;  %v500_v61 = vpop.f32.mrf.mxu1 }
 0x101   :  { %3962 = vst [vmem:[#allocation20_spill] sm:$0xff] %v3297_v25  ;;  %3963 = vst [vmem:[#allocation21_spill] sm:$0xff] %v3300_v30  ;;  %v3303_v6 = vadd.f32 %v387_v31, %v3232_v32  ;;  %v3306_v9 = vadd.f32 %v500_v61, %v3234_v35 }
 0x102   :  { %v391_v10 = vpop.f32.mrf.mxu0  ;;  %v504_v13 = vpop.f32.mrf.mxu1 }
 0x103   :  { %3964 = vst [vmem:[#allocation22_spill] sm:$0xff] %v3303_v6  ;;  %3965 = vst [vmem:[#allocation23_spill] sm:$0xff] %v3306_v9  ;;  %v3309_v14 = vadd.f32 %v391_v10, %v3228_v28  ;;  %v3312_v1 = vadd.f32 %v504_v13, %v3230_v29 }
 0x104   :  { %v393_v21 = vpop.f32.mrf.mxu0  ;;  %v506_v25 = vpop.f32.mrf.mxu1 }
 0x105   :  { %3966 = vst [vmem:[#allocation24_spill] sm:$0xff] %v3309_v14  ;;  %3967 = vst [vmem:[#allocation25_spill] sm:$0xff] %v3312_v1  ;;  %v3315_v24 = vadd.f32 %v393_v21, %v3232_v32  ;;  %v3318_v30 = vadd.f32 %v506_v25, %v3234_v35 }
 0x106   :  { %v395_v31 = vpop.f32.mrf.mxu0  ;;  %v508_v6 = vpop.f32.mrf.mxu1 }
 0x107   :  { %3968 = vst [vmem:[#allocation26_spill] sm:$0xff] %v3315_v24  ;;  %3969 = vst [vmem:[#allocation27_spill] sm:$0xff] %v3318_v30  ;;  %v3321_v61 = vadd.f32 %v395_v31, %v3228_v28  ;;  %v3324_v9 = vadd.f32 %v508_v6, %v3230_v29 }
 0x108   :  { %v397_v10 = vpop.f32.mrf.mxu0  ;;  %v510_v14 = vpop.f32.mrf.mxu1 }
 0x109   :  { %3970 = vst [vmem:[#allocation28_spill] sm:$0xff] %v3321_v61  ;;  %3971 = vst [vmem:[#allocation29_spill] sm:$0xff] %v3324_v9  ;;  %v3327_v13 = vadd.f32 %v397_v10, %v3232_v32  ;;  %v3330_v1 = vadd.f32 %v510_v14, %v3234_v35 }
 0x10a   :  { %v401_v21 = vpop.f32.mrf.mxu0  ;;  %v514_v24 = vpop.f32.mrf.mxu1 }
 0x10b   :  { %3972 = vst [vmem:[#allocation30_spill] sm:$0xff] %v3327_v13  ;;  %3973 = vst [vmem:[#allocation31_spill] sm:$0xff] %v3330_v1  ;;  %v3333_v25 = vadd.f32 %v401_v21, %v3228_v28  ;;  %v3336_v30 = vadd.f32 %v514_v24, %v3230_v29 }
 0x10c   :  { %v403_v31 = vpop.f32.mrf.mxu0  ;;  %v516_v61 = vpop.f32.mrf.mxu1 }
 0x10d   :  { %3974 = vst [vmem:[#allocation32_spill] sm:$0xff] %v3333_v25  ;;  %3975 = vst [vmem:[#allocation33_spill] sm:$0xff] %v3336_v30  ;;  %v3339_v6 = vadd.f32 %v403_v31, %v3232_v32  ;;  %v3342_v9 = vadd.f32 %v516_v61, %v3234_v35 }
 0x10e   :  { %v405_v10 = vpop.f32.mrf.mxu0  ;;  %v518_v13 = vpop.f32.mrf.mxu1 }
 0x10f   :  { %3976 = vst [vmem:[#allocation34_spill] sm:$0xff] %v3339_v6  ;;  %3977 = vst [vmem:[#allocation35_spill] sm:$0xff] %v3342_v9  ;;  %v3345_v14 = vadd.f32 %v405_v10, %v3228_v28  ;;  %v3348_v1 = vadd.f32 %v518_v13, %v3230_v29 }
 0x110   :  { %v407_v21 = vpop.f32.mrf.mxu0  ;;  %v520_v25 = vpop.f32.mrf.mxu1 }
 0x111   :  { %3978 = vst [vmem:[#allocation36_spill] sm:$0xff] %v3345_v14  ;;  %3979 = vst [vmem:[#allocation37_spill] sm:$0xff] %v3348_v1  ;;  %v3351_v24 = vadd.f32 %v407_v21, %v3232_v32  ;;  %v3354_v30 = vadd.f32 %v520_v25, %v3234_v35 }
 0x112   :  { %v411_v31 = vpop.f32.mrf.mxu0  ;;  %v524_v6 = vpop.f32.mrf.mxu1 }
 0x113   :  { %3980 = vst [vmem:[#allocation38_spill] sm:$0xff] %v3351_v24  ;;  %3981 = vst [vmem:[#allocation39_spill] sm:$0xff] %v3354_v30  ;;  %v3357_v61 = vadd.f32 %v411_v31, %v3228_v28  ;;  %v3360_v9 = vadd.f32 %v524_v6, %v3230_v29 }
 0x114   :  { %v413_v10 = vpop.f32.mrf.mxu0  ;;  %v526_v14 = vpop.f32.mrf.mxu1 }
 0x115   :  { %3982 = vst [vmem:[#allocation40_spill] sm:$0xff] %v3357_v61  ;;  %3983 = vst [vmem:[#allocation41_spill] sm:$0xff] %v3360_v9  ;;  %v3363_v13 = vadd.f32 %v413_v10, %v3232_v32  ;;  %v3366_v1 = vadd.f32 %v526_v14, %v3234_v35 }
 0x116   :  { %v415_v21 = vpop.f32.mrf.mxu0  ;;  %v528_v24 = vpop.f32.mrf.mxu1 }
 0x117   :  { %3984 = vst [vmem:[#allocation42_spill] sm:$0xff] %v3363_v13  ;;  %3985 = vst [vmem:[#allocation43_spill] sm:$0xff] %v3366_v1  ;;  %v3369_v25 = vadd.f32 %v415_v21, %v3228_v28  ;;  %v3372_v30 = vadd.f32 %v528_v24, %v3230_v29 }
 0x118   :  { %v417_v31 = vpop.f32.mrf.mxu0  ;;  %v530_v61 = vpop.f32.mrf.mxu1 }
 0x119   :  { %3986 = vst [vmem:[#allocation44_spill] sm:$0xff] %v3369_v25  ;;  %3987 = vst [vmem:[#allocation45_spill] sm:$0xff] %v3372_v30  ;;  %v3375_v6 = vadd.f32 %v417_v31, %v3232_v32  ;;  %v3378_v9 = vadd.f32 %v530_v61, %v3234_v35 }
 0x11a   :  { %v421_v10 = vpop.f32.mrf.mxu0  ;;  %v534_v13 = vpop.f32.mrf.mxu1 }
 0x11b   :  { %3988 = vst [vmem:[#allocation46_spill] sm:$0xff] %v3375_v6  ;;  %3989 = vst [vmem:[#allocation47_spill] sm:$0xff] %v3378_v9  ;;  %v3381_v14 = vadd.f32 %v421_v10, %v3228_v28  ;;  %v3384_v1 = vadd.f32 %v534_v13, %v3230_v29  ;;  %v352_v13 = vadd.f32 %v3209_v15, %v3228_v28 }
 0x11c   :  { %v423_v21 = vpop.f32.mrf.mxu0  ;;  %v536_v25 = vpop.f32.mrf.mxu1  ;;  %v358_v15 = vadd.f32 %v3224_v26, %v3232_v32  ;;  %v469_v26 = vadd.f32 %v3222_v23, %v3230_v29 }
 0x11d   :  { %3990 = vst [vmem:[#allocation48_spill] sm:$0xff] %v3381_v14  ;;  %3991 = vst [vmem:[#allocation49_spill] sm:$0xff] %v3384_v1  ;;  %v3387_v24 = vadd.f32 %v423_v21, %v3232_v32  ;;  %v3390_v30 = vadd.f32 %v536_v25, %v3234_v35 }
 0x11e   :  { %v425_v31 = vpop.f32.mrf.mxu0  ;;  %v538_v6 = vpop.f32.mrf.mxu1 }
 0x11f   :  { %3992 = vst [vmem:[#allocation50_spill] sm:$0xff] %v3387_v24  ;;  %3993 = vst [vmem:[#allocation51_spill] sm:$0xff] %v3390_v30  ;;  %v3393_v61 = vadd.f32 %v425_v31, %v3228_v28  ;;  %v3396_v9 = vadd.f32 %v538_v6, %v3230_v29  ;;  %v354_v30 = vadd.f32 %v3213_v17, %v3232_v32 }
 0x120   :  { %v427_v10 = vpop.f32.mrf.mxu0  ;;  %v540_v14 = vpop.f32.mrf.mxu1  ;;  %v356_v6 = vadd.f32 %v3220_v22, %v3228_v28  ;;  %v465_v22 = vadd.f32 %v3211_v16, %v3230_v29 }
 0x121   :  { %3994 = vst [vmem:[#allocation52_spill] sm:$0xff] %v3393_v61  ;;  %3995 = vst [vmem:[#allocation53_spill] sm:$0xff] %v3396_v9  ;;  %v3401_v1 = vadd.f32 %v427_v10, %v3232_v32  ;;  %v3404_v21 = vadd.f32 %v540_v14, %v3234_v35 }
 0x122   :  { %v846_v25 = vpop.f32.mrf.mxu0  ;;  %v889_v10 = vpop.f32.mrf.mxu1 }
 0x123   :  { %3996 = vst [vmem:[#allocation54_spill] sm:$0xff] %v3401_v1  ;;  %3997 = vst [vmem:[#allocation55_spill] sm:$0xff] %v3404_v21  ;;  %v898_v31 = vadd.f32 %v846_v25, %v352_v13  ;;  %v900_v32 = vadd.f32 %v889_v10, %v465_v22 }
 0x124   :  { %v848_v61 = vpop.f32.mrf.mxu0  ;;  %v891_v17 = vpop.f32.mrf.mxu1 }
 0x125   :  { %v2257_v9 = vmul.f32 -1.442695, %v898_v31  ;;  %v899_v24 = vadd.f32 %v848_v61, %v354_v30  ;;  %v467_v30 = vadd.f32 %v3215_v18, %v3234_v35 }
 0x126   :  { %v850_v20 = vpop.f32.mrf.mxu0  ;;  %v893_v28 = vpop.f32.mrf.mxu1 }
 0x127   :  { %2503 = vpow2.f32 %v2257_v9  ;;  %v2258_v1 = vmul.f32 -1.442695, %v899_v24  ;;  %v902_v14 = vadd.f32 %v850_v20, %v356_v6  ;;  %v901_v20 = vadd.f32 %v891_v17, %v467_v30 }
 0x128   :  { %v852_v21 = vpop.f32.mrf.mxu0  ;;  %v904_v9 = vadd.f32 %v893_v28, %v469_v26  ;;  %v2259_v24 = vmul.f32 -1.442695, %v900_v32  ;;  %v36_v26 = vld [vmem:[%s3941_s2 + $0x8] sm:$0xff] }
 0x129   :  { %2505 = vpow2.f32 %v2258_v1  ;;  %v2260_v8 = vmul.f32 -1.442695, %v902_v14  ;;  %v903_v12 = vadd.f32 %v852_v21, %v358_v15  ;;  %v895_v21 = vpop.f32.mrf.mxu1 }
 0x12a   :  { %v2262_v16 = vmul.f32 -1.442695, %v904_v9 }
 0x12b   :  { %2507 = vpow2.f32 %v2260_v8  ;;  %v2261_v13 = vmul.f32 -1.442695, %v903_v12  ;;  %v471_v12 = vadd.f32 %v3226_v27, %v3234_v35  ;;  %v35_v27 = vld [vmem:[%s3941_s2] sm:$0xff] }
 0x12d   :  { %2509 = vpow2.f32 %v2261_v13  ;;  %v905_v18 = vadd.f32 %v895_v21, %v471_v12 }
 0x12e   :  { %2511 = vtanh.f32 %v901_v20 }
 0x134   :  { %v2504_v1 = vpop.eup %2503 }
 0x135   :  { %v924_v61 = vadd.f32 1.0, %v2504_v1 }
 0x136   :  { %v2506_v8 = vpop.eup %2505 }
 0x137   :  { %2513 = vrcp.f32 %v924_v61  ;;  %v925_v25 = vadd.f32 1.0, %v2506_v8 }
 0x138   :  { %v2508_v31 = vpop.eup %2507  ;;  %2515 = vpow2.f32 %v2259_v24 }
 0x139   :  { %2517 = vrcp.f32 %v925_v25  ;;  %v927_v23 = vadd.f32 1.0, %v2508_v31 }
 0x13a   :  { %v2510_v29 = vpop.eup %2509  ;;  %2519 = vpow2.f32 %v2262_v16 }
 0x13b   :  { %2521 = vrcp.f32 %v927_v23  ;;  %v928_v6 = vadd.f32 1.0, %v2510_v29  ;;  %v2512_v15 = vpop.eup %2511  ;;  %v3998_v29 = vmov 0  }
 0x13c   :  { %2523 = vtanh.f32 %v905_v18 }
 0x13d   :  { %2525 = vrcp.f32 %v928_v6 }
 0x144   :  { %v2514_v10 = vpop.eup %2513 }
 0x145   :  { %v2516_v35 = vpop.eup %2515  ;;  %v946_v14 = vmul.f32 %v2514_v10, %v2512_v15 }
 0x146   :  { %v2518_v17 = vpop.eup %2517  ;;  %v926_v30 = vadd.f32 1.0, %v2516_v35 }
 0x147   :  { %v2520_v13 = vpop.eup %2519  ;;  %v944_v22 = vmul.f32 %v2518_v17, %v35_v27 }
 0x148   :  { %v2522_v28 = vpop.eup %2521  ;;  %v929_v1 = vadd.f32 1.0, %v2520_v13  ;;  %2527 = vrcp.f32 %v926_v30 }
 0x149   :  { %v2524_v32 = vpop.eup %2523  ;;  %v3426_v20 = vadd.f32 %v946_v14, %v944_v22 }
 0x14a   :  { %v2526_v9 = vpop.eup %2525  ;;  %v947_v61 = vmul.f32 %v2524_v32, %v2522_v28 }
 0x14b   :  { %v945_v24 = vmul.f32 %v2526_v9, %v36_v26  ;;  %2529 = vtanh.f32 %v3426_v20  ;;  %v3999_v9 = vld [vmem:[#allocation6_spill] sm:$0xff] }
 0x14c   :  { %2531 = vrcp.f32 %v929_v1 }
 0x14d   :  { %v3429_v21 = vadd.f32 %v947_v61, %v945_v24  ;;  %v4000_v24 = vld [vmem:[#allocation5_spill] sm:$0xff] }
 0x14f   :  { %2533 = vtanh.f32 %v3429_v21 }
 0x155   :  { %v2528_v8 = vpop.eup %2527 }
 0x158   :  { %v2530_v12 = vpop.eup %2529 }
 0x159   :  { %v2532_v16 = vpop.eup %2531  ;;  %v952_v31 = vmul.f32 %v2530_v12, %v2528_v8 }
 0x15c   :  { %v2534_v25 = vpop.eup %2533 }
 0x15d   :  { %v953_v18 = vmul.f32 %v2534_v25, %v2532_v16 }
 0x15f   :  { %v2354_v23 = vpack.c.bf16 %v953_v18, %v952_v31  ;;  %v4001_v31 = vld [vmem:[#allocation7_spill] sm:$0xff] }
 0x161   :  { %2355 = vst [vmem:[%s3942_s6] sm:$0xff] %v2354_v23   ;;  %1015 = vmatmul.mubr.bf16.vlgmr.msra.gmra.mxu0 %v2354_v23  ;;  %1058 = vmatmul.mubr.bf16.vlgmr.msra.gmra.mxu1 %v2354_v23 }
 0x162   :  { %1154 = vmatpush1.bf16.msra.mxu0 %v2951_v36  ;;  %1197 = vmatpush1.bf16.msra.mxu1 %v2963_v38 }
 0x163   :  { %1155 = vmatprep.subr.bf16.mxu0 %v2957_v37  ;;  %1198 = vmatprep.subr.bf16.mxu1 %v2968_v39 }
 0x164   :  { %1185 = vmatprep.mubr.bf16.mxu0 %v3998_v29  ;;  %1228 = vmatprep.mubr.bf16.mxu1 %v3998_v29 }
 0x166   :  { %1156 = vmatpush1.bf16.msra.mxu0 %v2975_v40  ;;  %1199 = vmatpush1.bf16.msra.mxu1 %v2988_v42 }
 0x167   :  { %1157 = vmatprep.subr.bf16.mxu0 %v2982_v41  ;;  %1200 = vmatprep.subr.bf16.mxu1 %v3009_v46 }
 0x16a   :  { %1158 = vmatpush1.bf16.msra.mxu0 %v2998_v44  ;;  %1201 = vmatpush1.bf16.msra.mxu1 %v3015_v47 }
 0x16b   :  { %1159 = vmatprep.subr.bf16.mxu0 %v3003_v45  ;;  %1202 = vmatprep.subr.bf16.mxu1 %v3020_v48 }
 0x16e   :  { %1160 = vmatpush1.bf16.msra.mxu0 %v3028_v49  ;;  %1203 = vmatpush1.bf16.msra.mxu1 %v3041_v51 }
 0x16f   :  { %1161 = vmatprep.subr.bf16.mxu0 %v3033_v50  ;;  %1204 = vmatprep.subr.bf16.mxu1 %v3056_v54 }
 0x172   :  { %1162 = vmatpush1.bf16.msra.mxu0 %v3050_v53  ;;  %1205 = vmatpush1.bf16.msra.mxu1 %v3068_v56 }
 0x173   :  { %1163 = vmatprep.subr.bf16.mxu0 %v3062_v55  ;;  %1206 = vmatprep.subr.bf16.mxu1 %v3073_v57 }
 0x176   :  { %1164 = vmatpush1.bf16.msra.mxu0 %v3081_v58  ;;  %1207 = vmatpush1.bf16.msra.mxu1 %v3094_v60 }
 0x177   :  { %1165 = vmatprep.subr.bf16.mxu0 %v3088_v59  ;;  %1208 = vmatprep.subr.bf16.mxu1 %v3109_v63 }
 0x17a   :  { %1166 = vmatpush1.bf16.msra.mxu0 %v3104_v62  ;;  %1209 = vmatpush1.bf16.msra.mxu1 %v3121_v2 }
 0x17b   :  { %1167 = vmatprep.subr.bf16.mxu0 %v3116_v0  ;;  %1210 = vmatprep.subr.bf16.mxu1 %v3126_v3 }
 0x17e   :  { %1168 = vmatpush1.bf16.msra.mxu0 %v3135_v4  ;;  %1211 = vmatpush1.bf16.msra.mxu1 %v3142_v5 }
 0x17f   :  { %1324 = vmatprep.subr.bf16.mxu0 %v2938_v33  ;;  %1367 = vmatprep.subr.bf16.mxu1 %v2943_v34 }
 0x221   :  { %v1016_v6 = vpop.f32.mrf.mxu0  ;;  %v1059_v35 = vpop.f32.mrf.mxu1 }
 0x222   :  { %v1068_v15 = vadd.f32 %v1016_v6, %v3237_v43  ;;  %v1070_v43 = vadd.f32 %v1059_v35, %v3240_v52 }
 0x223   :  { %v1018_v10 = vpop.f32.mrf.mxu0  ;;  %v1061_v30 = vpop.f32.mrf.mxu1 }
 0x224   :  { %v2265_v27 = vmul.f32 -1.442695, %v1068_v15  ;;  %v1069_v14 = vadd.f32 %v1018_v10, %v3243_v7  ;;  %v2267_v7 = vmul.f32 -1.442695, %v1070_v43  ;;  %v1071_v61 = vadd.f32 %v1061_v30, %v4000_v24 }
 0x225   :  { %v1020_v17 = vpop.f32.mrf.mxu0  ;;  %v1063_v32 = vpop.f32.mrf.mxu1 }
 0x226   :  { %2535 = vpow2.f32 %v2265_v27  ;;  %v2266_v13 = vmul.f32 -1.442695, %v1069_v14  ;;  %v1072_v22 = vadd.f32 %v1020_v17, %v3249_v11  ;;  %v1074_v1 = vadd.f32 %v1063_v32, %v3999_v9 }
 0x227   :  { %v1022_v28 = vpop.f32.mrf.mxu0  ;;  %v1065_v8 = vpop.f32.mrf.mxu1 }
 0x228   :  { %2537 = vpow2.f32 %v2266_v13  ;;  %v2268_v26 = vmul.f32 -1.442695, %v1072_v22  ;;  %v1073_v33 = vadd.f32 %v1022_v28, %v3255_v19  ;;  %v2270_v11 = vmul.f32 -1.442695, %v1074_v1 }
 0x229   :  { %v1075_v19 = vadd.f32 %v1065_v8, %v4001_v31  ;;  %v4009_v31 = vld [vmem:[#allocation15_spill] sm:$0xff] }
 0x22a   :  { %2539 = vpow2.f32 %v2268_v26  ;;  %v2269_v34 = vmul.f32 -1.442695, %v1073_v33 }
 0x22c   :  { %2541 = vpow2.f32 %v2269_v34 }
 0x22d   :  { %2543 = vpow2.f32 %v2267_v7 }
 0x22e   :  { %2545 = vtanh.f32 %v1071_v61 }
 0x233   :  { %v2536_v12 = vpop.eup %2535 }
 0x234   :  { %v1094_v16 = vadd.f32 1.0, %v2536_v12 }
 0x235   :  { %v2538_v25 = vpop.eup %2537 }
 0x236   :  { %2547 = vrcp.f32 %v1094_v16  ;;  %v1095_v18 = vadd.f32 1.0, %v2538_v25 }
 0x237   :  { %v2540_v23 = vpop.eup %2539  ;;  %2549 = vpow2.f32 %v2270_v11 }
 0x238   :  { %2551 = vrcp.f32 %v1095_v18  ;;  %v1097_v52 = vadd.f32 1.0, %v2540_v23 }
 0x239   :  { %v2542_v6 = vpop.eup %2541  ;;  %2553 = vtanh.f32 %v1075_v19 }
 0x23a   :  { %2555 = vrcp.f32 %v1097_v52  ;;  %v1098_v15 = vadd.f32 1.0, %v2542_v6  ;;  %v2544_v10 = vpop.eup %2543 }
 0x23b   :  { %v2546_v27 = vpop.eup %2545  ;;  %v1096_v26 = vadd.f32 1.0, %v2544_v10 }
 0x23c   :  { %2557 = vrcp.f32 %v1098_v15 }
 0x23d   :  { %2559 = vrcp.f32 %v1096_v26 }
 0x243   :  { %v2548_v35 = vpop.eup %2547 }
 0x244   :  { %v2550_v14 = vpop.eup %2549  ;;  %v1116_v17 = vmul.f32 %v2548_v35, %v2546_v27 }
 0x245   :  { %v2552_v13 = vpop.eup %2551  ;;  %v1099_v32 = vadd.f32 1.0, %v2550_v14 }
 0x246   :  { %v2554_v22 = vpop.eup %2553  ;;  %v1114_v28 = vmul.f32 %v2552_v13, %v3426_v20 }
 0x247   :  { %v2556_v30 = vpop.eup %2555 }
 0x248   :  { %v3478_v33 = vadd.f32 %v1116_v17, %v1114_v28  ;;  %v1117_v34 = vmul.f32 %v2556_v30, %v2554_v22 }
 0x249   :  { %v2558_v43 = vpop.eup %2557 }
 0x24a   :  { %v1115_v9 = vmul.f32 %v2558_v43, %v3429_v21  ;;  %2561 = vtanh.f32 %v3478_v33  ;;  %v2560_v7 = vpop.eup %2559 }
 0x24b   :  { %2563 = vrcp.f32 %v1099_v32 }
 0x24c   :  { %v3482_v1 = vadd.f32 %v1117_v34, %v1115_v9 }
 0x24e   :  { %2565 = vtanh.f32 %v3482_v1 }
 0x257   :  { %v2562_v24 = vpop.eup %2561 }
 0x258   :  { %v2564_v20 = vpop.eup %2563  ;;  %v1122_v8 = vmul.f32 %v2562_v24, %v2560_v7 }
 0x25b   :  { %v2566_v61 = vpop.eup %2565 }
 0x25c   :  { %v1123_v12 = vmul.f32 %v2566_v61, %v2564_v20 }
 0x25e   :  { %v2359_v11 = vpack.c.bf16 %v1123_v12, %v1122_v8 }
 0x260   :  { %2391 = vst [vmem:[%s3942_s6 + $0x8] sm:$0xff] %v2359_v11   ;;  %1186 = vmatmul.mubr.bf16.vlgmr.msra.gmra.mxu0 %v2359_v11  ;;  %1229 = vmatmul.mubr.bf16.vlgmr.msra.gmra.mxu1 %v2359_v11 }
 0x261   :  { %1325 = vmatpush1.bf16.msra.mxu0 %v2951_v36  ;;  %1368 = vmatpush1.bf16.msra.mxu1 %v2963_v38  ;;  %v3523_v36 = vld [vmem:[%s3938_s4 + $0xe4] ss:$16 sps:$4 sm:$0xff]  }
 0x262   :  { %1326 = vmatprep.subr.bf16.mxu0 %v2957_v37  ;;  %1369 = vmatprep.subr.bf16.mxu1 %v2968_v39  ;;  %v3529_v37 = vld [vmem:[%s3938_s4 + $0xec] ss:$16 sps:$4 sm:$0xff]  }
 0x263   :  { %1356 = vmatprep.mubr.bf16.mxu0 %v3998_v29  ;;  %1399 = vmatprep.mubr.bf16.mxu1 %v3998_v29  ;;  %v4002_v39 = vld [vmem:[#allocation8_spill] sm:$0xff] }
 0x265   :  { %1327 = vmatpush1.bf16.msra.mxu0 %v2975_v40  ;;  %1370 = vmatpush1.bf16.msra.mxu1 %v2988_v42 }
 0x266   :  { %1328 = vmatprep.subr.bf16.mxu0 %v2982_v41  ;;  %1371 = vmatprep.subr.bf16.mxu1 %v3009_v46 }
 0x269   :  { %1329 = vmatpush1.bf16.msra.mxu0 %v2998_v44  ;;  %1372 = vmatpush1.bf16.msra.mxu1 %v3015_v47 }
 0x26a   :  { %1330 = vmatprep.subr.bf16.mxu0 %v3003_v45  ;;  %1373 = vmatprep.subr.bf16.mxu1 %v3020_v48  ;;  %v4003_v45 = vld [vmem:[#allocation10_spill] sm:$0xff] }
 0x26d   :  { %1331 = vmatpush1.bf16.msra.mxu0 %v3028_v49  ;;  %1374 = vmatpush1.bf16.msra.mxu1 %v3041_v51  ;;  %v4004_v49 = vld [vmem:[#allocation12_spill] sm:$0xff] }
 0x26e   :  { %1332 = vmatprep.subr.bf16.mxu0 %v3033_v50  ;;  %1375 = vmatprep.subr.bf16.mxu1 %v3056_v54 }
 0x271   :  { %1333 = vmatpush1.bf16.msra.mxu0 %v3050_v53  ;;  %1376 = vmatpush1.bf16.msra.mxu1 %v3068_v56 }
 0x272   :  { %1334 = vmatprep.subr.bf16.mxu0 %v3062_v55  ;;  %1377 = vmatprep.subr.bf16.mxu1 %v3073_v57  ;;  %v4005_v55 = vld [vmem:[#allocation14_spill] sm:$0xff] }
 0x275   :  { %1335 = vmatpush1.bf16.msra.mxu0 %v3081_v58  ;;  %1378 = vmatpush1.bf16.msra.mxu1 %v3094_v60  ;;  %v4006_v58 = vld [vmem:[#allocation9_spill] sm:$0xff] }
 0x276   :  { %1336 = vmatprep.subr.bf16.mxu0 %v3088_v59  ;;  %1379 = vmatprep.subr.bf16.mxu1 %v3109_v63 }
 0x279   :  { %1337 = vmatpush1.bf16.msra.mxu0 %v3104_v62  ;;  %1380 = vmatpush1.bf16.msra.mxu1 %v3121_v2  ;;  %v4007_v62 = vld [vmem:[#allocation13_spill] sm:$0xff]  ;;  %v4008_v2 = vld [vmem:[#allocation11_spill] sm:$0xff] }
 0x27a   :  { %1338 = vmatprep.subr.bf16.mxu0 %v3116_v0  ;;  %1381 = vmatprep.subr.bf16.mxu1 %v3126_v3 }
 0x27d   :  { %1339 = vmatpush1.bf16.msra.mxu0 %v3135_v4  ;;  %1382 = vmatpush1.bf16.msra.mxu1 %v3142_v5 }
 0x27e   :  { %1495 = vmatprep.subr.bf16.mxu0 %v3523_v36  ;;  %1538 = vmatprep.subr.bf16.mxu1 %v3529_v37 }
 0x320   :  { %v1187_v38 = vpop.f32.mrf.mxu0  ;;  %v1230_v44 = vpop.f32.mrf.mxu1 }
 0x321   :  { %v1239_v40 = vadd.f32 %v1187_v38, %v4002_v39  ;;  %v1241_v59 = vadd.f32 %v1230_v44, %v4006_v58  ;;  %v3560_v39 = vld [vmem:[%s3938_s4 + $0xe8] ss:$16 sps:$4 sm:$0xff]   ;;  %v3664_v58 = vld [vmem:[%s3938_s4 + $0x44] ss:$16 sps:$4 sm:$0xff]  }
 0x322   :  { %v1189_v41 = vpop.f32.mrf.mxu0  ;;  %v1232_v53 = vpop.f32.mrf.mxu1  ;;  %v3586_v44 = vld [vmem:[%s3938_s4 + $0xc8] ss:$16 sps:$4 sm:$0xff]  }
 0x323   :  { %v2275_v42 = vmul.f32 -1.442695, %v1239_v40  ;;  %v1240_v46 = vadd.f32 %v1189_v41, %v4003_v45  ;;  %v2277_v0 = vmul.f32 -1.442695, %v1241_v59  ;;  %v1242_v3 = vadd.f32 %v1232_v53, %v4008_v2  ;;  %v3566_v40 = vld [vmem:[%s3938_s4 + $0xc4] ss:$16 sps:$4 sm:$0xff]  }
 0x324   :  { %v1191_v47 = vpop.f32.mrf.mxu0  ;;  %v1234_v60 = vpop.f32.mrf.mxu1  ;;  %v3572_v41 = vld [vmem:[%s3938_s4 + $0xcc] ss:$16 sps:$4 sm:$0xff]   ;;  %v3592_v45 = vld [vmem:[%s3938_s4 + $0xa4] ss:$16 sps:$4 sm:$0xff]   ;;  %v3634_v53 = vld [vmem:[%s3938_s4 + $0x88] ss:$16 sps:$4 sm:$0xff]  }
 0x325   :  { %2567 = vpow2.f32 %v2275_v42  ;;  %v2276_v48 = vmul.f32 -1.442695, %v1240_v46  ;;  %v1243_v50 = vadd.f32 %v1191_v47, %v4004_v49  ;;  %v1245_v63 = vadd.f32 %v1234_v60, %v4007_v62  ;;  %v3580_v42 = vld [vmem:[%s3938_s4 + $0xc0] ss:$16 sps:$4 sm:$0xff]   ;;  %v3598_v46 = vld [vmem:[%s3938_s4 + $0xac] ss:$16 sps:$4 sm:$0xff]  }
 0x326   :  { %v1193_v51 = vpop.f32.mrf.mxu0  ;;  %v1236_v4 = vpop.f32.mrf.mxu1  ;;  %v3604_v47 = vld [vmem:[%s3938_s4 + $0xa0] ss:$16 sps:$4 sm:$0xff]   ;;  %v3616_v49 = vld [vmem:[%s3938_s4 + $0x84] ss:$16 sps:$4 sm:$0xff]   ;;  %v3670_v59 = vld [vmem:[%s3938_s4 + $0x4c] ss:$16 sps:$4 sm:$0xff]  }
 0x327   :  { %2569 = vpow2.f32 %v2276_v48  ;;  %v2278_v54 = vmul.f32 -1.442695, %v1243_v50  ;;  %v1244_v56 = vadd.f32 %v1193_v51, %v4005_v55  ;;  %v2280_v21 = vmul.f32 -1.442695, %v1245_v63  ;;  %v3610_v48 = vld [vmem:[%s3938_s4 + $0xa8] ss:$16 sps:$4 sm:$0xff]  }
 0x328   :  { %v1246_v19 = vadd.f32 %v1236_v4, %v4009_v31  ;;  %v3622_v50 = vld [vmem:[%s3938_s4 + $0x8c] ss:$16 sps:$4 sm:$0xff]   ;;  %v3628_v51 = vld [vmem:[%s3938_s4 + $0x80] ss:$16 sps:$4 sm:$0xff]   ;;  %v3682_v62 = vld [vmem:[%s3938_s4 + $0x48] ss:$16 sps:$4 sm:$0xff]  }
 0x329   :  { %2571 = vpow2.f32 %v2278_v54  ;;  %v2279_v57 = vmul.f32 -1.442695, %v1244_v56  ;;  %v3640_v54 = vld [vmem:[%s3938_s4 + $0x64] ss:$16 sps:$4 sm:$0xff]   ;;  %v3646_v55 = vld [vmem:[%s3938_s4 + $0x6c] ss:$16 sps:$4 sm:$0xff]  }
 0x32a   :  { %v3652_v56 = vld [vmem:[%s3938_s4 + $0x60] ss:$16 sps:$4 sm:$0xff]   ;;  %v3688_v63 = vld [vmem:[%s3938_s4 + $0x24] ss:$16 sps:$4 sm:$0xff]   ;;  %v4010_v31 = vld [vmem:[#allocation16_spill] sm:$0xff] }
 0x32b   :  { %2573 = vpow2.f32 %v2279_v57  ;;  %v3658_v57 = vld [vmem:[%s3938_s4 + $0x68] ss:$16 sps:$4 sm:$0xff]   ;;  %v3676_v60 = vld [vmem:[%s3938_s4 + $0x40] ss:$16 sps:$4 sm:$0xff]   ;;  %v3712_v4 = vld [vmem:[%s3938_s4 + $0x4] ss:$16 sps:$4 sm:$0xff]  }
 0x32c   :  { %2575 = vpow2.f32 %v2277_v0  ;;  %v3694_v0 = vld [vmem:[%s3938_s4 + $0x2c] ss:$16 sps:$4 sm:$0xff]   ;;  %v3700_v2 = vld [vmem:[%s3938_s4 + $0x20] ss:$16 sps:$4 sm:$0xff]  }
 0x32d   :  { %2577 = vtanh.f32 %v1242_v3  ;;  %v3706_v3 = vld [vmem:[%s3938_s4 + $0x28] ss:$16 sps:$4 sm:$0xff]  }
 0x332   :  { %v2568_v5 = vpop.eup %2567 }
 0x333   :  { %v1265_v16 = vadd.f32 1.0, %v2568_v5  ;;  %v3718_v5 = vld [vmem:[%s3938_s4 + $0xc] ss:$16 sps:$4 sm:$0xff]  }
 0x334   :  { %v2570_v25 = vpop.eup %2569 }
 0x335   :  { %2579 = vrcp.f32 %v1265_v16  ;;  %v1266_v18 = vadd.f32 1.0, %v2570_v25  ;;  %v3730_v16 = vld [vmem:[%s3938_s4 + $0x8] ss:$16 sps:$4 sm:$0xff]  }
 0x336   :  { %v2572_v23 = vpop.eup %2571  ;;  %2581 = vpow2.f32 %v2280_v21  ;;  %v3724_v21 = vld [vmem:[%s3938_s4] ss:$16 sps:$4 sm:$0xff]  }
 0x337   :  { %2583 = vrcp.f32 %v1266_v18  ;;  %v1268_v52 = vadd.f32 1.0, %v2572_v23 }
 0x338   :  { %v2574_v6 = vpop.eup %2573  ;;  %2585 = vtanh.f32 %v1246_v19 }
 0x339   :  { %2587 = vrcp.f32 %v1268_v52  ;;  %v1269_v15 = vadd.f32 1.0, %v2574_v6  ;;  %v2576_v10 = vpop.eup %2575  ;;  %v4011_v6 = vld [vmem:[#allocation18_spill] sm:$0xff] }
 0x33a   :  { %v2578_v27 = vpop.eup %2577  ;;  %v1267_v26 = vadd.f32 1.0, %v2576_v10 }
 0x33b   :  { %2589 = vrcp.f32 %v1269_v15 }
 0x33c   :  { %2591 = vrcp.f32 %v1267_v26 }
 0x342   :  { %v2580_v35 = vpop.eup %2579 }
 0x343   :  { %v2582_v14 = vpop.eup %2581  ;;  %v1287_v17 = vmul.f32 %v2580_v35, %v2578_v27  ;;  %v4012_v35 = vld [vmem:[#allocation20_spill] sm:$0xff] }
 0x344   :  { %v2584_v13 = vpop.eup %2583  ;;  %v1270_v9 = vadd.f32 1.0, %v2582_v14 }
 0x345   :  { %v2586_v22 = vpop.eup %2585  ;;  %v1285_v28 = vmul.f32 %v2584_v13, %v3478_v33 }
 0x346   :  { %v2588_v30 = vpop.eup %2587 }
 0x347   :  { %v3541_v34 = vadd.f32 %v1287_v17, %v1285_v28  ;;  %v1288_v43 = vmul.f32 %v2588_v30, %v2586_v22  ;;  %v4013_v28 = vld [vmem:[#allocation22_spill] sm:$0xff] }
 0x348   :  { %v2590_v32 = vpop.eup %2589 }
 0x349   :  { %v1286_v7 = vmul.f32 %v2590_v32, %v3482_v1  ;;  %2593 = vtanh.f32 %v3541_v34  ;;  %v2592_v20 = vpop.eup %2591  ;;  %v3554_v1 = vld [vmem:[%s3938_s4 + $0xe0] ss:$16 sps:$4 sm:$0xff]  }
 0x34a   :  { %2595 = vrcp.f32 %v1270_v9 }
 0x34b   :  { %v3545_v24 = vadd.f32 %v1288_v43, %v1286_v7  ;;  %v4014_v43 = vld [vmem:[#allocation17_spill] sm:$0xff] }
 0x34c   :  { %v4015_v7 = vld [vmem:[#allocation21_spill] sm:$0xff] }
 0x34d   :  { %2597 = vtanh.f32 %v3545_v24 }
 0x356   :  { %v2594_v61 = vpop.eup %2593 }
 0x357   :  { %v2596_v33 = vpop.eup %2595  ;;  %v1293_v12 = vmul.f32 %v2594_v61, %v2592_v20 }
 0x35a   :  { %v2598_v8 = vpop.eup %2597 }
 0x35b   :  { %v1294_v11 = vmul.f32 %v2598_v8, %v2596_v33  ;;  %v4016_v33 = vld [vmem:[#allocation19_spill] sm:$0xff] }
 0x35d   :  { %v2364_v38 = vpack.c.bf16 %v1294_v11, %v1293_v12 }
 0x35f   :  { %2392 = vst [vmem:[%s3942_s6 + $0x10] sm:$0xff] %v2364_v38   ;;  %1357 = vmatmul.mubr.bf16.vlgmr.msra.gmra.mxu0 %v2364_v38  ;;  %1400 = vmatmul.mubr.bf16.vlgmr.msra.gmra.mxu1 %v2364_v38 }
 0x360   :  { %1496 = vmatpush1.bf16.msra.mxu0 %v3554_v1  ;;  %1539 = vmatpush1.bf16.msra.mxu1 %v3560_v39 }
 0x361   :  { %1497 = vmatprep.subr.bf16.mxu0 %v3566_v40  ;;  %1540 = vmatprep.subr.bf16.mxu1 %v3572_v41 }
 0x362   :  { %1527 = vmatprep.mubr.bf16.mxu0 %v3998_v29  ;;  %1570 = vmatprep.mubr.bf16.mxu1 %v3998_v29 }
 0x364   :  { %1498 = vmatpush1.bf16.msra.mxu0 %v3580_v42  ;;  %1541 = vmatpush1.bf16.msra.mxu1 %v3586_v44 }
 0x365   :  { %1499 = vmatprep.subr.bf16.mxu0 %v3592_v45  ;;  %1542 = vmatprep.subr.bf16.mxu1 %v3598_v46 }
 0x368   :  { %1500 = vmatpush1.bf16.msra.mxu0 %v3604_v47  ;;  %1543 = vmatpush1.bf16.msra.mxu1 %v3610_v48 }
 0x369   :  { %1501 = vmatprep.subr.bf16.mxu0 %v3616_v49  ;;  %1544 = vmatprep.subr.bf16.mxu1 %v3622_v50 }
 0x36c   :  { %1502 = vmatpush1.bf16.msra.mxu0 %v3628_v51  ;;  %1545 = vmatpush1.bf16.msra.mxu1 %v3634_v53 }
 0x36d   :  { %1503 = vmatprep.subr.bf16.mxu0 %v3640_v54  ;;  %1546 = vmatprep.subr.bf16.mxu1 %v3646_v55 }
 0x370   :  { %1504 = vmatpush1.bf16.msra.mxu0 %v3652_v56  ;;  %1547 = vmatpush1.bf16.msra.mxu1 %v3658_v57 }
 0x371   :  { %1505 = vmatprep.subr.bf16.mxu0 %v3664_v58  ;;  %1548 = vmatprep.subr.bf16.mxu1 %v3670_v59 }
 0x374   :  { %1506 = vmatpush1.bf16.msra.mxu0 %v3676_v60  ;;  %1549 = vmatpush1.bf16.msra.mxu1 %v3682_v62 }
 0x375   :  { %1507 = vmatprep.subr.bf16.mxu0 %v3688_v63  ;;  %1550 = vmatprep.subr.bf16.mxu1 %v3694_v0 }
 0x378   :  { %1508 = vmatpush1.bf16.msra.mxu0 %v3700_v2  ;;  %1551 = vmatpush1.bf16.msra.mxu1 %v3706_v3 }
 0x379   :  { %1509 = vmatprep.subr.bf16.mxu0 %v3712_v4  ;;  %1552 = vmatprep.subr.bf16.mxu1 %v3718_v5 }
 0x37c   :  { %1510 = vmatpush1.bf16.msra.mxu0 %v3724_v21  ;;  %1553 = vmatpush1.bf16.msra.mxu1 %v3730_v16 }
 0x37d   :  { %1666 = vmatprep.subr.bf16.mxu0 %v3523_v36  ;;  %1709 = vmatprep.subr.bf16.mxu1 %v3529_v37 }
 0x41f   :  { %v1358_v25 = vpop.f32.mrf.mxu0  ;;  %v1401_v52 = vpop.f32.mrf.mxu1 }
 0x420   :  { %v1410_v19 = vadd.f32 %v1358_v25, %v4010_v31  ;;  %v1412_v32 = vadd.f32 %v1401_v52, %v4014_v43 }
 0x421   :  { %v1360_v18 = vpop.f32.mrf.mxu0  ;;  %v1403_v13 = vpop.f32.mrf.mxu1 }
 0x422   :  { %v2285_v23 = vmul.f32 -1.442695, %v1410_v19  ;;  %v1411_v15 = vadd.f32 %v1360_v18, %v4011_v6  ;;  %v2287_v61 = vmul.f32 -1.442695, %v1412_v32  ;;  %v1413_v8 = vadd.f32 %v1403_v13, %v4016_v33  ;;  %v4017_v19 = vld [vmem:[#allocation23_spill] sm:$0xff] }
 0x423   :  { %v1362_v10 = vpop.f32.mrf.mxu0  ;;  %v1405_v9 = vpop.f32.mrf.mxu1 }
 0x424   :  { %2599 = vpow2.f32 %v2285_v23  ;;  %v2286_v27 = vmul.f32 -1.442695, %v1411_v15  ;;  %v1414_v14 = vadd.f32 %v1362_v10, %v4012_v35  ;;  %v1416_v20 = vadd.f32 %v1405_v9, %v4015_v7 }
 0x425   :  { %v1364_v17 = vpop.f32.mrf.mxu0  ;;  %v1407_v12 = vpop.f32.mrf.mxu1 }
 0x426   :  { %2601 = vpow2.f32 %v2286_v27  ;;  %v2288_v22 = vmul.f32 -1.442695, %v1414_v14  ;;  %v1415_v30 = vadd.f32 %v1364_v17, %v4013_v28  ;;  %v2290_v38 = vmul.f32 -1.442695, %v1416_v20 }
 0x427   :  { %v1417_v18 = vadd.f32 %v1407_v12, %v4017_v19  ;;  %v4018_v19 = vld [vmem:[#allocation24_spill] sm:$0xff] }
 0x428   :  { %2603 = vpow2.f32 %v2288_v22  ;;  %v2289_v26 = vmul.f32 -1.442695, %v1415_v30 }
 0x42a   :  { %2605 = vpow2.f32 %v2289_v26 }
 0x42b   :  { %2607 = vpow2.f32 %v2287_v61 }
 0x42c   :  { %2609 = vtanh.f32 %v1413_v8 }
 0x431   :  { %v2600_v11 = vpop.eup %2599 }
 0x432   :  { %v1436_v25 = vadd.f32 1.0, %v2600_v11 }
 0x433   :  { %v2602_v31 = vpop.eup %2601 }
 0x434   :  { %2611 = vrcp.f32 %v1436_v25  ;;  %v1437_v23 = vadd.f32 1.0, %v2602_v31 }
 0x435   :  { %v2604_v6 = vpop.eup %2603  ;;  %2613 = vpow2.f32 %v2290_v38 }
 0x436   :  { %2615 = vrcp.f32 %v1437_v23  ;;  %v1439_v52 = vadd.f32 1.0, %v2604_v6 }
 0x437   :  { %v2606_v15 = vpop.eup %2605  ;;  %2617 = vtanh.f32 %v1417_v18 }
 0x438   :  { %2619 = vrcp.f32 %v1439_v52  ;;  %v1440_v10 = vadd.f32 1.0, %v2606_v15  ;;  %v2608_v27 = vpop.eup %2607  ;;  %v4019_v15 = vld [vmem:[#allocation26_spill] sm:$0xff] }
 0x439   :  { %v2610_v35 = vpop.eup %2609  ;;  %v1438_v43 = vadd.f32 1.0, %v2608_v27 }
 0x43a   :  { %2621 = vrcp.f32 %v1440_v10 }
 0x43b   :  { %2623 = vrcp.f32 %v1438_v43 }
 0x441   :  { %v2612_v14 = vpop.eup %2611 }
 0x442   :  { %v2614_v17 = vpop.eup %2613  ;;  %v1458_v13 = vmul.f32 %v2612_v14, %v2610_v35  ;;  %v4020_v14 = vld [vmem:[#allocation28_spill] sm:$0xff] }
 0x443   :  { %v2616_v22 = vpop.eup %2615  ;;  %v1441_v20 = vadd.f32 1.0, %v2614_v17 }
 0x444   :  { %v2618_v28 = vpop.eup %2617  ;;  %v1456_v30 = vmul.f32 %v2616_v22, %v3541_v34 }
 0x445   :  { %v2620_v26 = vpop.eup %2619 }
 0x446   :  { %v3744_v32 = vadd.f32 %v1458_v13, %v1456_v30  ;;  %v1459_v9 = vmul.f32 %v2620_v26, %v2618_v28  ;;  %v4021_v30 = vld [vmem:[#allocation30_spill] sm:$0xff] }
 0x447   :  { %v2622_v7 = vpop.eup %2621 }
 0x448   :  { %v1457_v61 = vmul.f32 %v2622_v7, %v3545_v24  ;;  %2625 = vtanh.f32 %v3744_v32  ;;  %v2624_v8 = vpop.eup %2623 }
 0x449   :  { %2627 = vrcp.f32 %v1441_v20 }
 0x44a   :  { %v3748_v33 = vadd.f32 %v1459_v9, %v1457_v61  ;;  %v4022_v9 = vld [vmem:[#allocation25_spill] sm:$0xff] }
 0x44b   :  { %v4023_v61 = vld [vmem:[#allocation29_spill] sm:$0xff] }
 0x44c   :  { %2629 = vtanh.f32 %v3748_v33 }
 0x455   :  { %v2626_v12 = vpop.eup %2625 }
 0x456   :  { %v2628_v34 = vpop.eup %2627  ;;  %v1464_v38 = vmul.f32 %v2626_v12, %v2624_v8 }
 0x459   :  { %v2630_v11 = vpop.eup %2629 }
 0x45a   :  { %v1465_v25 = vmul.f32 %v2630_v11, %v2628_v34  ;;  %v4024_v34 = vld [vmem:[#allocation27_spill] sm:$0xff] }
 0x45c   :  { %v2369_v31 = vpack.c.bf16 %v1465_v25, %v1464_v38 }
 0x45e   :  { %2393 = vst [vmem:[%s3942_s6 + $0x18] sm:$0xff] %v2369_v31   ;;  %1528 = vmatmul.mubr.bf16.vlgmr.msra.gmra.mxu0 %v2369_v31  ;;  %1571 = vmatmul.mubr.bf16.vlgmr.msra.gmra.mxu1 %v2369_v31 }
 0x45f   :  { %1667 = vmatpush1.bf16.msra.mxu0 %v3554_v1  ;;  %1710 = vmatpush1.bf16.msra.mxu1 %v3560_v39 }
 0x460   :  { %1668 = vmatprep.subr.bf16.mxu0 %v3566_v40  ;;  %1711 = vmatprep.subr.bf16.mxu1 %v3572_v41 }
 0x461   :  { %1698 = vmatprep.mubr.bf16.mxu0 %v3998_v29  ;;  %1741 = vmatprep.mubr.bf16.mxu1 %v3998_v29 }
 0x463   :  { %1669 = vmatpush1.bf16.msra.mxu0 %v3580_v42  ;;  %1712 = vmatpush1.bf16.msra.mxu1 %v3586_v44 }
 0x464   :  { %1670 = vmatprep.subr.bf16.mxu0 %v3592_v45  ;;  %1713 = vmatprep.subr.bf16.mxu1 %v3598_v46 }
 0x467   :  { %1671 = vmatpush1.bf16.msra.mxu0 %v3604_v47  ;;  %1714 = vmatpush1.bf16.msra.mxu1 %v3610_v48 }
 0x468   :  { %1672 = vmatprep.subr.bf16.mxu0 %v3616_v49  ;;  %1715 = vmatprep.subr.bf16.mxu1 %v3622_v50 }
 0x46b   :  { %1673 = vmatpush1.bf16.msra.mxu0 %v3628_v51  ;;  %1716 = vmatpush1.bf16.msra.mxu1 %v3634_v53 }
 0x46c   :  { %1674 = vmatprep.subr.bf16.mxu0 %v3640_v54  ;;  %1717 = vmatprep.subr.bf16.mxu1 %v3646_v55 }
 0x46f   :  { %1675 = vmatpush1.bf16.msra.mxu0 %v3652_v56  ;;  %1718 = vmatpush1.bf16.msra.mxu1 %v3658_v57 }
 0x470   :  { %1676 = vmatprep.subr.bf16.mxu0 %v3664_v58  ;;  %1719 = vmatprep.subr.bf16.mxu1 %v3670_v59 }
 0x473   :  { %1677 = vmatpush1.bf16.msra.mxu0 %v3676_v60  ;;  %1720 = vmatpush1.bf16.msra.mxu1 %v3682_v62 }
 0x474   :  { %1678 = vmatprep.subr.bf16.mxu0 %v3688_v63  ;;  %1721 = vmatprep.subr.bf16.mxu1 %v3694_v0 }
 0x477   :  { %1679 = vmatpush1.bf16.msra.mxu0 %v3700_v2  ;;  %1722 = vmatpush1.bf16.msra.mxu1 %v3706_v3 }
 0x478   :  { %1680 = vmatprep.subr.bf16.mxu0 %v3712_v4  ;;  %1723 = vmatprep.subr.bf16.mxu1 %v3718_v5 }
 0x47b   :  { %1681 = vmatpush1.bf16.msra.mxu0 %v3724_v21  ;;  %1724 = vmatpush1.bf16.msra.mxu1 %v3730_v16 }
 0x47c   :  { %1837 = vmatprep.subr.bf16.mxu0 %v3523_v36  ;;  %1880 = vmatprep.subr.bf16.mxu1 %v3529_v37 }
 0x51e   :  { %v1529_v24 = vpop.f32.mrf.mxu0  ;;  %v1572_v52 = vpop.f32.mrf.mxu1 }
 0x51f   :  { %v1581_v18 = vadd.f32 %v1529_v24, %v4018_v19  ;;  %v1583_v7 = vadd.f32 %v1572_v52, %v4022_v9 }
 0x520   :  { %v1531_v23 = vpop.f32.mrf.mxu0  ;;  %v1574_v22 = vpop.f32.mrf.mxu1 }
 0x521   :  { %v2295_v6 = vmul.f32 -1.442695, %v1581_v18  ;;  %v1582_v10 = vadd.f32 %v1531_v23, %v4019_v15  ;;  %v2297_v12 = vmul.f32 -1.442695, %v1583_v7  ;;  %v1584_v11 = vadd.f32 %v1574_v22, %v4024_v34  ;;  %v4025_v18 = vld [vmem:[#allocation31_spill] sm:$0xff] }
 0x522   :  { %v1533_v27 = vpop.f32.mrf.mxu0  ;;  %v1576_v20 = vpop.f32.mrf.mxu1 }
 0x523   :  { %2631 = vpow2.f32 %v2295_v6  ;;  %v2296_v35 = vmul.f32 -1.442695, %v1582_v10  ;;  %v1585_v17 = vadd.f32 %v1533_v27, %v4020_v14  ;;  %v1587_v8 = vadd.f32 %v1576_v20, %v4023_v61 }
 0x524   :  { %v1535_v13 = vpop.f32.mrf.mxu0  ;;  %v1578_v38 = vpop.f32.mrf.mxu1 }
 0x525   :  { %2633 = vpow2.f32 %v2296_v35  ;;  %v2298_v28 = vmul.f32 -1.442695, %v1585_v17  ;;  %v1586_v26 = vadd.f32 %v1535_v13, %v4021_v30  ;;  %v2300_v31 = vmul.f32 -1.442695, %v1587_v8 }
 0x526   :  { %v1588_v23 = vadd.f32 %v1578_v38, %v4025_v18  ;;  %v4026_v18 = vld [vmem:[#allocation32_spill] sm:$0xff] }
 0x527   :  { %2635 = vpow2.f32 %v2298_v28  ;;  %v2299_v43 = vmul.f32 -1.442695, %v1586_v26 }
 0x529   :  { %2637 = vpow2.f32 %v2299_v43 }
 0x52a   :  { %2639 = vpow2.f32 %v2297_v12 }
 0x52b   :  { %2641 = vtanh.f32 %v1584_v11 }
 0x530   :  { %v2632_v25 = vpop.eup %2631 }
 0x531   :  { %v1607_v24 = vadd.f32 1.0, %v2632_v25 }
 0x532   :  { %v2634_v19 = vpop.eup %2633 }
 0x533   :  { %2643 = vrcp.f32 %v1607_v24  ;;  %v1608_v6 = vadd.f32 1.0, %v2634_v19 }
 0x534   :  { %v2636_v15 = vpop.eup %2635  ;;  %2645 = vpow2.f32 %v2300_v31 }
 0x535   :  { %2647 = vrcp.f32 %v1608_v6  ;;  %v1610_v52 = vadd.f32 1.0, %v2636_v15 }
 0x536   :  { %v2638_v10 = vpop.eup %2637  ;;  %2649 = vtanh.f32 %v1588_v23 }
 0x537   :  { %2651 = vrcp.f32 %v1610_v52  ;;  %v1611_v27 = vadd.f32 1.0, %v2638_v10  ;;  %v2640_v35 = vpop.eup %2639  ;;  %v4027_v10 = vld [vmem:[#allocation34_spill] sm:$0xff] }
 0x538   :  { %v2642_v14 = vpop.eup %2641  ;;  %v1609_v9 = vadd.f32 1.0, %v2640_v35 }
 0x539   :  { %2653 = vrcp.f32 %v1611_v27 }
 0x53a   :  { %2655 = vrcp.f32 %v1609_v9 }
 0x540   :  { %v2644_v17 = vpop.eup %2643 }
 0x541   :  { %v2646_v13 = vpop.eup %2645  ;;  %v1629_v22 = vmul.f32 %v2644_v17, %v2642_v14  ;;  %v4028_v17 = vld [vmem:[#allocation36_spill] sm:$0xff] }
 0x542   :  { %v2648_v28 = vpop.eup %2647  ;;  %v1612_v8 = vadd.f32 1.0, %v2646_v13 }
 0x543   :  { %v2650_v30 = vpop.eup %2649  ;;  %v1627_v26 = vmul.f32 %v2648_v28, %v3744_v32 }
 0x544   :  { %v2652_v43 = vpop.eup %2651 }
 0x545   :  { %v3797_v7 = vadd.f32 %v1629_v22, %v1627_v26  ;;  %v1630_v20 = vmul.f32 %v2652_v43, %v2650_v30  ;;  %v4030_v43 = vld [vmem:[#allocation33_spill] sm:$0xff] }
 0x546   :  { %v2654_v61 = vpop.eup %2653 }
 0x547   :  { %v1628_v12 = vmul.f32 %v2654_v61, %v3748_v33  ;;  %2657 = vtanh.f32 %v3797_v7  ;;  %v2656_v11 = vpop.eup %2655  ;;  %v4031_v61 = vld [vmem:[#allocation37_spill] sm:$0xff] }
 0x548   :  { %2659 = vrcp.f32 %v1612_v8 }
 0x549   :  { %v3801_v34 = vadd.f32 %v1630_v20, %v1628_v12 }
 0x54b   :  { %2661 = vtanh.f32 %v3801_v34 }
 0x554   :  { %v2658_v38 = vpop.eup %2657 }
 0x555   :  { %v2660_v32 = vpop.eup %2659  ;;  %v1635_v31 = vmul.f32 %v2658_v38, %v2656_v11  ;;  %v4032_v11 = vld [vmem:[#allocation35_spill] sm:$0xff] }
 0x558   :  { %v2662_v25 = vpop.eup %2661 }
 0x559   :  { %v1636_v24 = vmul.f32 %v2662_v25, %v2660_v32 }
 0x55b   :  { %v2374_v19 = vpack.c.bf16 %v1636_v24, %v1635_v31 }
 0x55d   :  { %2394 = vst [vmem:[%s3942_s6 + $0x20] sm:$0xff] %v2374_v19   ;;  %1699 = vmatmul.mubr.bf16.vlgmr.msra.gmra.mxu0 %v2374_v19  ;;  %1742 = vmatmul.mubr.bf16.vlgmr.msra.gmra.mxu1 %v2374_v19 }
 0x55e   :  { %1838 = vmatpush1.bf16.msra.mxu0 %v3554_v1  ;;  %1881 = vmatpush1.bf16.msra.mxu1 %v3560_v39 }
 0x55f   :  { %1839 = vmatprep.subr.bf16.mxu0 %v3566_v40  ;;  %1882 = vmatprep.subr.bf16.mxu1 %v3572_v41 }
 0x560   :  { %1869 = vmatprep.mubr.bf16.mxu0 %v3998_v29  ;;  %1912 = vmatprep.mubr.bf16.mxu1 %v3998_v29 }
 0x562   :  { %1840 = vmatpush1.bf16.msra.mxu0 %v3580_v42  ;;  %1883 = vmatpush1.bf16.msra.mxu1 %v3586_v44 }
 0x563   :  { %1841 = vmatprep.subr.bf16.mxu0 %v3592_v45  ;;  %1884 = vmatprep.subr.bf16.mxu1 %v3598_v46 }
 0x566   :  { %1842 = vmatpush1.bf16.msra.mxu0 %v3604_v47  ;;  %1885 = vmatpush1.bf16.msra.mxu1 %v3610_v48 }
 0x567   :  { %1843 = vmatprep.subr.bf16.mxu0 %v3616_v49  ;;  %1886 = vmatprep.subr.bf16.mxu1 %v3622_v50 }
 0x56a   :  { %1844 = vmatpush1.bf16.msra.mxu0 %v3628_v51  ;;  %1887 = vmatpush1.bf16.msra.mxu1 %v3634_v53 }
 0x56b   :  { %1845 = vmatprep.subr.bf16.mxu0 %v3640_v54  ;;  %1888 = vmatprep.subr.bf16.mxu1 %v3646_v55 }
 0x56e   :  { %1846 = vmatpush1.bf16.msra.mxu0 %v3652_v56  ;;  %1889 = vmatpush1.bf16.msra.mxu1 %v3658_v57 }
 0x56f   :  { %1847 = vmatprep.subr.bf16.mxu0 %v3664_v58  ;;  %1890 = vmatprep.subr.bf16.mxu1 %v3670_v59 }
 0x572   :  { %1848 = vmatpush1.bf16.msra.mxu0 %v3676_v60  ;;  %1891 = vmatpush1.bf16.msra.mxu1 %v3682_v62 }
 0x573   :  { %1849 = vmatprep.subr.bf16.mxu0 %v3688_v63  ;;  %1892 = vmatprep.subr.bf16.mxu1 %v3694_v0 }
 0x576   :  { %1850 = vmatpush1.bf16.msra.mxu0 %v3700_v2  ;;  %1893 = vmatpush1.bf16.msra.mxu1 %v3706_v3 }
 0x577   :  { %1851 = vmatprep.subr.bf16.mxu0 %v3712_v4  ;;  %1894 = vmatprep.subr.bf16.mxu1 %v3718_v5 }
 0x57a   :  { %1852 = vmatpush1.bf16.msra.mxu0 %v3724_v21  ;;  %1895 = vmatpush1.bf16.msra.mxu1 %v3730_v16 }
 0x57b   :  { %2008 = vmatprep.subr.bf16.mxu0 %v3523_v36  ;;  %2051 = vmatprep.subr.bf16.mxu1 %v3529_v37  ;;  %v4029_v36 = vld [vmem:[#allocation38_spill] sm:$0xff] }
 0x61d   :  { %v1700_v33 = vpop.f32.mrf.mxu0  ;;  %v1743_v52 = vpop.f32.mrf.mxu1 }
 0x61e   :  { %v1752_v23 = vadd.f32 %v1700_v33, %v4026_v18  ;;  %v1754_v9 = vadd.f32 %v1743_v52, %v4030_v43  ;;  %v4033_v33 = vld [vmem:[#allocation39_spill] sm:$0xff] }
 0x61f   :  { %v1702_v6 = vpop.f32.mrf.mxu0  ;;  %v1745_v28 = vpop.f32.mrf.mxu1 }
 0x620   :  { %v2305_v15 = vmul.f32 -1.442695, %v1752_v23  ;;  %v1753_v27 = vadd.f32 %v1702_v6, %v4027_v10  ;;  %v2307_v12 = vmul.f32 -1.442695, %v1754_v9  ;;  %v1755_v38 = vadd.f32 %v1745_v28, %v4032_v11 }
 0x621   :  { %v1704_v35 = vpop.f32.mrf.mxu0  ;;  %v1747_v20 = vpop.f32.mrf.mxu1 }
 0x622   :  { %2663 = vpow2.f32 %v2305_v15  ;;  %v2306_v14 = vmul.f32 -1.442695, %v1753_v27  ;;  %v1756_v13 = vadd.f32 %v1704_v35, %v4028_v17  ;;  %v1758_v8 = vadd.f32 %v1747_v20, %v4031_v61 }
 0x623   :  { %v1706_v22 = vpop.f32.mrf.mxu0  ;;  %v1749_v32 = vpop.f32.mrf.mxu1 }
 0x624   :  { %2665 = vpow2.f32 %v2306_v14  ;;  %v2308_v30 = vmul.f32 -1.442695, %v1756_v13  ;;  %v1757_v26 = vadd.f32 %v1706_v22, %v4029_v36  ;;  %v2310_v31 = vmul.f32 -1.442695, %v1758_v8 }
 0x625   :  { %v1759_v18 = vadd.f32 %v1749_v32, %v4033_v33 }
 0x626   :  { %2667 = vpow2.f32 %v2308_v30  ;;  %v2309_v37 = vmul.f32 -1.442695, %v1757_v26 }
 0x628   :  { %2669 = vpow2.f32 %v2309_v37 }
 0x629   :  { %2671 = vpow2.f32 %v2307_v12 }
 0x62a   :  { %2673 = vtanh.f32 %v1755_v38 }
 0x62f   :  { %v2664_v25 = vpop.eup %2663 }
 0x630   :  { %v1778_v24 = vadd.f32 1.0, %v2664_v25 }
 0x631   :  { %v2666_v19 = vpop.eup %2665 }
 0x632   :  { %2675 = vrcp.f32 %v1778_v24  ;;  %v1779_v23 = vadd.f32 1.0, %v2666_v19 }
 0x633   :  { %v2668_v6 = vpop.eup %2667  ;;  %2677 = vpow2.f32 %v2310_v31 }
 0x634   :  { %2679 = vrcp.f32 %v1779_v23  ;;  %v1781_v15 = vadd.f32 1.0, %v2668_v6 }
 0x635   :  { %v2670_v52 = vpop.eup %2669  ;;  %2681 = vtanh.f32 %v1759_v18 }
 0x636   :  { %2683 = vrcp.f32 %v1781_v15  ;;  %v1782_v10 = vadd.f32 1.0, %v2670_v52  ;;  %v2672_v27 = vpop.eup %2671 }
 0x637   :  { %v2674_v35 = vpop.eup %2673  ;;  %v1780_v26 = vadd.f32 1.0, %v2672_v27 }
 0x638   :  { %2685 = vrcp.f32 %v1782_v10 }
 0x639   :  { %2687 = vrcp.f32 %v1780_v26 }
 0x63f   :  { %v2676_v14 = vpop.eup %2675 }
 0x640   :  { %v2678_v17 = vpop.eup %2677  ;;  %v1800_v13 = vmul.f32 %v2676_v14, %v2674_v35 }
 0x641   :  { %v2680_v22 = vpop.eup %2679  ;;  %v1783_v20 = vadd.f32 1.0, %v2678_v17 }
 0x642   :  { %v2682_v28 = vpop.eup %2681  ;;  %v1798_v30 = vmul.f32 %v2680_v22, %v3797_v7 }
 0x643   :  { %v2684_v36 = vpop.eup %2683 }
 0x644   :  { %v3850_v37 = vadd.f32 %v1800_v13, %v1798_v30  ;;  %v1801_v43 = vmul.f32 %v2684_v36, %v2682_v28 }
 0x645   :  { %v2686_v9 = vpop.eup %2685 }
 0x646   :  { %v1799_v61 = vmul.f32 %v2686_v9, %v3801_v34  ;;  %2689 = vtanh.f32 %v3850_v37  ;;  %v2688_v12 = vpop.eup %2687  ;;  %v4041_v34 = vld [vmem:[#allocation47_spill] sm:$0xff] }
 0x647   :  { %2691 = vrcp.f32 %v1783_v20 }
 0x648   :  { %v3854_v8 = vadd.f32 %v1801_v43, %v1799_v61 }
 0x64a   :  { %2693 = vtanh.f32 %v3854_v8 }
 0x653   :  { %v2690_v11 = vpop.eup %2689 }
 0x654   :  { %v2692_v7 = vpop.eup %2691  ;;  %v1806_v32 = vmul.f32 %v2690_v11, %v2688_v12 }
 0x657   :  { %v2694_v38 = vpop.eup %2693 }
 0x658   :  { %v1807_v25 = vmul.f32 %v2694_v38, %v2692_v7 }
 0x65a   :  { %v2379_v31 = vpack.c.bf16 %v1807_v25, %v1806_v32  ;;  %v4042_v25 = vld [vmem:[#allocation48_spill] sm:$0xff] }
 0x65c   :  { %2395 = vst [vmem:[%s3942_s6 + $0x28] sm:$0xff] %v2379_v31   ;;  %1870 = vmatmul.mubr.bf16.vlgmr.msra.gmra.mxu0 %v2379_v31  ;;  %1913 = vmatmul.mubr.bf16.vlgmr.msra.gmra.mxu1 %v2379_v31 }
 0x65d   :  { %2009 = vmatpush1.bf16.msra.mxu0 %v3554_v1  ;;  %2052 = vmatpush1.bf16.msra.mxu1 %v3560_v39  ;;  %v4034_v1 = vld [vmem:[#allocation40_spill] sm:$0xff] }
 0x65e   :  { %2010 = vmatprep.subr.bf16.mxu0 %v3566_v40  ;;  %2053 = vmatprep.subr.bf16.mxu1 %v3572_v41 }
 0x65f   :  { %2040 = vmatprep.mubr.bf16.mxu0 %v3998_v29  ;;  %2083 = vmatprep.mubr.bf16.mxu1 %v3998_v29 }
 0x661   :  { %2011 = vmatpush1.bf16.msra.mxu0 %v3580_v42  ;;  %2054 = vmatpush1.bf16.msra.mxu1 %v3586_v44  ;;  %v4035_v44 = vld [vmem:[#allocation42_spill] sm:$0xff] }
 0x662   :  { %2012 = vmatprep.subr.bf16.mxu0 %v3592_v45  ;;  %2055 = vmatprep.subr.bf16.mxu1 %v3598_v46 }
 0x665   :  { %2013 = vmatpush1.bf16.msra.mxu0 %v3604_v47  ;;  %2056 = vmatpush1.bf16.msra.mxu1 %v3610_v48  ;;  %v4036_v48 = vld [vmem:[#allocation44_spill] sm:$0xff] }
 0x666   :  { %2014 = vmatprep.subr.bf16.mxu0 %v3616_v49  ;;  %2057 = vmatprep.subr.bf16.mxu1 %v3622_v50 }
 0x669   :  { %2015 = vmatpush1.bf16.msra.mxu0 %v3628_v51  ;;  %2058 = vmatpush1.bf16.msra.mxu1 %v3634_v53 }
 0x66a   :  { %2016 = vmatprep.subr.bf16.mxu0 %v3640_v54  ;;  %2059 = vmatprep.subr.bf16.mxu1 %v3646_v55  ;;  %v4037_v54 = vld [vmem:[#allocation46_spill] sm:$0xff] }
 0x66d   :  { %2017 = vmatpush1.bf16.msra.mxu0 %v3652_v56  ;;  %2060 = vmatpush1.bf16.msra.mxu1 %v3658_v57  ;;  %v4038_v57 = vld [vmem:[#allocation41_spill] sm:$0xff] }
 0x66e   :  { %2018 = vmatprep.subr.bf16.mxu0 %v3664_v58  ;;  %2061 = vmatprep.subr.bf16.mxu1 %v3670_v59 }
 0x671   :  { %2019 = vmatpush1.bf16.msra.mxu0 %v3676_v60  ;;  %2062 = vmatpush1.bf16.msra.mxu1 %v3682_v62  ;;  %v4039_v60 = vld [vmem:[#allocation45_spill] sm:$0xff] }
 0x672   :  { %2020 = vmatprep.subr.bf16.mxu0 %v3688_v63  ;;  %2063 = vmatprep.subr.bf16.mxu1 %v3694_v0  ;;  %v4040_v0 = vld [vmem:[#allocation43_spill] sm:$0xff] }
 0x675   :  { %2021 = vmatpush1.bf16.msra.mxu0 %v3700_v2  ;;  %2064 = vmatpush1.bf16.msra.mxu1 %v3706_v3 }
 0x676   :  { %2022 = vmatprep.subr.bf16.mxu0 %v3712_v4  ;;  %2065 = vmatprep.subr.bf16.mxu1 %v3718_v5 }
 0x679   :  { %2023 = vmatpush1.bf16.msra.mxu0 %v3724_v21  ;;  %2066 = vmatpush1.bf16.msra.mxu1 %v3730_v16 }
 0x71c   :  { %v1871_v29 = vpop.f32.mrf.mxu0  ;;  %v1914_v42 = vpop.f32.mrf.mxu1 }
 0x71d   :  { %v1923_v39 = vadd.f32 %v1871_v29, %v4034_v1  ;;  %v1925_v58 = vadd.f32 %v1914_v42, %v4038_v57  ;;  %v4047_v57 = vld [vmem:[#allocation53_spill] sm:$0xff] }
 0x71e   :  { %v1873_v40 = vpop.f32.mrf.mxu0  ;;  %v1916_v51 = vpop.f32.mrf.mxu1 }
 0x71f   :  { %v2315_v41 = vmul.f32 -1.442695, %v1923_v39  ;;  %v1924_v45 = vadd.f32 %v1873_v40, %v4035_v44  ;;  %v2317_v63 = vmul.f32 -1.442695, %v1925_v58  ;;  %v1926_v2 = vadd.f32 %v1916_v51, %v4040_v0  ;;  %v4043_v40 = vld [vmem:[#allocation50_spill] sm:$0xff] }
 0x720   :  { %v1875_v46 = vpop.f32.mrf.mxu0  ;;  %v1918_v59 = vpop.f32.mrf.mxu1 }
 0x721   :  { %2695 = vpow2.f32 %v2315_v41  ;;  %v2316_v47 = vmul.f32 -1.442695, %v1924_v45  ;;  %v1927_v49 = vadd.f32 %v1875_v46, %v4036_v48  ;;  %v1929_v62 = vadd.f32 %v1918_v59, %v4039_v60  ;;  %v4044_v45 = vld [vmem:[#allocation52_spill] sm:$0xff]  ;;  %v4048_v60 = vld [vmem:[#allocation51_spill] sm:$0xff] }
 0x722   :  { %v1877_v50 = vpop.f32.mrf.mxu0  ;;  %v1920_v3 = vpop.f32.mrf.mxu1 }
 0x723   :  { %2697 = vpow2.f32 %v2316_v47  ;;  %v2318_v53 = vmul.f32 -1.442695, %v1927_v49  ;;  %v1928_v55 = vadd.f32 %v1877_v50, %v4037_v54  ;;  %v2320_v5 = vmul.f32 -1.442695, %v1929_v62  ;;  %v4045_v50 = vld [vmem:[#allocation54_spill] sm:$0xff]  ;;  %v4046_v54 = vld [vmem:[#allocation49_spill] sm:$0xff] }
 0x724   :  { %v1930_v24 = vadd.f32 %v1920_v3, %v4041_v34 }
 0x725   :  { %2699 = vpow2.f32 %v2318_v53  ;;  %v2319_v56 = vmul.f32 -1.442695, %v1928_v55 }
 0x727   :  { %2701 = vpow2.f32 %v2319_v56 }
 0x728   :  { %2703 = vpow2.f32 %v2317_v63 }
 0x729   :  { %2705 = vtanh.f32 %v1926_v2 }
 0x72e   :  { %v2696_v4 = vpop.eup %2695 }
 0x72f   :  { %v1949_v21 = vadd.f32 1.0, %v2696_v4 }
 0x730   :  { %v2698_v16 = vpop.eup %2697 }
 0x731   :  { %2707 = vrcp.f32 %v1949_v21  ;;  %v1950_v19 = vadd.f32 1.0, %v2698_v16 }
 0x732   :  { %v2700_v33 = vpop.eup %2699  ;;  %2709 = vpow2.f32 %v2320_v5  ;;  %v4049_v5 = vld [vmem:[#allocation55_spill] sm:$0xff] }
 0x733   :  { %2711 = vrcp.f32 %v1950_v19  ;;  %v1952_v18 = vadd.f32 1.0, %v2700_v33 }
 0x734   :  { %v2702_v23 = vpop.eup %2701  ;;  %2713 = vtanh.f32 %v1930_v24 }
 0x735   :  { %2715 = vrcp.f32 %v1952_v18  ;;  %v1953_v6 = vadd.f32 1.0, %v2702_v23  ;;  %v2704_v15 = vpop.eup %2703 }
 0x736   :  { %v2706_v52 = vpop.eup %2705  ;;  %v1951_v28 = vadd.f32 1.0, %v2704_v15 }
 0x737   :  { %2717 = vrcp.f32 %v1953_v6 }
 0x738   :  { %2719 = vrcp.f32 %v1951_v28 }
 0x73e   :  { %v2708_v10 = vpop.eup %2707 }
 0x73f   :  { %v2710_v27 = vpop.eup %2709  ;;  %v1971_v35 = vmul.f32 %v2708_v10, %v2706_v52 }
 0x740   :  { %v2712_v14 = vpop.eup %2711  ;;  %v1954_v43 = vadd.f32 1.0, %v2710_v27 }
 0x741   :  { %v2714_v17 = vpop.eup %2713  ;;  %v1969_v13 = vmul.f32 %v2712_v14, %v3850_v37 }
 0x742   :  { %v2716_v22 = vpop.eup %2715 }
 0x743   :  { %v3901_v30 = vadd.f32 %v1971_v35, %v1969_v13  ;;  %v1972_v36 = vmul.f32 %v2716_v22, %v2714_v17 }
 0x744   :  { %v2718_v26 = vpop.eup %2717 }
 0x745   :  { %v1970_v9 = vmul.f32 %v2718_v26, %v3854_v8  ;;  %2721 = vtanh.f32 %v3901_v30  ;;  %v2720_v61 = vpop.eup %2719 }
 0x746   :  { %2723 = vrcp.f32 %v1954_v43 }
 0x747   :  { %v3905_v20 = vadd.f32 %v1972_v36, %v1970_v9 }
 0x749   :  { %2725 = vtanh.f32 %v3905_v20 }
 0x752   :  { %v2722_v12 = vpop.eup %2721 }
 0x753   :  { %v2724_v37 = vpop.eup %2723  ;;  %v1977_v7 = vmul.f32 %v2722_v12, %v2720_v61 }
 0x756   :  { %v2726_v11 = vpop.eup %2725 }
 0x757   :  { %v1978_v38 = vmul.f32 %v2726_v11, %v2724_v37 }
 0x759   :  { %v2384_v32 = vpack.c.bf16 %v1978_v38, %v1977_v7 }
 0x75b   :  { %2396 = vst [vmem:[%s3942_s6 + $0x30] sm:$0xff] %v2384_v32   ;;  %2041 = vmatmul.mubr.bf16.vlgmr.msra.gmra.mxu0 %v2384_v32  ;;  %2084 = vmatmul.mubr.bf16.vlgmr.msra.gmra.mxu1 %v2384_v32 }
 0x81b   :  { %v2042_v8 = vpop.f32.mrf.mxu0  ;;  %v2085_v39 = vpop.f32.mrf.mxu1 }
 0x81c   :  { %v2094_v31 = vadd.f32 %v2042_v8, %v4042_v25  ;;  %v2096_v55 = vadd.f32 %v2085_v39, %v4046_v54 }
 0x81d   :  { %v2044_v29 = vpop.f32.mrf.mxu0  ;;  %v2087_v48 = vpop.f32.mrf.mxu1 }
 0x81e   :  { %v2325_v1 = vmul.f32 -1.442695, %v2094_v31  ;;  %v2095_v41 = vadd.f32 %v2044_v29, %v4043_v40  ;;  %v2327_v59 = vmul.f32 -1.442695, %v2096_v55  ;;  %v2097_v62 = vadd.f32 %v2087_v48, %v4048_v60 }
 0x81f   :  { %v2046_v42 = vpop.f32.mrf.mxu0  ;;  %v2089_v56 = vpop.f32.mrf.mxu1 }
 0x820   :  { %2727 = vpow2.f32 %v2325_v1  ;;  %v2326_v44 = vmul.f32 -1.442695, %v2095_v41  ;;  %v2098_v46 = vadd.f32 %v2046_v42, %v4044_v45  ;;  %v2100_v58 = vadd.f32 %v2089_v56, %v4047_v57 }
 0x821   :  { %v2048_v47 = vpop.f32.mrf.mxu0  ;;  %v2091_v63 = vpop.f32.mrf.mxu1 }
 0x822   :  { %2729 = vpow2.f32 %v2326_v44  ;;  %v2328_v49 = vmul.f32 -1.442695, %v2098_v46  ;;  %v2099_v51 = vadd.f32 %v2048_v47, %v4045_v50  ;;  %v2330_v2 = vmul.f32 -1.442695, %v2100_v58 }
 0x823   :  { %v2101_v21 = vadd.f32 %v2091_v63, %v4049_v5 }
 0x824   :  { %2731 = vpow2.f32 %v2328_v49  ;;  %v2329_v53 = vmul.f32 -1.442695, %v2099_v51 }
 0x826   :  { %2733 = vpow2.f32 %v2329_v53 }
 0x827   :  { %2735 = vpow2.f32 %v2327_v59 }
 0x828   :  { %2737 = vtanh.f32 %v2097_v62 }
 0x82d   :  { %v2728_v0 = vpop.eup %2727 }
 0x82e   :  { %v2120_v3 = vadd.f32 1.0, %v2728_v0 }
 0x82f   :  { %v2730_v4 = vpop.eup %2729 }
 0x830   :  { %2739 = vrcp.f32 %v2120_v3  ;;  %v2121_v16 = vadd.f32 1.0, %v2730_v4 }
 0x831   :  { %v2732_v34 = vpop.eup %2731  ;;  %2741 = vpow2.f32 %v2330_v2 }
 0x832   :  { %2743 = vrcp.f32 %v2121_v16  ;;  %v2123_v24 = vadd.f32 1.0, %v2732_v34 }
 0x833   :  { %v2734_v19 = vpop.eup %2733  ;;  %2745 = vtanh.f32 %v2101_v21 }
 0x834   :  { %2747 = vrcp.f32 %v2123_v24  ;;  %v2124_v33 = vadd.f32 1.0, %v2734_v19  ;;  %v2736_v18 = vpop.eup %2735 }
 0x835   :  { %v2738_v23 = vpop.eup %2737  ;;  %v2122_v27 = vadd.f32 1.0, %v2736_v18 }
 0x836   :  { %2749 = vrcp.f32 %v2124_v33 }
 0x837   :  { %2751 = vrcp.f32 %v2122_v27 }
 0x83d   :  { %v2740_v6 = vpop.eup %2739 }
 0x83e   :  { %v2742_v15 = vpop.eup %2741  ;;  %v2142_v52 = vmul.f32 %v2740_v6, %v2738_v23 }
 0x83f   :  { %v2744_v10 = vpop.eup %2743  ;;  %v2125_v36 = vadd.f32 1.0, %v2742_v15 }
 0x840   :  { %v2746_v35 = vpop.eup %2745  ;;  %v2140_v14 = vmul.f32 %v2744_v10, %v3901_v30 }
 0x841   :  { %v2748_v17 = vpop.eup %2747 }
 0x842   :  { %v2144_v13 = vadd.f32 %v2142_v52, %v2140_v14  ;;  %v2143_v22 = vmul.f32 %v2748_v17, %v2746_v35 }
 0x843   :  { %v2750_v28 = vpop.eup %2749 }
 0x844   :  { %2753 = vtanh.f32 %v2144_v13  ;;  %2171 = vst [vmem:[%s3943_s8] sm:$0xff] %v2144_v13  ;;  %v2141_v26 = vmul.f32 %v2750_v28, %v3905_v20  ;;  %v2752_v30 = vpop.eup %2751 }
 0x845   :  { %2755 = vrcp.f32 %v2125_v36 }
 0x846   :  { %v2145_v43 = vadd.f32 %v2143_v22, %v2141_v26 }
 0x848   :  { %2757 = vtanh.f32 %v2145_v43  ;;  %2172 = vst [vmem:[%s3943_s8 + $0x8] sm:$0xff] %v2145_v43 }
 0x851   :  { %v2754_v9 = vpop.eup %2753 }
 0x852   :  { %v2148_v61 = vmul.f32 %v2754_v9, %v2752_v30  ;;  %v2756_v12 = vpop.eup %2755 }
 0x854   :  { %2167 = vst [vmem:[%s3944_s7] sm:$0xff] %v2148_v61 }
 0x855   :  { %v2758_v37 = vpop.eup %2757 }
 0x856   :  { %v2149_v11 = vmul.f32 %v2758_v37, %v2756_v12 }
 0x858   :  { %v2389_v7 = vpack.c.bf16 %v2149_v11, %v2148_v61  ;;  %2168 = vst [vmem:[%s3944_s7 + $0x8] sm:$0xff] %v2149_v11 }
 0x85a   :  { %2397 = vst [vmem:[%s3942_s6 + $0x38] sm:$0xff] %v2389_v7  }

// kernel: lstm_nn_forward.3
= control target key start
LH: loop header
LB: loop body
LE: loop exit
PB: predicated region body
PF: predicated region fallthrough
CT: control target
= control target key end

     0   :  { %v3822_v1 = vmov 0   ;;  %vm2128_vm0 = vcmask 7168   ;;  %s3811_s3 = inlined_call_operand.vmem [shape: bf16[128,512], index: 3, kind: input, shape index: {}]   ;;  %s3812_s0 = inlined_call_operand.vmem [shape: bf16[8,16,128], index: 0, kind: input, shape index: {}]   ;;  %s3813_s4 = inlined_call_operand.vmem [shape: bf16[128,512], index: 4, kind: input, shape index: {}]   ;;  %s3814_s1 = inlined_call_operand.vmem [shape: f32[16,128], index: 1, kind: input, shape index: {}]   ;;  %s3815_s5 = inlined_call_operand.vmem [shape: f32[1,512], index: 5, kind: input, shape index: {}]   ;;  %s3816_s2 = inlined_call_operand.vmem [shape: f32[16,128], index: 2, kind: input, shape index: {}]   ;;  %s3817_s7 = inlined_call_operand.<no memory space> [shape: f32[1,1], index: 7, kind: input, shape index: {}]   ;;  %s3818_s10 = inlined_call_operand.vmem [shape: f32[16,128], index: 10, kind: output, shape index: {2}]   ;;  %s3819_s6 = inlined_call_operand.vmem [shape: f32[1,128], index: 6, kind: input, shape index: {}]   ;;  %s3820_s9 = inlined_call_operand.vmem [shape: f32[16,128], index: 9, kind: output, shape index: {1}]   ;;  %s3821_s8 = inlined_call_operand.vmem [shape: f32[16,1], index: 8, kind: output, shape index: {0}]  }
   0x1   :  { %v2268_v0 = vld [vmem:[%s3811_s3 + $0xe4] ss:$16 sps:$4 sm:$0xff]   ;;  %357 = vmatprep.mubr.bf16.mxu0 %v3822_v1  ;;  %470 = vmatprep.mubr.bf16.mxu1 %v3822_v1  ;;  %v2270_v2 = vld [vmem:[%s3811_s3 + $0xec] ss:$16 sps:$4 sm:$0xff]   ;;  %v2272_v3 = vld [vmem:[%s3811_s3 + $0xe0] ss:$16 sps:$4 sm:$0xff]  }
   0x2   :  { %325 = vmatprep.subr.bf16.mxu0 %v2268_v0  ;;  %v2273_v4 = vld [vmem:[%s3811_s3 + $0xe8] ss:$16 sps:$4 sm:$0xff]   ;;  %438 = vmatprep.subr.bf16.mxu1 %v2270_v2  ;;  %v2274_v5 = vld [vmem:[%s3811_s3 + $0xc4] ss:$16 sps:$4 sm:$0xff]   ;;  %v2276_v6 = vld [vmem:[%s3811_s3 + $0xcc] ss:$16 sps:$4 sm:$0xff]  }
   0x3   :  { %326 = vmatpush1.bf16.msra.mxu0 %v2272_v3  ;;  %439 = vmatpush1.bf16.msra.mxu1 %v2273_v4  ;;  %v2278_v7 = vld [vmem:[%s3811_s3 + $0xc0] ss:$16 sps:$4 sm:$0xff]   ;;  %v2279_v8 = vld [vmem:[%s3811_s3 + $0xc8] ss:$16 sps:$4 sm:$0xff]   ;;  %v2280_v9 = vld [vmem:[%s3811_s3 + $0xa4] ss:$16 sps:$4 sm:$0xff]  }
   0x4   :  { %327 = vmatprep.subr.bf16.mxu0 %v2274_v5  ;;  %440 = vmatprep.subr.bf16.mxu1 %v2276_v6  ;;  %v2282_v10 = vld [vmem:[%s3811_s3 + $0xac] ss:$16 sps:$4 sm:$0xff]   ;;  %v2284_v11 = vld [vmem:[%s3811_s3 + $0xa0] ss:$16 sps:$4 sm:$0xff]   ;;  %v2285_v12 = vld [vmem:[%s3811_s3 + $0xa8] ss:$16 sps:$4 sm:$0xff]  }
   0x5   :  { %v2286_v13 = vld [vmem:[%s3811_s3 + $0x84] ss:$16 sps:$4 sm:$0xff]   ;;  %v2288_v14 = vld [vmem:[%s3811_s3 + $0x8c] ss:$16 sps:$4 sm:$0xff]   ;;  %v2290_v15 = vld [vmem:[%s3811_s3 + $0x80] ss:$16 sps:$4 sm:$0xff]  }
   0x6   :  { %v2291_v16 = vld [vmem:[%s3811_s3 + $0x88] ss:$16 sps:$4 sm:$0xff]   ;;  %v2292_v17 = vld [vmem:[%s3811_s3 + $0x64] ss:$16 sps:$4 sm:$0xff]   ;;  %v2294_v18 = vld [vmem:[%s3811_s3 + $0x6c] ss:$16 sps:$4 sm:$0xff]  }
   0x7   :  { %328 = vmatpush1.bf16.msra.mxu0 %v2278_v7  ;;  %441 = vmatpush1.bf16.msra.mxu1 %v2279_v8  ;;  %v2296_v19 = vld [vmem:[%s3811_s3 + $0x60] ss:$16 sps:$4 sm:$0xff]   ;;  %v2297_v20 = vld [vmem:[%s3811_s3 + $0x68] ss:$16 sps:$4 sm:$0xff]   ;;  %v2298_v21 = vld [vmem:[%s3811_s3 + $0x44] ss:$16 sps:$4 sm:$0xff]  }
   0x8   :  { %329 = vmatprep.subr.bf16.mxu0 %v2280_v9  ;;  %442 = vmatprep.subr.bf16.mxu1 %v2282_v10  ;;  %v2300_v22 = vld [vmem:[%s3811_s3 + $0x4c] ss:$16 sps:$4 sm:$0xff]   ;;  %v2302_v23 = vld [vmem:[%s3811_s3 + $0x40] ss:$16 sps:$4 sm:$0xff]   ;;  %v2303_v24 = vld [vmem:[%s3811_s3 + $0x48] ss:$16 sps:$4 sm:$0xff]  }
   0x9   :  { %v2304_v25 = vld [vmem:[%s3811_s3 + $0x24] ss:$16 sps:$4 sm:$0xff]   ;;  %v2306_v26 = vld [vmem:[%s3811_s3 + $0x2c] ss:$16 sps:$4 sm:$0xff]   ;;  %v2308_v27 = vld [vmem:[%s3811_s3 + $0x20] ss:$16 sps:$4 sm:$0xff]  }
   0xa   :  { %v2309_v28 = vld [vmem:[%s3811_s3 + $0x28] ss:$16 sps:$4 sm:$0xff]   ;;  %v2310_v29 = vld [vmem:[%s3811_s3 + $0x4] ss:$16 sps:$4 sm:$0xff]   ;;  %v2312_v30 = vld [vmem:[%s3811_s3 + $0xc] ss:$16 sps:$4 sm:$0xff]  }
   0xb   :  { %330 = vmatpush1.bf16.msra.mxu0 %v2284_v11  ;;  %443 = vmatpush1.bf16.msra.mxu1 %v2285_v12  ;;  %v2314_v31 = vld [vmem:[%s3811_s3] ss:$16 sps:$4 sm:$0xff]   ;;  %v2315_v32 = vld [vmem:[%s3811_s3 + $0x8] ss:$16 sps:$4 sm:$0xff]   ;;  %v2825_v33 = vld [vmem:[%s3813_s4 + $0xe4] ss:$16 sps:$4 sm:$0xff]  }
   0xc   :  { %331 = vmatprep.subr.bf16.mxu0 %v2286_v13  ;;  %444 = vmatprep.subr.bf16.mxu1 %v2288_v14  ;;  %v2830_v34 = vld [vmem:[%s3813_s4 + $0xec] ss:$16 sps:$4 sm:$0xff]   ;;  %v2316_v35 = vld [vmem:[%s3812_s0] sm:$0xff]   ;;  %v2850_v38 = vld [vmem:[%s3813_s4 + $0xe8] ss:$16 sps:$4 sm:$0xff]   ;;  %v97_v13 = vlaneseq }
   0xd   :  { %v2838_v36 = vld [vmem:[%s3813_s4 + $0xe0] ss:$16 sps:$4 sm:$0xff]   ;;  %v2844_v37 = vld [vmem:[%s3813_s4 + $0xc4] ss:$16 sps:$4 sm:$0xff]   ;;  %v2855_v39 = vld [vmem:[%s3813_s4 + $0xcc] ss:$16 sps:$4 sm:$0xff]  }
   0xe   :  { %v2862_v40 = vld [vmem:[%s3813_s4 + $0xc0] ss:$16 sps:$4 sm:$0xff]   ;;  %v2869_v41 = vld [vmem:[%s3813_s4 + $0xa4] ss:$16 sps:$4 sm:$0xff]   ;;  %v2875_v42 = vld [vmem:[%s3813_s4 + $0xc8] ss:$16 sps:$4 sm:$0xff]  }
   0xf   :  { %332 = vmatpush1.bf16.msra.mxu0 %v2290_v15  ;;  %445 = vmatpush1.bf16.msra.mxu1 %v2291_v16  ;;  %v2320_v43 = vld [vmem:[%s3812_s0 + $0x8] sm:$0xff]   ;;  %v2885_v44 = vld [vmem:[%s3813_s4 + $0xa0] ss:$16 sps:$4 sm:$0xff]   ;;  %v2890_v45 = vld [vmem:[%s3813_s4 + $0x84] ss:$16 sps:$4 sm:$0xff]   ;;  %v98_v14 = vshrl.u32 %v97_v13, 7 }
  0x10   :  { %333 = vmatprep.subr.bf16.mxu0 %v2292_v17  ;;  %446 = vmatprep.subr.bf16.mxu1 %v2294_v18  ;;  %v2896_v46 = vld [vmem:[%s3813_s4 + $0xac] ss:$16 sps:$4 sm:$0xff]   ;;  %v2902_v47 = vld [vmem:[%s3813_s4 + $0xa8] ss:$16 sps:$4 sm:$0xff]   ;;  %v2915_v49 = vld [vmem:[%s3813_s4 + $0x80] ss:$16 sps:$4 sm:$0xff]  }
  0x11   :  { %v2907_v48 = vld [vmem:[%s3813_s4 + $0x8c] ss:$16 sps:$4 sm:$0xff]   ;;  %v2920_v50 = vld [vmem:[%s3813_s4 + $0x64] ss:$16 sps:$4 sm:$0xff]   ;;  %v2928_v51 = vld [vmem:[%s3813_s4 + $0x88] ss:$16 sps:$4 sm:$0xff]  }
  0x12   :  { %v2324_v52 = vld [vmem:[%s3812_s0 + $0x10] sm:$0xff]   ;;  %v2943_v54 = vld [vmem:[%s3813_s4 + $0x6c] ss:$16 sps:$4 sm:$0xff]   ;;  %v2955_v56 = vld [vmem:[%s3813_s4 + $0x68] ss:$16 sps:$4 sm:$0xff]  }
  0x13   :  { %334 = vmatpush1.bf16.msra.mxu0 %v2296_v19  ;;  %447 = vmatpush1.bf16.msra.mxu1 %v2297_v20  ;;  %v2937_v53 = vld [vmem:[%s3813_s4 + $0x60] ss:$16 sps:$4 sm:$0xff]   ;;  %v2949_v55 = vld [vmem:[%s3813_s4 + $0x44] ss:$16 sps:$4 sm:$0xff]   ;;  %v2960_v57 = vld [vmem:[%s3813_s4 + $0x4c] ss:$16 sps:$4 sm:$0xff]  }
  0x14   :  { %335 = vmatprep.subr.bf16.mxu0 %v2298_v21  ;;  %448 = vmatprep.subr.bf16.mxu1 %v2300_v22  ;;  %v2968_v58 = vld [vmem:[%s3813_s4 + $0x40] ss:$16 sps:$4 sm:$0xff]   ;;  %v2975_v59 = vld [vmem:[%s3813_s4 + $0x24] ss:$16 sps:$4 sm:$0xff]   ;;  %v2981_v60 = vld [vmem:[%s3813_s4 + $0x48] ss:$16 sps:$4 sm:$0xff]  }
  0x15   :  { %v2331_v61 = vld [vmem:[%s3812_s0 + $0x18] sm:$0xff]   ;;  %v2991_v62 = vld [vmem:[%s3813_s4 + $0x20] ss:$16 sps:$4 sm:$0xff]   ;;  %v3003_v0 = vld [vmem:[%s3813_s4 + $0x4] ss:$16 sps:$4 sm:$0xff]   ;;  %v99_v19 = vsub.s32 0, %v98_v14 }
  0x16   :  { %v2996_v63 = vld [vmem:[%s3813_s4 + $0x2c] ss:$16 sps:$4 sm:$0xff]   ;;  %v3008_v2 = vld [vmem:[%s3813_s4 + $0x28] ss:$16 sps:$4 sm:$0xff]   ;;  %v3022_v4 = vld [vmem:[%s3813_s4] ss:$16 sps:$4 sm:$0xff]  }
  0x17   :  { %336 = vmatpush1.bf16.msra.mxu0 %v2302_v23  ;;  %449 = vmatpush1.bf16.msra.mxu1 %v2303_v24  ;;  %v3013_v3 = vld [vmem:[%s3813_s4 + $0xc] ss:$16 sps:$4 sm:$0xff]   ;;  %v3029_v5 = vld [vmem:[%s3813_s4 + $0x8] ss:$16 sps:$4 sm:$0xff]   ;;  %v2338_v6 = vld [vmem:[%s3812_s0 + $0x20] sm:$0xff]   ;;  %v107_v20 = vsub.s32 2, %v98_v14 }
  0x18   :  { %337 = vmatprep.subr.bf16.mxu0 %v2304_v25  ;;  %450 = vmatprep.subr.bf16.mxu1 %v2306_v26  ;;  %v2345_v7 = vld [vmem:[%s3812_s0 + $0x28] sm:$0xff]   ;;  %v2352_v8 = vld [vmem:[%s3812_s0 + $0x30] sm:$0xff]   ;;  %v2362_v9 = vld [vmem:[%s3812_s0 + $0x38] sm:$0xff]   ;;  %v103_v24 = vsub.s32 1, %v98_v14  ;;  %v111_v25 = vsub.s32 3, %v98_v14 }
  0x19   :  { %v39_v10 = vld [vmem:[%s3814_s1] sm:$0xff]  ;;  %v40_v11 = vld [vmem:[%s3814_s1 + $0x8] sm:$0xff] }
  0x1a   :  { %v659_v12 = vpack.c.bf16 %v40_v11, %v39_v10  ;;  %v95_v21 = vld [vmem:[%s3815_s5] sm:$0xf] }
  0x1b   :  { %338 = vmatpush1.bf16.msra.mxu0 %v2308_v27  ;;  %451 = vmatpush1.bf16.msra.mxu1 %v2309_v28  ;;  %v3115_v28 = vrot.slane %v95_v21, %v99_v19 }
  0x1c   :  { %339 = vmatprep.subr.bf16.mxu0 %v2310_v29  ;;  %452 = vmatprep.subr.bf16.mxu1 %v2312_v30  ;;  %v3117_v29 = vrot.slane %v95_v21, %v107_v20 }
  0x1f   :  { %340 = vmatpush1.bf16.msra.mxu0 %v2314_v31  ;;  %453 = vmatpush1.bf16.msra.mxu1 %v2315_v32  ;;  %v3119_v32 = vrot.slane %v95_v21, %v103_v24 }
  0x20   :  { %820 = vmatprep.subr.bf16.mxu0 %v2825_v33  ;;  %863 = vmatprep.subr.bf16.mxu1 %v2830_v34 }
  0x22   :  { %358 = vmatmul.mubr.bf16.vlgmr.msra.gmra.mxu0 %v2316_v35  ;;  %471 = vmatmul.mubr.bf16.vlgmr.msra.gmra.mxu1 %v2316_v35  ;;  %v3121_v35 = vrot.slane %v95_v21, %v111_v25 }
  0x23   :  { %821 = vmatpush1.bf16.msra.mxu0 %v2838_v36  ;;  %367 = vmatprep.mubr.bf16.mxu0 %v3822_v1 }
  0x24   :  { %480 = vmatprep.mubr.bf16.mxu1 %v3822_v1  ;;  %822 = vmatprep.subr.bf16.mxu0 %v2844_v37 }
  0x25   :  { %864 = vmatpush1.bf16.msra.mxu1 %v2850_v38 }
  0x26   :  { %865 = vmatprep.subr.bf16.mxu1 %v2855_v39 }
  0x27   :  { %823 = vmatpush1.bf16.msra.mxu0 %v2862_v40 }
  0x28   :  { %824 = vmatprep.subr.bf16.mxu0 %v2869_v41 }
  0x29   :  { %866 = vmatpush1.bf16.msra.mxu1 %v2875_v42 }
  0x2a   :  { %368 = vmatmul.mubr.bf16.gmra.mxu0 %v2320_v43  ;;  %481 = vmatmul.mubr.bf16.gmra.mxu1 %v2320_v43 }
  0x2b   :  { %377 = vmatprep.mubr.bf16.mxu0 %v3822_v1  ;;  %490 = vmatprep.mubr.bf16.mxu1 %v3822_v1 }
  0x2c   :  { %825 = vmatpush1.bf16.msra.mxu0 %v2885_v44  ;;  %867 = vmatprep.subr.bf16.mxu1 %v2896_v46 }
  0x2d   :  { %826 = vmatprep.subr.bf16.mxu0 %v2890_v45  ;;  %868 = vmatpush1.bf16.msra.mxu1 %v2902_v47 }
  0x2e   :  { %869 = vmatprep.subr.bf16.mxu1 %v2907_v48 }
  0x30   :  { %827 = vmatpush1.bf16.msra.mxu0 %v2915_v49 }
  0x31   :  { %828 = vmatprep.subr.bf16.mxu0 %v2920_v50  ;;  %870 = vmatpush1.bf16.msra.mxu1 %v2928_v51 }
  0x32   :  { %378 = vmatmul.mubr.bf16.gmra.mxu0 %v2324_v52  ;;  %491 = vmatmul.mubr.bf16.gmra.mxu1 %v2324_v52 }
  0x33   :  { %387 = vmatprep.mubr.bf16.mxu0 %v3822_v1  ;;  %500 = vmatprep.mubr.bf16.mxu1 %v3822_v1 }
  0x34   :  { %829 = vmatpush1.bf16.msra.mxu0 %v2937_v53  ;;  %871 = vmatprep.subr.bf16.mxu1 %v2943_v54 }
  0x35   :  { %830 = vmatprep.subr.bf16.mxu0 %v2949_v55  ;;  %872 = vmatpush1.bf16.msra.mxu1 %v2955_v56 }
  0x36   :  { %873 = vmatprep.subr.bf16.mxu1 %v2960_v57 }
  0x38   :  { %831 = vmatpush1.bf16.msra.mxu0 %v2968_v58 }
  0x39   :  { %832 = vmatprep.subr.bf16.mxu0 %v2975_v59  ;;  %874 = vmatpush1.bf16.msra.mxu1 %v2981_v60 }
  0x3a   :  { %388 = vmatmul.mubr.bf16.gmra.mxu0 %v2331_v61  ;;  %501 = vmatmul.mubr.bf16.gmra.mxu1 %v2331_v61 }
  0x3b   :  { %397 = vmatprep.mubr.bf16.mxu0 %v3822_v1  ;;  %510 = vmatprep.mubr.bf16.mxu1 %v3822_v1 }
  0x3c   :  { %833 = vmatpush1.bf16.msra.mxu0 %v2991_v62  ;;  %875 = vmatprep.subr.bf16.mxu1 %v2996_v63 }
  0x3d   :  { %834 = vmatprep.subr.bf16.mxu0 %v3003_v0  ;;  %876 = vmatpush1.bf16.msra.mxu1 %v3008_v2 }
  0x3e   :  { %877 = vmatprep.subr.bf16.mxu1 %v3013_v3 }
  0x40   :  { %835 = vmatpush1.bf16.msra.mxu0 %v3022_v4 }
  0x41   :  { %878 = vmatpush1.bf16.msra.mxu1 %v3029_v5  ;;  %980 = vmatprep.subr.bf16.mxu0 %v2825_v33 }
  0x42   :  { %398 = vmatmul.mubr.bf16.gmra.mxu0 %v2338_v6  ;;  %511 = vmatmul.mubr.bf16.gmra.mxu1 %v2338_v6 }
  0x43   :  { %407 = vmatprep.mubr.bf16.mxu0 %v3822_v1  ;;  %520 = vmatprep.mubr.bf16.mxu1 %v3822_v1 }
  0x44   :  { %1023 = vmatprep.subr.bf16.mxu1 %v2830_v34 }
  0x4a   :  { %408 = vmatmul.mubr.bf16.gmra.mxu0 %v2345_v7  ;;  %521 = vmatmul.mubr.bf16.gmra.mxu1 %v2345_v7 }
  0x4b   :  { %417 = vmatprep.mubr.bf16.mxu0 %v3822_v1  ;;  %530 = vmatprep.mubr.bf16.mxu1 %v3822_v1 }
  0x52   :  { %418 = vmatmul.mubr.bf16.gmra.mxu0 %v2352_v8  ;;  %531 = vmatmul.mubr.bf16.gmra.mxu1 %v2352_v8 }
  0x53   :  { %427 = vmatprep.mubr.bf16.mxu0 %v3822_v1  ;;  %540 = vmatprep.mubr.bf16.mxu1 %v3822_v1 }
  0x5a   :  { %428 = vmatmul.mubr.bf16.gmra.mxu0 %v2362_v9  ;;  %541 = vmatmul.mubr.bf16.gmra.mxu1 %v2362_v9 }
  0x5b   :  { %852 = vmatprep.mubr.bf16.mxu0 %v3822_v1  ;;  %895 = vmatprep.mubr.bf16.mxu1 %v3822_v1 }
  0x62   :  { %853 = vmatmul.mubr.bf16.vlgmr.msra.gmra.mxu0 %v659_v12  ;;  %896 = vmatmul.mubr.bf16.vlgmr.msra.gmra.mxu1 %v659_v12 }
  0x63   :  { %981 = vmatpush1.bf16.msra.mxu0 %v2838_v36  ;;  %1024 = vmatpush1.bf16.msra.mxu1 %v2850_v38 }
  0x64   :  { %982 = vmatprep.subr.bf16.mxu0 %v2844_v37  ;;  %1025 = vmatprep.subr.bf16.mxu1 %v2855_v39 }
  0x65   :  { %1012 = vmatprep.mubr.bf16.mxu0 %v3822_v1  ;;  %1055 = vmatprep.mubr.bf16.mxu1 %v3822_v1 }
  0x67   :  { %983 = vmatpush1.bf16.msra.mxu0 %v2862_v40  ;;  %1026 = vmatpush1.bf16.msra.mxu1 %v2875_v42 }
  0x68   :  { %984 = vmatprep.subr.bf16.mxu0 %v2869_v41  ;;  %1027 = vmatprep.subr.bf16.mxu1 %v2896_v46 }
  0x6b   :  { %985 = vmatpush1.bf16.msra.mxu0 %v2885_v44  ;;  %1028 = vmatpush1.bf16.msra.mxu1 %v2902_v47 }
  0x6c   :  { %986 = vmatprep.subr.bf16.mxu0 %v2890_v45  ;;  %1029 = vmatprep.subr.bf16.mxu1 %v2907_v48 }
  0x6f   :  { %987 = vmatpush1.bf16.msra.mxu0 %v2915_v49  ;;  %1030 = vmatpush1.bf16.msra.mxu1 %v2928_v51 }
  0x70   :  { %988 = vmatprep.subr.bf16.mxu0 %v2920_v50  ;;  %1031 = vmatprep.subr.bf16.mxu1 %v2943_v54 }
  0x73   :  { %989 = vmatpush1.bf16.msra.mxu0 %v2937_v53  ;;  %1032 = vmatpush1.bf16.msra.mxu1 %v2955_v56 }
  0x74   :  { %990 = vmatprep.subr.bf16.mxu0 %v2949_v55  ;;  %1033 = vmatprep.subr.bf16.mxu1 %v2960_v57 }
  0x77   :  { %991 = vmatpush1.bf16.msra.mxu0 %v2968_v58  ;;  %1034 = vmatpush1.bf16.msra.mxu1 %v2981_v60 }
  0x78   :  { %992 = vmatprep.subr.bf16.mxu0 %v2975_v59  ;;  %1035 = vmatprep.subr.bf16.mxu1 %v2996_v63 }
  0x7b   :  { %993 = vmatpush1.bf16.msra.mxu0 %v2991_v62  ;;  %1036 = vmatpush1.bf16.msra.mxu1 %v3008_v2 }
  0x7c   :  { %994 = vmatprep.subr.bf16.mxu0 %v3003_v0  ;;  %1037 = vmatprep.subr.bf16.mxu1 %v3013_v3 }
  0x7f   :  { %995 = vmatpush1.bf16.msra.mxu0 %v3022_v4  ;;  %1038 = vmatpush1.bf16.msra.mxu1 %v3029_v5 }
  0x80   :  { %1140 = vmatprep.subr.bf16.mxu0 %v2825_v33  ;;  %1183 = vmatprep.subr.bf16.mxu1 %v2830_v34 }
  0xe2   :  { %v3096_v15 = vpop.f32.mrf.mxu0  ;;  %v3098_v16 = vpop.f32.mrf.mxu1 }
  0xe4   :  { %v3100_v17 = vpop.f32.mrf.mxu0  ;;  %v3102_v18 = vpop.f32.mrf.mxu1 }
  0xe6   :  { %v3107_v22 = vpop.f32.mrf.mxu0  ;;  %v3109_v23 = vpop.f32.mrf.mxu1 }
  0xe8   :  { %v3111_v26 = vpop.f32.mrf.mxu0  ;;  %v3113_v27 = vpop.f32.mrf.mxu1 }
  0xea   :  { %v369_v30 = vpop.f32.mrf.mxu0  ;;  %v482_v31 = vpop.f32.mrf.mxu1 }
  0xeb   :  { %v3124_v43 = vadd.f32 %v369_v30, %v3115_v28  ;;  %v3127_v52 = vadd.f32 %v482_v31, %v3117_v29 }
  0xec   :  { %v371_v61 = vpop.f32.mrf.mxu0  ;;  %v484_v6 = vpop.f32.mrf.mxu1 }
  0xed   :  { %v3130_v7 = vadd.f32 %v371_v61, %v3119_v32  ;;  %v3133_v8 = vadd.f32 %v484_v6, %v3121_v35 }
  0xee   :  { %v373_v9 = vpop.f32.mrf.mxu0  ;;  %v486_v10 = vpop.f32.mrf.mxu1 }
  0xef   :  { %3824 = vst [vmem:[#allocation6_spill] sm:$0xff] %v3133_v8  ;;  %v3136_v11 = vadd.f32 %v373_v9, %v3115_v28  ;;  %v3139_v12 = vadd.f32 %v486_v10, %v3117_v29 }
  0xf0   :  { %v375_v13 = vpop.f32.mrf.mxu0  ;;  %v488_v14 = vpop.f32.mrf.mxu1 }
  0xf1   :  { %3825 = vst [vmem:[#allocation7_spill] sm:$0xff] %v3139_v12  ;;  %v3142_v19 = vadd.f32 %v375_v13, %v3119_v32  ;;  %v3145_v20 = vadd.f32 %v488_v14, %v3121_v35 }
  0xf2   :  { %v379_v21 = vpop.f32.mrf.mxu0  ;;  %v492_v24 = vpop.f32.mrf.mxu1 }
  0xf3   :  { %3826 = vst [vmem:[#allocation8_spill] sm:$0xff] %v3145_v20  ;;  %v3148_v25 = vadd.f32 %v379_v21, %v3115_v28  ;;  %v3151_v30 = vadd.f32 %v492_v24, %v3117_v29 }
  0xf4   :  { %v381_v31 = vpop.f32.mrf.mxu0  ;;  %v494_v61 = vpop.f32.mrf.mxu1 }
  0xf5   :  { %3827 = vst [vmem:[#allocation9_spill] sm:$0xff] %v3148_v25  ;;  %3828 = vst [vmem:[#allocation10_spill] sm:$0xff] %v3151_v30  ;;  %v3154_v6 = vadd.f32 %v381_v31, %v3119_v32  ;;  %v3157_v9 = vadd.f32 %v494_v61, %v3121_v35 }
  0xf6   :  { %v383_v10 = vpop.f32.mrf.mxu0  ;;  %v496_v13 = vpop.f32.mrf.mxu1 }
  0xf7   :  { %3829 = vst [vmem:[#allocation11_spill] sm:$0xff] %v3154_v6  ;;  %3830 = vst [vmem:[#allocation12_spill] sm:$0xff] %v3157_v9  ;;  %v3160_v14 = vadd.f32 %v383_v10, %v3115_v28  ;;  %v3163_v1 = vadd.f32 %v496_v13, %v3117_v29 }
  0xf8   :  { %v385_v21 = vpop.f32.mrf.mxu0  ;;  %v498_v25 = vpop.f32.mrf.mxu1 }
  0xf9   :  { %3831 = vst [vmem:[#allocation13_spill] sm:$0xff] %v3160_v14  ;;  %3832 = vst [vmem:[#allocation14_spill] sm:$0xff] %v3163_v1  ;;  %v3166_v24 = vadd.f32 %v385_v21, %v3119_v32  ;;  %v3169_v30 = vadd.f32 %v498_v25, %v3121_v35 }
  0xfa   :  { %v389_v31 = vpop.f32.mrf.mxu0  ;;  %v502_v6 = vpop.f32.mrf.mxu1 }
  0xfb   :  { %3833 = vst [vmem:[#allocation15_spill] sm:$0xff] %v3166_v24  ;;  %3834 = vst [vmem:[#allocation16_spill] sm:$0xff] %v3169_v30  ;;  %v3172_v61 = vadd.f32 %v389_v31, %v3115_v28  ;;  %v3175_v9 = vadd.f32 %v502_v6, %v3117_v29 }
  0xfc   :  { %v391_v10 = vpop.f32.mrf.mxu0  ;;  %v504_v14 = vpop.f32.mrf.mxu1 }
  0xfd   :  { %3835 = vst [vmem:[#allocation17_spill] sm:$0xff] %v3172_v61  ;;  %3836 = vst [vmem:[#allocation18_spill] sm:$0xff] %v3175_v9  ;;  %v3178_v13 = vadd.f32 %v391_v10, %v3119_v32  ;;  %v3181_v1 = vadd.f32 %v504_v14, %v3121_v35 }
  0xfe   :  { %v393_v21 = vpop.f32.mrf.mxu0  ;;  %v506_v24 = vpop.f32.mrf.mxu1 }
  0xff   :  { %3837 = vst [vmem:[#allocation19_spill] sm:$0xff] %v3178_v13  ;;  %3838 = vst [vmem:[#allocation20_spill] sm:$0xff] %v3181_v1  ;;  %v3184_v25 = vadd.f32 %v393_v21, %v3115_v28  ;;  %v3187_v30 = vadd.f32 %v506_v24, %v3117_v29 }
 0x100   :  { %v395_v31 = vpop.f32.mrf.mxu0  ;;  %v508_v61 = vpop.f32.mrf.mxu1 }
 0x101   :  { %3839 = vst [vmem:[#allocation21_spill] sm:$0xff] %v3184_v25  ;;  %3840 = vst [vmem:[#allocation22_spill] sm:$0xff] %v3187_v30  ;;  %v3190_v6 = vadd.f32 %v395_v31, %v3119_v32  ;;  %v3193_v9 = vadd.f32 %v508_v61, %v3121_v35 }
 0x102   :  { %v399_v10 = vpop.f32.mrf.mxu0  ;;  %v512_v13 = vpop.f32.mrf.mxu1 }
 0x103   :  { %3841 = vst [vmem:[#allocation23_spill] sm:$0xff] %v3190_v6  ;;  %3842 = vst [vmem:[#allocation24_spill] sm:$0xff] %v3193_v9  ;;  %v3196_v14 = vadd.f32 %v399_v10, %v3115_v28  ;;  %v3199_v1 = vadd.f32 %v512_v13, %v3117_v29 }
 0x104   :  { %v401_v21 = vpop.f32.mrf.mxu0  ;;  %v514_v25 = vpop.f32.mrf.mxu1 }
 0x105   :  { %3843 = vst [vmem:[#allocation25_spill] sm:$0xff] %v3196_v14  ;;  %3844 = vst [vmem:[#allocation26_spill] sm:$0xff] %v3199_v1  ;;  %v3202_v24 = vadd.f32 %v401_v21, %v3119_v32  ;;  %v3205_v30 = vadd.f32 %v514_v25, %v3121_v35 }
 0x106   :  { %v403_v31 = vpop.f32.mrf.mxu0  ;;  %v516_v6 = vpop.f32.mrf.mxu1 }
 0x107   :  { %3845 = vst [vmem:[#allocation27_spill] sm:$0xff] %v3202_v24  ;;  %3846 = vst [vmem:[#allocation28_spill] sm:$0xff] %v3205_v30  ;;  %v3208_v61 = vadd.f32 %v403_v31, %v3115_v28  ;;  %v3211_v9 = vadd.f32 %v516_v6, %v3117_v29 }
 0x108   :  { %v405_v10 = vpop.f32.mrf.mxu0  ;;  %v518_v14 = vpop.f32.mrf.mxu1 }
 0x109   :  { %3847 = vst [vmem:[#allocation29_spill] sm:$0xff] %v3208_v61  ;;  %3848 = vst [vmem:[#allocation30_spill] sm:$0xff] %v3211_v9  ;;  %v3214_v13 = vadd.f32 %v405_v10, %v3119_v32  ;;  %v3217_v1 = vadd.f32 %v518_v14, %v3121_v35 }
 0x10a   :  { %v409_v21 = vpop.f32.mrf.mxu0  ;;  %v522_v24 = vpop.f32.mrf.mxu1 }
 0x10b   :  { %3849 = vst [vmem:[#allocation31_spill] sm:$0xff] %v3214_v13  ;;  %3850 = vst [vmem:[#allocation32_spill] sm:$0xff] %v3217_v1  ;;  %v3220_v25 = vadd.f32 %v409_v21, %v3115_v28  ;;  %v3223_v30 = vadd.f32 %v522_v24, %v3117_v29 }
 0x10c   :  { %v411_v31 = vpop.f32.mrf.mxu0  ;;  %v524_v61 = vpop.f32.mrf.mxu1 }
 0x10d   :  { %3851 = vst [vmem:[#allocation33_spill] sm:$0xff] %v3220_v25  ;;  %3852 = vst [vmem:[#allocation34_spill] sm:$0xff] %v3223_v30  ;;  %v3226_v6 = vadd.f32 %v411_v31, %v3119_v32  ;;  %v3229_v9 = vadd.f32 %v524_v61, %v3121_v35 }
 0x10e   :  { %v413_v10 = vpop.f32.mrf.mxu0  ;;  %v526_v13 = vpop.f32.mrf.mxu1 }
 0x10f   :  { %3853 = vst [vmem:[#allocation35_spill] sm:$0xff] %v3226_v6  ;;  %3854 = vst [vmem:[#allocation36_spill] sm:$0xff] %v3229_v9  ;;  %v3232_v14 = vadd.f32 %v413_v10, %v3115_v28  ;;  %v3235_v1 = vadd.f32 %v526_v13, %v3117_v29 }
 0x110   :  { %v415_v21 = vpop.f32.mrf.mxu0  ;;  %v528_v25 = vpop.f32.mrf.mxu1 }
 0x111   :  { %3855 = vst [vmem:[#allocation37_spill] sm:$0xff] %v3232_v14  ;;  %3856 = vst [vmem:[#allocation38_spill] sm:$0xff] %v3235_v1  ;;  %v3238_v24 = vadd.f32 %v415_v21, %v3119_v32  ;;  %v3241_v30 = vadd.f32 %v528_v25, %v3121_v35 }
 0x112   :  { %v419_v31 = vpop.f32.mrf.mxu0  ;;  %v532_v6 = vpop.f32.mrf.mxu1 }
 0x113   :  { %3857 = vst [vmem:[#allocation39_spill] sm:$0xff] %v3238_v24  ;;  %3858 = vst [vmem:[#allocation40_spill] sm:$0xff] %v3241_v30  ;;  %v3244_v61 = vadd.f32 %v419_v31, %v3115_v28  ;;  %v3247_v9 = vadd.f32 %v532_v6, %v3117_v29 }
 0x114   :  { %v421_v10 = vpop.f32.mrf.mxu0  ;;  %v534_v14 = vpop.f32.mrf.mxu1 }
 0x115   :  { %3859 = vst [vmem:[#allocation41_spill] sm:$0xff] %v3244_v61  ;;  %3860 = vst [vmem:[#allocation42_spill] sm:$0xff] %v3247_v9  ;;  %v3250_v13 = vadd.f32 %v421_v10, %v3119_v32  ;;  %v3253_v1 = vadd.f32 %v534_v14, %v3121_v35 }
 0x116   :  { %v423_v21 = vpop.f32.mrf.mxu0  ;;  %v536_v24 = vpop.f32.mrf.mxu1 }
 0x117   :  { %3861 = vst [vmem:[#allocation43_spill] sm:$0xff] %v3250_v13  ;;  %3862 = vst [vmem:[#allocation44_spill] sm:$0xff] %v3253_v1  ;;  %v3256_v25 = vadd.f32 %v423_v21, %v3115_v28  ;;  %v3259_v30 = vadd.f32 %v536_v24, %v3117_v29 }
 0x118   :  { %v425_v31 = vpop.f32.mrf.mxu0  ;;  %v538_v61 = vpop.f32.mrf.mxu1 }
 0x119   :  { %3863 = vst [vmem:[#allocation45_spill] sm:$0xff] %v3256_v25  ;;  %3864 = vst [vmem:[#allocation46_spill] sm:$0xff] %v3259_v30  ;;  %v3262_v6 = vadd.f32 %v425_v31, %v3119_v32  ;;  %v3265_v9 = vadd.f32 %v538_v61, %v3121_v35 }
 0x11a   :  { %v429_v10 = vpop.f32.mrf.mxu0  ;;  %v542_v13 = vpop.f32.mrf.mxu1 }
 0x11b   :  { %3865 = vst [vmem:[#allocation47_spill] sm:$0xff] %v3262_v6  ;;  %3866 = vst [vmem:[#allocation48_spill] sm:$0xff] %v3265_v9  ;;  %v3268_v14 = vadd.f32 %v429_v10, %v3115_v28  ;;  %v3271_v1 = vadd.f32 %v542_v13, %v3117_v29  ;;  %v360_v13 = vadd.f32 %v3096_v15, %v3115_v28 }
 0x11c   :  { %v431_v21 = vpop.f32.mrf.mxu0  ;;  %v544_v25 = vpop.f32.mrf.mxu1  ;;  %v366_v15 = vadd.f32 %v3111_v26, %v3119_v32  ;;  %v477_v26 = vadd.f32 %v3109_v23, %v3117_v29 }
 0x11d   :  { %3867 = vst [vmem:[#allocation49_spill] sm:$0xff] %v3268_v14  ;;  %3868 = vst [vmem:[#allocation50_spill] sm:$0xff] %v3271_v1  ;;  %v3274_v24 = vadd.f32 %v431_v21, %v3119_v32  ;;  %v3277_v30 = vadd.f32 %v544_v25, %v3121_v35 }
 0x11e   :  { %v433_v31 = vpop.f32.mrf.mxu0  ;;  %v546_v6 = vpop.f32.mrf.mxu1 }
 0x11f   :  { %3869 = vst [vmem:[#allocation51_spill] sm:$0xff] %v3274_v24  ;;  %3870 = vst [vmem:[#allocation52_spill] sm:$0xff] %v3277_v30  ;;  %v3280_v61 = vadd.f32 %v433_v31, %v3115_v28  ;;  %v3283_v9 = vadd.f32 %v546_v6, %v3117_v29  ;;  %v362_v30 = vadd.f32 %v3100_v17, %v3119_v32 }
 0x120   :  { %v435_v10 = vpop.f32.mrf.mxu0  ;;  %v548_v14 = vpop.f32.mrf.mxu1  ;;  %v364_v6 = vadd.f32 %v3107_v22, %v3115_v28  ;;  %v473_v22 = vadd.f32 %v3098_v16, %v3117_v29 }
 0x121   :  { %3871 = vst [vmem:[#allocation53_spill] sm:$0xff] %v3280_v61  ;;  %3872 = vst [vmem:[#allocation54_spill] sm:$0xff] %v3283_v9  ;;  %v3288_v1 = vadd.f32 %v435_v10, %v3119_v32  ;;  %v3291_v21 = vadd.f32 %v548_v14, %v3121_v35 }
 0x122   :  { %v854_v25 = vpop.f32.mrf.mxu0  ;;  %v897_v10 = vpop.f32.mrf.mxu1 }
 0x123   :  { %3873 = vst [vmem:[#allocation55_spill] sm:$0xff] %v3288_v1  ;;  %3874 = vst [vmem:[#allocation56_spill] sm:$0xff] %v3291_v21  ;;  %v906_v31 = vadd.f32 %v854_v25, %v360_v13  ;;  %v908_v32 = vadd.f32 %v897_v10, %v473_v22 }
 0x124   :  { %v856_v61 = vpop.f32.mrf.mxu0  ;;  %v899_v17 = vpop.f32.mrf.mxu1 }
 0x125   :  { %v2215_v9 = vmul.f32 -1.442695, %v906_v31  ;;  %v907_v24 = vadd.f32 %v856_v61, %v362_v30  ;;  %v475_v30 = vadd.f32 %v3102_v18, %v3121_v35 }
 0x126   :  { %v858_v20 = vpop.f32.mrf.mxu0  ;;  %v901_v28 = vpop.f32.mrf.mxu1 }
 0x127   :  { %2372 = vpow2.f32 %v2215_v9  ;;  %v2216_v1 = vmul.f32 -1.442695, %v907_v24  ;;  %v910_v14 = vadd.f32 %v858_v20, %v364_v6  ;;  %v909_v20 = vadd.f32 %v899_v17, %v475_v30 }
 0x128   :  { %v860_v21 = vpop.f32.mrf.mxu0  ;;  %v912_v9 = vadd.f32 %v901_v28, %v477_v26  ;;  %v2217_v24 = vmul.f32 -1.442695, %v908_v32  ;;  %v44_v26 = vld [vmem:[%s3816_s2 + $0x8] sm:$0xff] }
 0x129   :  { %2374 = vpow2.f32 %v2216_v1  ;;  %v2218_v8 = vmul.f32 -1.442695, %v910_v14  ;;  %v911_v12 = vadd.f32 %v860_v21, %v366_v15  ;;  %v903_v21 = vpop.f32.mrf.mxu1 }
 0x12a   :  { %v2220_v16 = vmul.f32 -1.442695, %v912_v9 }
 0x12b   :  { %2376 = vpow2.f32 %v2218_v8  ;;  %v2219_v13 = vmul.f32 -1.442695, %v911_v12  ;;  %v479_v12 = vadd.f32 %v3113_v27, %v3121_v35  ;;  %v43_v27 = vld [vmem:[%s3816_s2] sm:$0xff] }
 0x12d   :  { %2378 = vpow2.f32 %v2219_v13  ;;  %v913_v18 = vadd.f32 %v903_v21, %v479_v12 }
 0x12e   :  { %2380 = vtanh.f32 %v909_v20 }
 0x134   :  { %v2373_v1 = vpop.eup %2372 }
 0x135   :  { %v932_v61 = vadd.f32 1.0, %v2373_v1 }
 0x136   :  { %v2375_v8 = vpop.eup %2374 }
 0x137   :  { %2382 = vrcp.f32 %v932_v61  ;;  %v933_v25 = vadd.f32 1.0, %v2375_v8 }
 0x138   :  { %v2377_v31 = vpop.eup %2376  ;;  %2384 = vpow2.f32 %v2217_v24 }
 0x139   :  { %2386 = vrcp.f32 %v933_v25  ;;  %v935_v23 = vadd.f32 1.0, %v2377_v31 }
 0x13a   :  { %v2379_v29 = vpop.eup %2378  ;;  %2388 = vpow2.f32 %v2220_v16 }
 0x13b   :  { %2390 = vrcp.f32 %v935_v23  ;;  %v936_v6 = vadd.f32 1.0, %v2379_v29  ;;  %v2381_v15 = vpop.eup %2380  ;;  %v3875_v29 = vmov 0  }
 0x13c   :  { %2392 = vtanh.f32 %v913_v18 }
 0x13d   :  { %2394 = vrcp.f32 %v936_v6 }
 0x144   :  { %v2383_v10 = vpop.eup %2382 }
 0x145   :  { %v2385_v35 = vpop.eup %2384  ;;  %v954_v14 = vmul.f32 %v2383_v10, %v2381_v15 }
 0x146   :  { %v2387_v17 = vpop.eup %2386  ;;  %v934_v30 = vadd.f32 1.0, %v2385_v35 }
 0x147   :  { %v2389_v13 = vpop.eup %2388  ;;  %v952_v22 = vmul.f32 %v2387_v17, %v43_v27 }
 0x148   :  { %v2391_v28 = vpop.eup %2390  ;;  %v937_v1 = vadd.f32 1.0, %v2389_v13  ;;  %2396 = vrcp.f32 %v934_v30 }
 0x149   :  { %v2393_v32 = vpop.eup %2392  ;;  %v3313_v20 = vadd.f32 %v954_v14, %v952_v22 }
 0x14a   :  { %v2395_v9 = vpop.eup %2394  ;;  %v955_v61 = vmul.f32 %v2393_v32, %v2391_v28 }
 0x14b   :  { %v953_v24 = vmul.f32 %v2395_v9, %v44_v26  ;;  %2398 = vtanh.f32 %v3313_v20  ;;  %v3876_v9 = vld [vmem:[#allocation7_spill] sm:$0xff] }
 0x14c   :  { %2400 = vrcp.f32 %v937_v1 }
 0x14d   :  { %v3316_v21 = vadd.f32 %v955_v61, %v953_v24  ;;  %v3877_v24 = vld [vmem:[#allocation6_spill] sm:$0xff] }
 0x14f   :  { %2402 = vtanh.f32 %v3316_v21 }
 0x155   :  { %v2397_v8 = vpop.eup %2396 }
 0x158   :  { %v2399_v12 = vpop.eup %2398 }
 0x159   :  { %v2401_v16 = vpop.eup %2400  ;;  %v960_v31 = vmul.f32 %v2399_v12, %v2397_v8 }
 0x15c   :  { %v2403_v25 = vpop.eup %2402 }
 0x15d   :  { %v961_v18 = vmul.f32 %v2403_v25, %v2401_v16 }
 0x15f   :  { %v979_v23 = vpack.c.bf16 %v961_v18, %v960_v31  ;;  %v3878_v31 = vld [vmem:[#allocation8_spill] sm:$0xff] }
 0x161   :  { %1013 = vmatmul.mubr.bf16.vlgmr.msra.gmra.mxu0 %v979_v23  ;;  %1056 = vmatmul.mubr.bf16.vlgmr.msra.gmra.mxu1 %v979_v23 }
 0x162   :  { %1141 = vmatpush1.bf16.msra.mxu0 %v2838_v36  ;;  %1184 = vmatpush1.bf16.msra.mxu1 %v2850_v38 }
 0x163   :  { %1142 = vmatprep.subr.bf16.mxu0 %v2844_v37  ;;  %1185 = vmatprep.subr.bf16.mxu1 %v2855_v39 }
 0x164   :  { %1172 = vmatprep.mubr.bf16.mxu0 %v3875_v29  ;;  %1215 = vmatprep.mubr.bf16.mxu1 %v3875_v29 }
 0x166   :  { %1143 = vmatpush1.bf16.msra.mxu0 %v2862_v40  ;;  %1186 = vmatpush1.bf16.msra.mxu1 %v2875_v42 }
 0x167   :  { %1144 = vmatprep.subr.bf16.mxu0 %v2869_v41  ;;  %1187 = vmatprep.subr.bf16.mxu1 %v2896_v46 }
 0x16a   :  { %1145 = vmatpush1.bf16.msra.mxu0 %v2885_v44  ;;  %1188 = vmatpush1.bf16.msra.mxu1 %v2902_v47 }
 0x16b   :  { %1146 = vmatprep.subr.bf16.mxu0 %v2890_v45  ;;  %1189 = vmatprep.subr.bf16.mxu1 %v2907_v48 }
 0x16e   :  { %1147 = vmatpush1.bf16.msra.mxu0 %v2915_v49  ;;  %1190 = vmatpush1.bf16.msra.mxu1 %v2928_v51 }
 0x16f   :  { %1148 = vmatprep.subr.bf16.mxu0 %v2920_v50  ;;  %1191 = vmatprep.subr.bf16.mxu1 %v2943_v54 }
 0x172   :  { %1149 = vmatpush1.bf16.msra.mxu0 %v2937_v53  ;;  %1192 = vmatpush1.bf16.msra.mxu1 %v2955_v56 }
 0x173   :  { %1150 = vmatprep.subr.bf16.mxu0 %v2949_v55  ;;  %1193 = vmatprep.subr.bf16.mxu1 %v2960_v57 }
 0x176   :  { %1151 = vmatpush1.bf16.msra.mxu0 %v2968_v58  ;;  %1194 = vmatpush1.bf16.msra.mxu1 %v2981_v60 }
 0x177   :  { %1152 = vmatprep.subr.bf16.mxu0 %v2975_v59  ;;  %1195 = vmatprep.subr.bf16.mxu1 %v2996_v63 }
 0x17a   :  { %1153 = vmatpush1.bf16.msra.mxu0 %v2991_v62  ;;  %1196 = vmatpush1.bf16.msra.mxu1 %v3008_v2 }
 0x17b   :  { %1154 = vmatprep.subr.bf16.mxu0 %v3003_v0  ;;  %1197 = vmatprep.subr.bf16.mxu1 %v3013_v3 }
 0x17e   :  { %1155 = vmatpush1.bf16.msra.mxu0 %v3022_v4  ;;  %1198 = vmatpush1.bf16.msra.mxu1 %v3029_v5 }
 0x17f   :  { %1300 = vmatprep.subr.bf16.mxu0 %v2825_v33  ;;  %1343 = vmatprep.subr.bf16.mxu1 %v2830_v34 }
 0x221   :  { %v1014_v6 = vpop.f32.mrf.mxu0  ;;  %v1057_v35 = vpop.f32.mrf.mxu1 }
 0x222   :  { %v1066_v15 = vadd.f32 %v1014_v6, %v3124_v43  ;;  %v1068_v43 = vadd.f32 %v1057_v35, %v3127_v52 }
 0x223   :  { %v1016_v10 = vpop.f32.mrf.mxu0  ;;  %v1059_v30 = vpop.f32.mrf.mxu1 }
 0x224   :  { %v2221_v27 = vmul.f32 -1.442695, %v1066_v15  ;;  %v1067_v14 = vadd.f32 %v1016_v10, %v3130_v7  ;;  %v2223_v7 = vmul.f32 -1.442695, %v1068_v43  ;;  %v1069_v61 = vadd.f32 %v1059_v30, %v3877_v24 }
 0x225   :  { %v1018_v17 = vpop.f32.mrf.mxu0  ;;  %v1061_v32 = vpop.f32.mrf.mxu1 }
 0x226   :  { %2404 = vpow2.f32 %v2221_v27  ;;  %v2222_v13 = vmul.f32 -1.442695, %v1067_v14  ;;  %v1070_v22 = vadd.f32 %v1018_v17, %v3136_v11  ;;  %v1072_v1 = vadd.f32 %v1061_v32, %v3876_v9 }
 0x227   :  { %v1020_v28 = vpop.f32.mrf.mxu0  ;;  %v1063_v8 = vpop.f32.mrf.mxu1 }
 0x228   :  { %2406 = vpow2.f32 %v2222_v13  ;;  %v2224_v26 = vmul.f32 -1.442695, %v1070_v22  ;;  %v1071_v33 = vadd.f32 %v1020_v28, %v3142_v19  ;;  %v2226_v11 = vmul.f32 -1.442695, %v1072_v1 }
 0x229   :  { %v1073_v19 = vadd.f32 %v1063_v8, %v3878_v31  ;;  %v3886_v31 = vld [vmem:[#allocation16_spill] sm:$0xff] }
 0x22a   :  { %2408 = vpow2.f32 %v2224_v26  ;;  %v2225_v34 = vmul.f32 -1.442695, %v1071_v33 }
 0x22c   :  { %2410 = vpow2.f32 %v2225_v34 }
 0x22d   :  { %2412 = vpow2.f32 %v2223_v7 }
 0x22e   :  { %2414 = vtanh.f32 %v1069_v61 }
 0x233   :  { %v2405_v12 = vpop.eup %2404 }
 0x234   :  { %v1092_v16 = vadd.f32 1.0, %v2405_v12 }
 0x235   :  { %v2407_v25 = vpop.eup %2406 }
 0x236   :  { %2416 = vrcp.f32 %v1092_v16  ;;  %v1093_v18 = vadd.f32 1.0, %v2407_v25 }
 0x237   :  { %v2409_v23 = vpop.eup %2408  ;;  %2418 = vpow2.f32 %v2226_v11 }
 0x238   :  { %2420 = vrcp.f32 %v1093_v18  ;;  %v1095_v52 = vadd.f32 1.0, %v2409_v23 }
 0x239   :  { %v2411_v6 = vpop.eup %2410  ;;  %2422 = vtanh.f32 %v1073_v19 }
 0x23a   :  { %2424 = vrcp.f32 %v1095_v52  ;;  %v1096_v15 = vadd.f32 1.0, %v2411_v6  ;;  %v2413_v10 = vpop.eup %2412 }
 0x23b   :  { %v2415_v27 = vpop.eup %2414  ;;  %v1094_v26 = vadd.f32 1.0, %v2413_v10 }
 0x23c   :  { %2426 = vrcp.f32 %v1096_v15 }
 0x23d   :  { %2428 = vrcp.f32 %v1094_v26 }
 0x243   :  { %v2417_v35 = vpop.eup %2416 }
 0x244   :  { %v2419_v14 = vpop.eup %2418  ;;  %v1114_v17 = vmul.f32 %v2417_v35, %v2415_v27 }
 0x245   :  { %v2421_v13 = vpop.eup %2420  ;;  %v1097_v32 = vadd.f32 1.0, %v2419_v14 }
 0x246   :  { %v2423_v22 = vpop.eup %2422  ;;  %v1112_v28 = vmul.f32 %v2421_v13, %v3313_v20 }
 0x247   :  { %v2425_v30 = vpop.eup %2424 }
 0x248   :  { %v3362_v33 = vadd.f32 %v1114_v17, %v1112_v28  ;;  %v1115_v34 = vmul.f32 %v2425_v30, %v2423_v22 }
 0x249   :  { %v2427_v43 = vpop.eup %2426 }
 0x24a   :  { %v1113_v9 = vmul.f32 %v2427_v43, %v3316_v21  ;;  %2430 = vtanh.f32 %v3362_v33  ;;  %v2429_v7 = vpop.eup %2428 }
 0x24b   :  { %2432 = vrcp.f32 %v1097_v32 }
 0x24c   :  { %v3366_v1 = vadd.f32 %v1115_v34, %v1113_v9 }
 0x24e   :  { %2434 = vtanh.f32 %v3366_v1 }
 0x257   :  { %v2431_v24 = vpop.eup %2430 }
 0x258   :  { %v2433_v20 = vpop.eup %2432  ;;  %v1120_v8 = vmul.f32 %v2431_v24, %v2429_v7 }
 0x25b   :  { %v2435_v61 = vpop.eup %2434 }
 0x25c   :  { %v1121_v12 = vmul.f32 %v2435_v61, %v2433_v20 }
 0x25e   :  { %v1139_v11 = vpack.c.bf16 %v1121_v12, %v1120_v8 }
 0x260   :  { %1173 = vmatmul.mubr.bf16.vlgmr.msra.gmra.mxu0 %v1139_v11  ;;  %1216 = vmatmul.mubr.bf16.vlgmr.msra.gmra.mxu1 %v1139_v11 }
 0x261   :  { %1301 = vmatpush1.bf16.msra.mxu0 %v2838_v36  ;;  %1344 = vmatpush1.bf16.msra.mxu1 %v2850_v38  ;;  %v3404_v36 = vld [vmem:[%s3813_s4 + $0xe4] ss:$16 sps:$4 sm:$0xff]  }
 0x262   :  { %1302 = vmatprep.subr.bf16.mxu0 %v2844_v37  ;;  %1345 = vmatprep.subr.bf16.mxu1 %v2855_v39  ;;  %v3410_v37 = vld [vmem:[%s3813_s4 + $0xec] ss:$16 sps:$4 sm:$0xff]  }
 0x263   :  { %1332 = vmatprep.mubr.bf16.mxu0 %v3875_v29  ;;  %1375 = vmatprep.mubr.bf16.mxu1 %v3875_v29  ;;  %v3879_v39 = vld [vmem:[#allocation9_spill] sm:$0xff] }
 0x265   :  { %1303 = vmatpush1.bf16.msra.mxu0 %v2862_v40  ;;  %1346 = vmatpush1.bf16.msra.mxu1 %v2875_v42 }
 0x266   :  { %1304 = vmatprep.subr.bf16.mxu0 %v2869_v41  ;;  %1347 = vmatprep.subr.bf16.mxu1 %v2896_v46 }
 0x269   :  { %1305 = vmatpush1.bf16.msra.mxu0 %v2885_v44  ;;  %1348 = vmatpush1.bf16.msra.mxu1 %v2902_v47 }
 0x26a   :  { %1306 = vmatprep.subr.bf16.mxu0 %v2890_v45  ;;  %1349 = vmatprep.subr.bf16.mxu1 %v2907_v48  ;;  %v3880_v45 = vld [vmem:[#allocation11_spill] sm:$0xff] }
 0x26d   :  { %1307 = vmatpush1.bf16.msra.mxu0 %v2915_v49  ;;  %1350 = vmatpush1.bf16.msra.mxu1 %v2928_v51  ;;  %v3881_v49 = vld [vmem:[#allocation13_spill] sm:$0xff] }
 0x26e   :  { %1308 = vmatprep.subr.bf16.mxu0 %v2920_v50  ;;  %1351 = vmatprep.subr.bf16.mxu1 %v2943_v54 }
 0x271   :  { %1309 = vmatpush1.bf16.msra.mxu0 %v2937_v53  ;;  %1352 = vmatpush1.bf16.msra.mxu1 %v2955_v56 }
 0x272   :  { %1310 = vmatprep.subr.bf16.mxu0 %v2949_v55  ;;  %1353 = vmatprep.subr.bf16.mxu1 %v2960_v57  ;;  %v3882_v55 = vld [vmem:[#allocation15_spill] sm:$0xff] }
 0x275   :  { %1311 = vmatpush1.bf16.msra.mxu0 %v2968_v58  ;;  %1354 = vmatpush1.bf16.msra.mxu1 %v2981_v60  ;;  %v3883_v58 = vld [vmem:[#allocation10_spill] sm:$0xff] }
 0x276   :  { %1312 = vmatprep.subr.bf16.mxu0 %v2975_v59  ;;  %1355 = vmatprep.subr.bf16.mxu1 %v2996_v63 }
 0x279   :  { %1313 = vmatpush1.bf16.msra.mxu0 %v2991_v62  ;;  %1356 = vmatpush1.bf16.msra.mxu1 %v3008_v2  ;;  %v3884_v62 = vld [vmem:[#allocation14_spill] sm:$0xff]  ;;  %v3885_v2 = vld [vmem:[#allocation12_spill] sm:$0xff] }
 0x27a   :  { %1314 = vmatprep.subr.bf16.mxu0 %v3003_v0  ;;  %1357 = vmatprep.subr.bf16.mxu1 %v3013_v3 }
 0x27d   :  { %1315 = vmatpush1.bf16.msra.mxu0 %v3022_v4  ;;  %1358 = vmatpush1.bf16.msra.mxu1 %v3029_v5 }
 0x27e   :  { %1460 = vmatprep.subr.bf16.mxu0 %v3404_v36  ;;  %1503 = vmatprep.subr.bf16.mxu1 %v3410_v37 }
 0x320   :  { %v1174_v38 = vpop.f32.mrf.mxu0  ;;  %v1217_v44 = vpop.f32.mrf.mxu1 }
 0x321   :  { %v1226_v40 = vadd.f32 %v1174_v38, %v3879_v39  ;;  %v1228_v59 = vadd.f32 %v1217_v44, %v3883_v58  ;;  %v3438_v39 = vld [vmem:[%s3813_s4 + $0xe8] ss:$16 sps:$4 sm:$0xff]   ;;  %v3542_v58 = vld [vmem:[%s3813_s4 + $0x44] ss:$16 sps:$4 sm:$0xff]  }
 0x322   :  { %v1176_v41 = vpop.f32.mrf.mxu0  ;;  %v1219_v53 = vpop.f32.mrf.mxu1  ;;  %v3464_v44 = vld [vmem:[%s3813_s4 + $0xc8] ss:$16 sps:$4 sm:$0xff]  }
 0x323   :  { %v2227_v42 = vmul.f32 -1.442695, %v1226_v40  ;;  %v1227_v46 = vadd.f32 %v1176_v41, %v3880_v45  ;;  %v2229_v0 = vmul.f32 -1.442695, %v1228_v59  ;;  %v1229_v3 = vadd.f32 %v1219_v53, %v3885_v2  ;;  %v3444_v40 = vld [vmem:[%s3813_s4 + $0xc4] ss:$16 sps:$4 sm:$0xff]  }
 0x324   :  { %v1178_v47 = vpop.f32.mrf.mxu0  ;;  %v1221_v60 = vpop.f32.mrf.mxu1  ;;  %v3450_v41 = vld [vmem:[%s3813_s4 + $0xcc] ss:$16 sps:$4 sm:$0xff]   ;;  %v3470_v45 = vld [vmem:[%s3813_s4 + $0xa4] ss:$16 sps:$4 sm:$0xff]   ;;  %v3512_v53 = vld [vmem:[%s3813_s4 + $0x88] ss:$16 sps:$4 sm:$0xff]  }
 0x325   :  { %2436 = vpow2.f32 %v2227_v42  ;;  %v2228_v48 = vmul.f32 -1.442695, %v1227_v46  ;;  %v1230_v50 = vadd.f32 %v1178_v47, %v3881_v49  ;;  %v1232_v63 = vadd.f32 %v1221_v60, %v3884_v62  ;;  %v3458_v42 = vld [vmem:[%s3813_s4 + $0xc0] ss:$16 sps:$4 sm:$0xff]   ;;  %v3476_v46 = vld [vmem:[%s3813_s4 + $0xac] ss:$16 sps:$4 sm:$0xff]  }
 0x326   :  { %v1180_v51 = vpop.f32.mrf.mxu0  ;;  %v1223_v4 = vpop.f32.mrf.mxu1  ;;  %v3482_v47 = vld [vmem:[%s3813_s4 + $0xa0] ss:$16 sps:$4 sm:$0xff]   ;;  %v3494_v49 = vld [vmem:[%s3813_s4 + $0x84] ss:$16 sps:$4 sm:$0xff]   ;;  %v3548_v59 = vld [vmem:[%s3813_s4 + $0x4c] ss:$16 sps:$4 sm:$0xff]  }
 0x327   :  { %2438 = vpow2.f32 %v2228_v48  ;;  %v2230_v54 = vmul.f32 -1.442695, %v1230_v50  ;;  %v1231_v56 = vadd.f32 %v1180_v51, %v3882_v55  ;;  %v2232_v21 = vmul.f32 -1.442695, %v1232_v63  ;;  %v3488_v48 = vld [vmem:[%s3813_s4 + $0xa8] ss:$16 sps:$4 sm:$0xff]  }
 0x328   :  { %v1233_v19 = vadd.f32 %v1223_v4, %v3886_v31  ;;  %v3500_v50 = vld [vmem:[%s3813_s4 + $0x8c] ss:$16 sps:$4 sm:$0xff]   ;;  %v3506_v51 = vld [vmem:[%s3813_s4 + $0x80] ss:$16 sps:$4 sm:$0xff]   ;;  %v3560_v62 = vld [vmem:[%s3813_s4 + $0x48] ss:$16 sps:$4 sm:$0xff]  }
 0x329   :  { %2440 = vpow2.f32 %v2230_v54  ;;  %v2231_v57 = vmul.f32 -1.442695, %v1231_v56  ;;  %v3518_v54 = vld [vmem:[%s3813_s4 + $0x64] ss:$16 sps:$4 sm:$0xff]   ;;  %v3524_v55 = vld [vmem:[%s3813_s4 + $0x6c] ss:$16 sps:$4 sm:$0xff]  }
 0x32a   :  { %v3530_v56 = vld [vmem:[%s3813_s4 + $0x60] ss:$16 sps:$4 sm:$0xff]   ;;  %v3566_v63 = vld [vmem:[%s3813_s4 + $0x24] ss:$16 sps:$4 sm:$0xff]  }
 0x32b   :  { %2442 = vpow2.f32 %v2231_v57  ;;  %v3536_v57 = vld [vmem:[%s3813_s4 + $0x68] ss:$16 sps:$4 sm:$0xff]   ;;  %v3554_v60 = vld [vmem:[%s3813_s4 + $0x40] ss:$16 sps:$4 sm:$0xff]   ;;  %v3590_v4 = vld [vmem:[%s3813_s4 + $0x4] ss:$16 sps:$4 sm:$0xff]  }
 0x32c   :  { %2444 = vpow2.f32 %v2229_v0  ;;  %v3572_v0 = vld [vmem:[%s3813_s4 + $0x2c] ss:$16 sps:$4 sm:$0xff]   ;;  %v3578_v2 = vld [vmem:[%s3813_s4 + $0x20] ss:$16 sps:$4 sm:$0xff]  }
 0x32d   :  { %2446 = vtanh.f32 %v1229_v3  ;;  %v3584_v3 = vld [vmem:[%s3813_s4 + $0x28] ss:$16 sps:$4 sm:$0xff]  }
 0x32e   :  { %v3887_v31 = vld [vmem:[#allocation17_spill] sm:$0xff] }
 0x332   :  { %v2437_v5 = vpop.eup %2436 }
 0x333   :  { %v1252_v16 = vadd.f32 1.0, %v2437_v5  ;;  %v3596_v5 = vld [vmem:[%s3813_s4 + $0xc] ss:$16 sps:$4 sm:$0xff]  }
 0x334   :  { %v2439_v25 = vpop.eup %2438 }
 0x335   :  { %2448 = vrcp.f32 %v1252_v16  ;;  %v1253_v18 = vadd.f32 1.0, %v2439_v25  ;;  %v3608_v16 = vld [vmem:[%s3813_s4 + $0x8] ss:$16 sps:$4 sm:$0xff]  }
 0x336   :  { %v2441_v23 = vpop.eup %2440  ;;  %2450 = vpow2.f32 %v2232_v21  ;;  %v3602_v21 = vld [vmem:[%s3813_s4] ss:$16 sps:$4 sm:$0xff]  }
 0x337   :  { %2452 = vrcp.f32 %v1253_v18  ;;  %v1255_v52 = vadd.f32 1.0, %v2441_v23 }
 0x338   :  { %v2443_v6 = vpop.eup %2442  ;;  %2454 = vtanh.f32 %v1233_v19 }
 0x339   :  { %2456 = vrcp.f32 %v1255_v52  ;;  %v1256_v15 = vadd.f32 1.0, %v2443_v6  ;;  %v2445_v10 = vpop.eup %2444  ;;  %v3888_v6 = vld [vmem:[#allocation19_spill] sm:$0xff] }
 0x33a   :  { %v2447_v27 = vpop.eup %2446  ;;  %v1254_v26 = vadd.f32 1.0, %v2445_v10 }
 0x33b   :  { %2458 = vrcp.f32 %v1256_v15 }
 0x33c   :  { %2460 = vrcp.f32 %v1254_v26 }
 0x342   :  { %v2449_v35 = vpop.eup %2448 }
 0x343   :  { %v2451_v14 = vpop.eup %2450  ;;  %v1274_v17 = vmul.f32 %v2449_v35, %v2447_v27  ;;  %v3889_v35 = vld [vmem:[#allocation21_spill] sm:$0xff] }
 0x344   :  { %v2453_v13 = vpop.eup %2452  ;;  %v1257_v9 = vadd.f32 1.0, %v2451_v14 }
 0x345   :  { %v2455_v22 = vpop.eup %2454  ;;  %v1272_v28 = vmul.f32 %v2453_v13, %v3362_v33 }
 0x346   :  { %v2457_v30 = vpop.eup %2456 }
 0x347   :  { %v3422_v34 = vadd.f32 %v1274_v17, %v1272_v28  ;;  %v1275_v43 = vmul.f32 %v2457_v30, %v2455_v22  ;;  %v3890_v28 = vld [vmem:[#allocation23_spill] sm:$0xff] }
 0x348   :  { %v2459_v32 = vpop.eup %2458 }
 0x349   :  { %v1273_v7 = vmul.f32 %v2459_v32, %v3366_v1  ;;  %2462 = vtanh.f32 %v3422_v34  ;;  %v2461_v20 = vpop.eup %2460  ;;  %v3432_v1 = vld [vmem:[%s3813_s4 + $0xe0] ss:$16 sps:$4 sm:$0xff]  }
 0x34a   :  { %2464 = vrcp.f32 %v1257_v9 }
 0x34b   :  { %v3426_v24 = vadd.f32 %v1275_v43, %v1273_v7  ;;  %v3891_v43 = vld [vmem:[#allocation18_spill] sm:$0xff] }
 0x34c   :  { %v3892_v7 = vld [vmem:[#allocation22_spill] sm:$0xff] }
 0x34d   :  { %2466 = vtanh.f32 %v3426_v24 }
 0x356   :  { %v2463_v61 = vpop.eup %2462 }
 0x357   :  { %v2465_v33 = vpop.eup %2464  ;;  %v1280_v12 = vmul.f32 %v2463_v61, %v2461_v20 }
 0x35a   :  { %v2467_v8 = vpop.eup %2466 }
 0x35b   :  { %v1281_v11 = vmul.f32 %v2467_v8, %v2465_v33  ;;  %v3893_v33 = vld [vmem:[#allocation20_spill] sm:$0xff] }
 0x35d   :  { %v1299_v38 = vpack.c.bf16 %v1281_v11, %v1280_v12 }
 0x35f   :  { %1333 = vmatmul.mubr.bf16.vlgmr.msra.gmra.mxu0 %v1299_v38  ;;  %1376 = vmatmul.mubr.bf16.vlgmr.msra.gmra.mxu1 %v1299_v38 }
 0x360   :  { %1461 = vmatpush1.bf16.msra.mxu0 %v3432_v1  ;;  %1504 = vmatpush1.bf16.msra.mxu1 %v3438_v39 }
 0x361   :  { %1462 = vmatprep.subr.bf16.mxu0 %v3444_v40  ;;  %1505 = vmatprep.subr.bf16.mxu1 %v3450_v41 }
 0x362   :  { %1492 = vmatprep.mubr.bf16.mxu0 %v3875_v29  ;;  %1535 = vmatprep.mubr.bf16.mxu1 %v3875_v29 }
 0x364   :  { %1463 = vmatpush1.bf16.msra.mxu0 %v3458_v42  ;;  %1506 = vmatpush1.bf16.msra.mxu1 %v3464_v44 }
 0x365   :  { %1464 = vmatprep.subr.bf16.mxu0 %v3470_v45  ;;  %1507 = vmatprep.subr.bf16.mxu1 %v3476_v46 }
 0x368   :  { %1465 = vmatpush1.bf16.msra.mxu0 %v3482_v47  ;;  %1508 = vmatpush1.bf16.msra.mxu1 %v3488_v48 }
 0x369   :  { %1466 = vmatprep.subr.bf16.mxu0 %v3494_v49  ;;  %1509 = vmatprep.subr.bf16.mxu1 %v3500_v50 }
 0x36c   :  { %1467 = vmatpush1.bf16.msra.mxu0 %v3506_v51  ;;  %1510 = vmatpush1.bf16.msra.mxu1 %v3512_v53 }
 0x36d   :  { %1468 = vmatprep.subr.bf16.mxu0 %v3518_v54  ;;  %1511 = vmatprep.subr.bf16.mxu1 %v3524_v55 }
 0x370   :  { %1469 = vmatpush1.bf16.msra.mxu0 %v3530_v56  ;;  %1512 = vmatpush1.bf16.msra.mxu1 %v3536_v57 }
 0x371   :  { %1470 = vmatprep.subr.bf16.mxu0 %v3542_v58  ;;  %1513 = vmatprep.subr.bf16.mxu1 %v3548_v59 }
 0x374   :  { %1471 = vmatpush1.bf16.msra.mxu0 %v3554_v60  ;;  %1514 = vmatpush1.bf16.msra.mxu1 %v3560_v62 }
 0x375   :  { %1472 = vmatprep.subr.bf16.mxu0 %v3566_v63  ;;  %1515 = vmatprep.subr.bf16.mxu1 %v3572_v0 }
 0x378   :  { %1473 = vmatpush1.bf16.msra.mxu0 %v3578_v2  ;;  %1516 = vmatpush1.bf16.msra.mxu1 %v3584_v3 }
 0x379   :  { %1474 = vmatprep.subr.bf16.mxu0 %v3590_v4  ;;  %1517 = vmatprep.subr.bf16.mxu1 %v3596_v5 }
 0x37c   :  { %1475 = vmatpush1.bf16.msra.mxu0 %v3602_v21  ;;  %1518 = vmatpush1.bf16.msra.mxu1 %v3608_v16 }
 0x37d   :  { %1620 = vmatprep.subr.bf16.mxu0 %v3404_v36  ;;  %1663 = vmatprep.subr.bf16.mxu1 %v3410_v37 }
 0x41f   :  { %v1334_v25 = vpop.f32.mrf.mxu0  ;;  %v1377_v52 = vpop.f32.mrf.mxu1 }
 0x420   :  { %v1386_v19 = vadd.f32 %v1334_v25, %v3887_v31  ;;  %v1388_v32 = vadd.f32 %v1377_v52, %v3891_v43 }
 0x421   :  { %v1336_v18 = vpop.f32.mrf.mxu0  ;;  %v1379_v13 = vpop.f32.mrf.mxu1 }
 0x422   :  { %v2233_v23 = vmul.f32 -1.442695, %v1386_v19  ;;  %v1387_v15 = vadd.f32 %v1336_v18, %v3888_v6  ;;  %v2235_v61 = vmul.f32 -1.442695, %v1388_v32  ;;  %v1389_v8 = vadd.f32 %v1379_v13, %v3893_v33  ;;  %v3894_v19 = vld [vmem:[#allocation24_spill] sm:$0xff] }
 0x423   :  { %v1338_v10 = vpop.f32.mrf.mxu0  ;;  %v1381_v9 = vpop.f32.mrf.mxu1 }
 0x424   :  { %2468 = vpow2.f32 %v2233_v23  ;;  %v2234_v27 = vmul.f32 -1.442695, %v1387_v15  ;;  %v1390_v14 = vadd.f32 %v1338_v10, %v3889_v35  ;;  %v1392_v20 = vadd.f32 %v1381_v9, %v3892_v7 }
 0x425   :  { %v1340_v17 = vpop.f32.mrf.mxu0  ;;  %v1383_v12 = vpop.f32.mrf.mxu1 }
 0x426   :  { %2470 = vpow2.f32 %v2234_v27  ;;  %v2236_v22 = vmul.f32 -1.442695, %v1390_v14  ;;  %v1391_v30 = vadd.f32 %v1340_v17, %v3890_v28  ;;  %v2238_v38 = vmul.f32 -1.442695, %v1392_v20 }
 0x427   :  { %v1393_v18 = vadd.f32 %v1383_v12, %v3894_v19  ;;  %v3895_v19 = vld [vmem:[#allocation25_spill] sm:$0xff] }
 0x428   :  { %2472 = vpow2.f32 %v2236_v22  ;;  %v2237_v26 = vmul.f32 -1.442695, %v1391_v30 }
 0x42a   :  { %2474 = vpow2.f32 %v2237_v26 }
 0x42b   :  { %2476 = vpow2.f32 %v2235_v61 }
 0x42c   :  { %2478 = vtanh.f32 %v1389_v8 }
 0x431   :  { %v2469_v11 = vpop.eup %2468 }
 0x432   :  { %v1412_v25 = vadd.f32 1.0, %v2469_v11 }
 0x433   :  { %v2471_v31 = vpop.eup %2470 }
 0x434   :  { %2480 = vrcp.f32 %v1412_v25  ;;  %v1413_v23 = vadd.f32 1.0, %v2471_v31 }
 0x435   :  { %v2473_v6 = vpop.eup %2472  ;;  %2482 = vpow2.f32 %v2238_v38 }
 0x436   :  { %2484 = vrcp.f32 %v1413_v23  ;;  %v1415_v52 = vadd.f32 1.0, %v2473_v6 }
 0x437   :  { %v2475_v15 = vpop.eup %2474  ;;  %2486 = vtanh.f32 %v1393_v18 }
 0x438   :  { %2488 = vrcp.f32 %v1415_v52  ;;  %v1416_v10 = vadd.f32 1.0, %v2475_v15  ;;  %v2477_v27 = vpop.eup %2476  ;;  %v3896_v15 = vld [vmem:[#allocation27_spill] sm:$0xff] }
 0x439   :  { %v2479_v35 = vpop.eup %2478  ;;  %v1414_v43 = vadd.f32 1.0, %v2477_v27 }
 0x43a   :  { %2490 = vrcp.f32 %v1416_v10 }
 0x43b   :  { %2492 = vrcp.f32 %v1414_v43 }
 0x441   :  { %v2481_v14 = vpop.eup %2480 }
 0x442   :  { %v2483_v17 = vpop.eup %2482  ;;  %v1434_v13 = vmul.f32 %v2481_v14, %v2479_v35  ;;  %v3897_v14 = vld [vmem:[#allocation29_spill] sm:$0xff] }
 0x443   :  { %v2485_v22 = vpop.eup %2484  ;;  %v1417_v20 = vadd.f32 1.0, %v2483_v17 }
 0x444   :  { %v2487_v28 = vpop.eup %2486  ;;  %v1432_v30 = vmul.f32 %v2485_v22, %v3422_v34 }
 0x445   :  { %v2489_v26 = vpop.eup %2488 }
 0x446   :  { %v3622_v32 = vadd.f32 %v1434_v13, %v1432_v30  ;;  %v1435_v9 = vmul.f32 %v2489_v26, %v2487_v28  ;;  %v3898_v30 = vld [vmem:[#allocation31_spill] sm:$0xff] }
 0x447   :  { %v2491_v7 = vpop.eup %2490 }
 0x448   :  { %v1433_v61 = vmul.f32 %v2491_v7, %v3426_v24  ;;  %2494 = vtanh.f32 %v3622_v32  ;;  %v2493_v8 = vpop.eup %2492 }
 0x449   :  { %2496 = vrcp.f32 %v1417_v20 }
 0x44a   :  { %v3626_v33 = vadd.f32 %v1435_v9, %v1433_v61  ;;  %v3899_v9 = vld [vmem:[#allocation26_spill] sm:$0xff] }
 0x44b   :  { %v3900_v61 = vld [vmem:[#allocation30_spill] sm:$0xff] }
 0x44c   :  { %2498 = vtanh.f32 %v3626_v33 }
 0x455   :  { %v2495_v12 = vpop.eup %2494 }
 0x456   :  { %v2497_v34 = vpop.eup %2496  ;;  %v1440_v38 = vmul.f32 %v2495_v12, %v2493_v8 }
 0x459   :  { %v2499_v11 = vpop.eup %2498 }
 0x45a   :  { %v1441_v25 = vmul.f32 %v2499_v11, %v2497_v34  ;;  %v3901_v34 = vld [vmem:[#allocation28_spill] sm:$0xff] }
 0x45c   :  { %v1459_v31 = vpack.c.bf16 %v1441_v25, %v1440_v38 }
 0x45e   :  { %1493 = vmatmul.mubr.bf16.vlgmr.msra.gmra.mxu0 %v1459_v31  ;;  %1536 = vmatmul.mubr.bf16.vlgmr.msra.gmra.mxu1 %v1459_v31 }
 0x45f   :  { %1621 = vmatpush1.bf16.msra.mxu0 %v3432_v1  ;;  %1664 = vmatpush1.bf16.msra.mxu1 %v3438_v39 }
 0x460   :  { %1622 = vmatprep.subr.bf16.mxu0 %v3444_v40  ;;  %1665 = vmatprep.subr.bf16.mxu1 %v3450_v41 }
 0x461   :  { %1652 = vmatprep.mubr.bf16.mxu0 %v3875_v29  ;;  %1695 = vmatprep.mubr.bf16.mxu1 %v3875_v29 }
 0x463   :  { %1623 = vmatpush1.bf16.msra.mxu0 %v3458_v42  ;;  %1666 = vmatpush1.bf16.msra.mxu1 %v3464_v44 }
 0x464   :  { %1624 = vmatprep.subr.bf16.mxu0 %v3470_v45  ;;  %1667 = vmatprep.subr.bf16.mxu1 %v3476_v46 }
 0x467   :  { %1625 = vmatpush1.bf16.msra.mxu0 %v3482_v47  ;;  %1668 = vmatpush1.bf16.msra.mxu1 %v3488_v48 }
 0x468   :  { %1626 = vmatprep.subr.bf16.mxu0 %v3494_v49  ;;  %1669 = vmatprep.subr.bf16.mxu1 %v3500_v50 }
 0x46b   :  { %1627 = vmatpush1.bf16.msra.mxu0 %v3506_v51  ;;  %1670 = vmatpush1.bf16.msra.mxu1 %v3512_v53 }
 0x46c   :  { %1628 = vmatprep.subr.bf16.mxu0 %v3518_v54  ;;  %1671 = vmatprep.subr.bf16.mxu1 %v3524_v55 }
 0x46f   :  { %1629 = vmatpush1.bf16.msra.mxu0 %v3530_v56  ;;  %1672 = vmatpush1.bf16.msra.mxu1 %v3536_v57 }
 0x470   :  { %1630 = vmatprep.subr.bf16.mxu0 %v3542_v58  ;;  %1673 = vmatprep.subr.bf16.mxu1 %v3548_v59 }
 0x473   :  { %1631 = vmatpush1.bf16.msra.mxu0 %v3554_v60  ;;  %1674 = vmatpush1.bf16.msra.mxu1 %v3560_v62 }
 0x474   :  { %1632 = vmatprep.subr.bf16.mxu0 %v3566_v63  ;;  %1675 = vmatprep.subr.bf16.mxu1 %v3572_v0 }
 0x477   :  { %1633 = vmatpush1.bf16.msra.mxu0 %v3578_v2  ;;  %1676 = vmatpush1.bf16.msra.mxu1 %v3584_v3 }
 0x478   :  { %1634 = vmatprep.subr.bf16.mxu0 %v3590_v4  ;;  %1677 = vmatprep.subr.bf16.mxu1 %v3596_v5 }
 0x47b   :  { %1635 = vmatpush1.bf16.msra.mxu0 %v3602_v21  ;;  %1678 = vmatpush1.bf16.msra.mxu1 %v3608_v16 }
 0x47c   :  { %1780 = vmatprep.subr.bf16.mxu0 %v3404_v36  ;;  %1823 = vmatprep.subr.bf16.mxu1 %v3410_v37 }
 0x51e   :  { %v1494_v24 = vpop.f32.mrf.mxu0  ;;  %v1537_v52 = vpop.f32.mrf.mxu1 }
 0x51f   :  { %v1546_v18 = vadd.f32 %v1494_v24, %v3895_v19  ;;  %v1548_v7 = vadd.f32 %v1537_v52, %v3899_v9 }
 0x520   :  { %v1496_v23 = vpop.f32.mrf.mxu0  ;;  %v1539_v22 = vpop.f32.mrf.mxu1 }
 0x521   :  { %v2239_v6 = vmul.f32 -1.442695, %v1546_v18  ;;  %v1547_v10 = vadd.f32 %v1496_v23, %v3896_v15  ;;  %v2241_v12 = vmul.f32 -1.442695, %v1548_v7  ;;  %v1549_v11 = vadd.f32 %v1539_v22, %v3901_v34  ;;  %v3902_v18 = vld [vmem:[#allocation32_spill] sm:$0xff] }
 0x522   :  { %v1498_v27 = vpop.f32.mrf.mxu0  ;;  %v1541_v20 = vpop.f32.mrf.mxu1 }
 0x523   :  { %2500 = vpow2.f32 %v2239_v6  ;;  %v2240_v35 = vmul.f32 -1.442695, %v1547_v10  ;;  %v1550_v17 = vadd.f32 %v1498_v27, %v3897_v14  ;;  %v1552_v8 = vadd.f32 %v1541_v20, %v3900_v61 }
 0x524   :  { %v1500_v13 = vpop.f32.mrf.mxu0  ;;  %v1543_v38 = vpop.f32.mrf.mxu1 }
 0x525   :  { %2502 = vpow2.f32 %v2240_v35  ;;  %v2242_v28 = vmul.f32 -1.442695, %v1550_v17  ;;  %v1551_v26 = vadd.f32 %v1500_v13, %v3898_v30  ;;  %v2244_v31 = vmul.f32 -1.442695, %v1552_v8 }
 0x526   :  { %v1553_v23 = vadd.f32 %v1543_v38, %v3902_v18  ;;  %v3903_v18 = vld [vmem:[#allocation33_spill] sm:$0xff] }
 0x527   :  { %2504 = vpow2.f32 %v2242_v28  ;;  %v2243_v43 = vmul.f32 -1.442695, %v1551_v26 }
 0x529   :  { %2506 = vpow2.f32 %v2243_v43 }
 0x52a   :  { %2508 = vpow2.f32 %v2241_v12 }
 0x52b   :  { %2510 = vtanh.f32 %v1549_v11 }
 0x530   :  { %v2501_v25 = vpop.eup %2500 }
 0x531   :  { %v1572_v24 = vadd.f32 1.0, %v2501_v25 }
 0x532   :  { %v2503_v19 = vpop.eup %2502 }
 0x533   :  { %2512 = vrcp.f32 %v1572_v24  ;;  %v1573_v6 = vadd.f32 1.0, %v2503_v19 }
 0x534   :  { %v2505_v15 = vpop.eup %2504  ;;  %2514 = vpow2.f32 %v2244_v31 }
 0x535   :  { %2516 = vrcp.f32 %v1573_v6  ;;  %v1575_v52 = vadd.f32 1.0, %v2505_v15 }
 0x536   :  { %v2507_v10 = vpop.eup %2506  ;;  %2518 = vtanh.f32 %v1553_v23 }
 0x537   :  { %2520 = vrcp.f32 %v1575_v52  ;;  %v1576_v27 = vadd.f32 1.0, %v2507_v10  ;;  %v2509_v35 = vpop.eup %2508  ;;  %v3904_v10 = vld [vmem:[#allocation35_spill] sm:$0xff] }
 0x538   :  { %v2511_v14 = vpop.eup %2510  ;;  %v1574_v9 = vadd.f32 1.0, %v2509_v35 }
 0x539   :  { %2522 = vrcp.f32 %v1576_v27 }
 0x53a   :  { %2524 = vrcp.f32 %v1574_v9 }
 0x540   :  { %v2513_v17 = vpop.eup %2512 }
 0x541   :  { %v2515_v13 = vpop.eup %2514  ;;  %v1594_v22 = vmul.f32 %v2513_v17, %v2511_v14  ;;  %v3905_v17 = vld [vmem:[#allocation37_spill] sm:$0xff] }
 0x542   :  { %v2517_v28 = vpop.eup %2516  ;;  %v1577_v8 = vadd.f32 1.0, %v2515_v13 }
 0x543   :  { %v2519_v30 = vpop.eup %2518  ;;  %v1592_v26 = vmul.f32 %v2517_v28, %v3622_v32 }
 0x544   :  { %v2521_v43 = vpop.eup %2520 }
 0x545   :  { %v3672_v7 = vadd.f32 %v1594_v22, %v1592_v26  ;;  %v1595_v20 = vmul.f32 %v2521_v43, %v2519_v30  ;;  %v3907_v43 = vld [vmem:[#allocation34_spill] sm:$0xff] }
 0x546   :  { %v2523_v61 = vpop.eup %2522 }
 0x547   :  { %v1593_v12 = vmul.f32 %v2523_v61, %v3626_v33  ;;  %2526 = vtanh.f32 %v3672_v7  ;;  %v2525_v11 = vpop.eup %2524  ;;  %v3908_v61 = vld [vmem:[#allocation38_spill] sm:$0xff] }
 0x548   :  { %2528 = vrcp.f32 %v1577_v8 }
 0x549   :  { %v3676_v34 = vadd.f32 %v1595_v20, %v1593_v12 }
 0x54b   :  { %2530 = vtanh.f32 %v3676_v34 }
 0x554   :  { %v2527_v38 = vpop.eup %2526 }
 0x555   :  { %v2529_v32 = vpop.eup %2528  ;;  %v1600_v31 = vmul.f32 %v2527_v38, %v2525_v11  ;;  %v3909_v11 = vld [vmem:[#allocation36_spill] sm:$0xff] }
 0x558   :  { %v2531_v25 = vpop.eup %2530 }
 0x559   :  { %v1601_v24 = vmul.f32 %v2531_v25, %v2529_v32 }
 0x55b   :  { %v1619_v19 = vpack.c.bf16 %v1601_v24, %v1600_v31 }
 0x55d   :  { %1653 = vmatmul.mubr.bf16.vlgmr.msra.gmra.mxu0 %v1619_v19  ;;  %1696 = vmatmul.mubr.bf16.vlgmr.msra.gmra.mxu1 %v1619_v19 }
 0x55e   :  { %1781 = vmatpush1.bf16.msra.mxu0 %v3432_v1  ;;  %1824 = vmatpush1.bf16.msra.mxu1 %v3438_v39 }
 0x55f   :  { %1782 = vmatprep.subr.bf16.mxu0 %v3444_v40  ;;  %1825 = vmatprep.subr.bf16.mxu1 %v3450_v41 }
 0x560   :  { %1812 = vmatprep.mubr.bf16.mxu0 %v3875_v29  ;;  %1855 = vmatprep.mubr.bf16.mxu1 %v3875_v29 }
 0x562   :  { %1783 = vmatpush1.bf16.msra.mxu0 %v3458_v42  ;;  %1826 = vmatpush1.bf16.msra.mxu1 %v3464_v44 }
 0x563   :  { %1784 = vmatprep.subr.bf16.mxu0 %v3470_v45  ;;  %1827 = vmatprep.subr.bf16.mxu1 %v3476_v46 }
 0x566   :  { %1785 = vmatpush1.bf16.msra.mxu0 %v3482_v47  ;;  %1828 = vmatpush1.bf16.msra.mxu1 %v3488_v48 }
 0x567   :  { %1786 = vmatprep.subr.bf16.mxu0 %v3494_v49  ;;  %1829 = vmatprep.subr.bf16.mxu1 %v3500_v50 }
 0x56a   :  { %1787 = vmatpush1.bf16.msra.mxu0 %v3506_v51  ;;  %1830 = vmatpush1.bf16.msra.mxu1 %v3512_v53 }
 0x56b   :  { %1788 = vmatprep.subr.bf16.mxu0 %v3518_v54  ;;  %1831 = vmatprep.subr.bf16.mxu1 %v3524_v55 }
 0x56e   :  { %1789 = vmatpush1.bf16.msra.mxu0 %v3530_v56  ;;  %1832 = vmatpush1.bf16.msra.mxu1 %v3536_v57 }
 0x56f   :  { %1790 = vmatprep.subr.bf16.mxu0 %v3542_v58  ;;  %1833 = vmatprep.subr.bf16.mxu1 %v3548_v59 }
 0x572   :  { %1791 = vmatpush1.bf16.msra.mxu0 %v3554_v60  ;;  %1834 = vmatpush1.bf16.msra.mxu1 %v3560_v62 }
 0x573   :  { %1792 = vmatprep.subr.bf16.mxu0 %v3566_v63  ;;  %1835 = vmatprep.subr.bf16.mxu1 %v3572_v0 }
 0x576   :  { %1793 = vmatpush1.bf16.msra.mxu0 %v3578_v2  ;;  %1836 = vmatpush1.bf16.msra.mxu1 %v3584_v3 }
 0x577   :  { %1794 = vmatprep.subr.bf16.mxu0 %v3590_v4  ;;  %1837 = vmatprep.subr.bf16.mxu1 %v3596_v5 }
 0x57a   :  { %1795 = vmatpush1.bf16.msra.mxu0 %v3602_v21  ;;  %1838 = vmatpush1.bf16.msra.mxu1 %v3608_v16 }
 0x57b   :  { %1940 = vmatprep.subr.bf16.mxu0 %v3404_v36  ;;  %1983 = vmatprep.subr.bf16.mxu1 %v3410_v37  ;;  %v3906_v36 = vld [vmem:[#allocation39_spill] sm:$0xff] }
 0x61d   :  { %v1654_v33 = vpop.f32.mrf.mxu0  ;;  %v1697_v52 = vpop.f32.mrf.mxu1 }
 0x61e   :  { %v1706_v23 = vadd.f32 %v1654_v33, %v3903_v18  ;;  %v1708_v9 = vadd.f32 %v1697_v52, %v3907_v43  ;;  %v3910_v33 = vld [vmem:[#allocation40_spill] sm:$0xff] }
 0x61f   :  { %v1656_v6 = vpop.f32.mrf.mxu0  ;;  %v1699_v28 = vpop.f32.mrf.mxu1 }
 0x620   :  { %v2245_v15 = vmul.f32 -1.442695, %v1706_v23  ;;  %v1707_v27 = vadd.f32 %v1656_v6, %v3904_v10  ;;  %v2247_v12 = vmul.f32 -1.442695, %v1708_v9  ;;  %v1709_v38 = vadd.f32 %v1699_v28, %v3909_v11 }
 0x621   :  { %v1658_v35 = vpop.f32.mrf.mxu0  ;;  %v1701_v20 = vpop.f32.mrf.mxu1 }
 0x622   :  { %2532 = vpow2.f32 %v2245_v15  ;;  %v2246_v14 = vmul.f32 -1.442695, %v1707_v27  ;;  %v1710_v13 = vadd.f32 %v1658_v35, %v3905_v17  ;;  %v1712_v8 = vadd.f32 %v1701_v20, %v3908_v61 }
 0x623   :  { %v1660_v22 = vpop.f32.mrf.mxu0  ;;  %v1703_v32 = vpop.f32.mrf.mxu1 }
 0x624   :  { %2534 = vpow2.f32 %v2246_v14  ;;  %v2248_v30 = vmul.f32 -1.442695, %v1710_v13  ;;  %v1711_v26 = vadd.f32 %v1660_v22, %v3906_v36  ;;  %v2250_v31 = vmul.f32 -1.442695, %v1712_v8 }
 0x625   :  { %v1713_v18 = vadd.f32 %v1703_v32, %v3910_v33 }
 0x626   :  { %2536 = vpow2.f32 %v2248_v30  ;;  %v2249_v37 = vmul.f32 -1.442695, %v1711_v26 }
 0x628   :  { %2538 = vpow2.f32 %v2249_v37 }
 0x629   :  { %2540 = vpow2.f32 %v2247_v12 }
 0x62a   :  { %2542 = vtanh.f32 %v1709_v38 }
 0x62f   :  { %v2533_v25 = vpop.eup %2532 }
 0x630   :  { %v1732_v24 = vadd.f32 1.0, %v2533_v25 }
 0x631   :  { %v2535_v19 = vpop.eup %2534 }
 0x632   :  { %2544 = vrcp.f32 %v1732_v24  ;;  %v1733_v23 = vadd.f32 1.0, %v2535_v19 }
 0x633   :  { %v2537_v6 = vpop.eup %2536  ;;  %2546 = vpow2.f32 %v2250_v31 }
 0x634   :  { %2548 = vrcp.f32 %v1733_v23  ;;  %v1735_v15 = vadd.f32 1.0, %v2537_v6 }
 0x635   :  { %v2539_v52 = vpop.eup %2538  ;;  %2550 = vtanh.f32 %v1713_v18 }
 0x636   :  { %2552 = vrcp.f32 %v1735_v15  ;;  %v1736_v10 = vadd.f32 1.0, %v2539_v52  ;;  %v2541_v27 = vpop.eup %2540 }
 0x637   :  { %v2543_v35 = vpop.eup %2542  ;;  %v1734_v26 = vadd.f32 1.0, %v2541_v27 }
 0x638   :  { %2554 = vrcp.f32 %v1736_v10 }
 0x639   :  { %2556 = vrcp.f32 %v1734_v26 }
 0x63f   :  { %v2545_v14 = vpop.eup %2544 }
 0x640   :  { %v2547_v17 = vpop.eup %2546  ;;  %v1754_v13 = vmul.f32 %v2545_v14, %v2543_v35 }
 0x641   :  { %v2549_v22 = vpop.eup %2548  ;;  %v1737_v20 = vadd.f32 1.0, %v2547_v17 }
 0x642   :  { %v2551_v28 = vpop.eup %2550  ;;  %v1752_v30 = vmul.f32 %v2549_v22, %v3672_v7 }
 0x643   :  { %v2553_v36 = vpop.eup %2552 }
 0x644   :  { %v3722_v37 = vadd.f32 %v1754_v13, %v1752_v30  ;;  %v1755_v43 = vmul.f32 %v2553_v36, %v2551_v28 }
 0x645   :  { %v2555_v9 = vpop.eup %2554 }
 0x646   :  { %v1753_v61 = vmul.f32 %v2555_v9, %v3676_v34  ;;  %2558 = vtanh.f32 %v3722_v37  ;;  %v2557_v12 = vpop.eup %2556  ;;  %v3918_v34 = vld [vmem:[#allocation48_spill] sm:$0xff] }
 0x647   :  { %2560 = vrcp.f32 %v1737_v20 }
 0x648   :  { %v3726_v8 = vadd.f32 %v1755_v43, %v1753_v61 }
 0x64a   :  { %2562 = vtanh.f32 %v3726_v8 }
 0x653   :  { %v2559_v11 = vpop.eup %2558 }
 0x654   :  { %v2561_v7 = vpop.eup %2560  ;;  %v1760_v32 = vmul.f32 %v2559_v11, %v2557_v12 }
 0x657   :  { %v2563_v38 = vpop.eup %2562 }
 0x658   :  { %v1761_v25 = vmul.f32 %v2563_v38, %v2561_v7 }
 0x65a   :  { %v1779_v31 = vpack.c.bf16 %v1761_v25, %v1760_v32 }
 0x65c   :  { %1813 = vmatmul.mubr.bf16.vlgmr.msra.gmra.mxu0 %v1779_v31  ;;  %1856 = vmatmul.mubr.bf16.vlgmr.msra.gmra.mxu1 %v1779_v31  ;;  %v3919_v31 = vld [vmem:[#allocation49_spill] sm:$0xff] }
 0x65d   :  { %1941 = vmatpush1.bf16.msra.mxu0 %v3432_v1  ;;  %1984 = vmatpush1.bf16.msra.mxu1 %v3438_v39  ;;  %v3911_v1 = vld [vmem:[#allocation41_spill] sm:$0xff] }
 0x65e   :  { %1942 = vmatprep.subr.bf16.mxu0 %v3444_v40  ;;  %1985 = vmatprep.subr.bf16.mxu1 %v3450_v41 }
 0x65f   :  { %1972 = vmatprep.mubr.bf16.mxu0 %v3875_v29  ;;  %2015 = vmatprep.mubr.bf16.mxu1 %v3875_v29 }
 0x661   :  { %1943 = vmatpush1.bf16.msra.mxu0 %v3458_v42  ;;  %1986 = vmatpush1.bf16.msra.mxu1 %v3464_v44  ;;  %v3912_v44 = vld [vmem:[#allocation43_spill] sm:$0xff] }
 0x662   :  { %1944 = vmatprep.subr.bf16.mxu0 %v3470_v45  ;;  %1987 = vmatprep.subr.bf16.mxu1 %v3476_v46 }
 0x665   :  { %1945 = vmatpush1.bf16.msra.mxu0 %v3482_v47  ;;  %1988 = vmatpush1.bf16.msra.mxu1 %v3488_v48  ;;  %v3913_v48 = vld [vmem:[#allocation45_spill] sm:$0xff] }
 0x666   :  { %1946 = vmatprep.subr.bf16.mxu0 %v3494_v49  ;;  %1989 = vmatprep.subr.bf16.mxu1 %v3500_v50 }
 0x669   :  { %1947 = vmatpush1.bf16.msra.mxu0 %v3506_v51  ;;  %1990 = vmatpush1.bf16.msra.mxu1 %v3512_v53 }
 0x66a   :  { %1948 = vmatprep.subr.bf16.mxu0 %v3518_v54  ;;  %1991 = vmatprep.subr.bf16.mxu1 %v3524_v55  ;;  %v3914_v54 = vld [vmem:[#allocation47_spill] sm:$0xff] }
 0x66d   :  { %1949 = vmatpush1.bf16.msra.mxu0 %v3530_v56  ;;  %1992 = vmatpush1.bf16.msra.mxu1 %v3536_v57  ;;  %v3915_v57 = vld [vmem:[#allocation42_spill] sm:$0xff] }
 0x66e   :  { %1950 = vmatprep.subr.bf16.mxu0 %v3542_v58  ;;  %1993 = vmatprep.subr.bf16.mxu1 %v3548_v59 }
 0x671   :  { %1951 = vmatpush1.bf16.msra.mxu0 %v3554_v60  ;;  %1994 = vmatpush1.bf16.msra.mxu1 %v3560_v62  ;;  %v3916_v60 = vld [vmem:[#allocation46_spill] sm:$0xff] }
 0x672   :  { %1952 = vmatprep.subr.bf16.mxu0 %v3566_v63  ;;  %1995 = vmatprep.subr.bf16.mxu1 %v3572_v0  ;;  %v3917_v0 = vld [vmem:[#allocation44_spill] sm:$0xff] }
 0x675   :  { %1953 = vmatpush1.bf16.msra.mxu0 %v3578_v2  ;;  %1996 = vmatpush1.bf16.msra.mxu1 %v3584_v3 }
 0x676   :  { %1954 = vmatprep.subr.bf16.mxu0 %v3590_v4  ;;  %1997 = vmatprep.subr.bf16.mxu1 %v3596_v5 }
 0x679   :  { %1955 = vmatpush1.bf16.msra.mxu0 %v3602_v21  ;;  %1998 = vmatpush1.bf16.msra.mxu1 %v3608_v16 }
 0x71c   :  { %v1814_v29 = vpop.f32.mrf.mxu0  ;;  %v1857_v42 = vpop.f32.mrf.mxu1 }
 0x71d   :  { %v1866_v39 = vadd.f32 %v1814_v29, %v3911_v1  ;;  %v1868_v58 = vadd.f32 %v1857_v42, %v3915_v57 }
 0x71e   :  { %v1816_v40 = vpop.f32.mrf.mxu0  ;;  %v1859_v51 = vpop.f32.mrf.mxu1 }
 0x71f   :  { %v2251_v41 = vmul.f32 -1.442695, %v1866_v39  ;;  %v1867_v45 = vadd.f32 %v1816_v40, %v3912_v44  ;;  %v2253_v63 = vmul.f32 -1.442695, %v1868_v58  ;;  %v1869_v2 = vadd.f32 %v1859_v51, %v3917_v0  ;;  %v3922_v51 = vld [vmem:[#allocation55_spill] sm:$0xff]  ;;  %v3924_v58 = vld [vmem:[#allocation54_spill] sm:$0xff] }
 0x720   :  { %v1818_v46 = vpop.f32.mrf.mxu0  ;;  %v1861_v59 = vpop.f32.mrf.mxu1 }
 0x721   :  { %2564 = vpow2.f32 %v2251_v41  ;;  %v2252_v47 = vmul.f32 -1.442695, %v1867_v45  ;;  %v1870_v49 = vadd.f32 %v1818_v46, %v3913_v48  ;;  %v1872_v62 = vadd.f32 %v1861_v59, %v3916_v60  ;;  %v3920_v41 = vld [vmem:[#allocation51_spill] sm:$0xff]  ;;  %v3921_v46 = vld [vmem:[#allocation53_spill] sm:$0xff] }
 0x722   :  { %v1820_v50 = vpop.f32.mrf.mxu0  ;;  %v1863_v3 = vpop.f32.mrf.mxu1 }
 0x723   :  { %2566 = vpow2.f32 %v2252_v47  ;;  %v2254_v53 = vmul.f32 -1.442695, %v1870_v49  ;;  %v1871_v55 = vadd.f32 %v1820_v50, %v3914_v54  ;;  %v2256_v5 = vmul.f32 -1.442695, %v1872_v62  ;;  %v3925_v62 = vld [vmem:[#allocation52_spill] sm:$0xff] }
 0x724   :  { %v1873_v24 = vadd.f32 %v1863_v3, %v3918_v34 }
 0x725   :  { %2568 = vpow2.f32 %v2254_v53  ;;  %v2255_v56 = vmul.f32 -1.442695, %v1871_v55  ;;  %v3923_v55 = vld [vmem:[#allocation50_spill] sm:$0xff] }
 0x727   :  { %2570 = vpow2.f32 %v2255_v56 }
 0x728   :  { %2572 = vpow2.f32 %v2253_v63 }
 0x729   :  { %2574 = vtanh.f32 %v1869_v2 }
 0x72e   :  { %v2565_v4 = vpop.eup %2564 }
 0x72f   :  { %v1892_v21 = vadd.f32 1.0, %v2565_v4 }
 0x730   :  { %v2567_v16 = vpop.eup %2566 }
 0x731   :  { %2576 = vrcp.f32 %v1892_v21  ;;  %v1893_v19 = vadd.f32 1.0, %v2567_v16  ;;  %v3926_v21 = vld [vmem:[#allocation56_spill] sm:$0xff] }
 0x732   :  { %v2569_v33 = vpop.eup %2568  ;;  %2578 = vpow2.f32 %v2256_v5 }
 0x733   :  { %2580 = vrcp.f32 %v1893_v19  ;;  %v1895_v18 = vadd.f32 1.0, %v2569_v33 }
 0x734   :  { %v2571_v23 = vpop.eup %2570  ;;  %2582 = vtanh.f32 %v1873_v24 }
 0x735   :  { %2584 = vrcp.f32 %v1895_v18  ;;  %v1896_v6 = vadd.f32 1.0, %v2571_v23  ;;  %v2573_v15 = vpop.eup %2572 }
 0x736   :  { %v2575_v52 = vpop.eup %2574  ;;  %v1894_v28 = vadd.f32 1.0, %v2573_v15 }
 0x737   :  { %2586 = vrcp.f32 %v1896_v6 }
 0x738   :  { %2588 = vrcp.f32 %v1894_v28 }
 0x73e   :  { %v2577_v10 = vpop.eup %2576 }
 0x73f   :  { %v2579_v27 = vpop.eup %2578  ;;  %v1914_v35 = vmul.f32 %v2577_v10, %v2575_v52 }
 0x740   :  { %v2581_v14 = vpop.eup %2580  ;;  %v1897_v43 = vadd.f32 1.0, %v2579_v27 }
 0x741   :  { %v2583_v17 = vpop.eup %2582  ;;  %v1912_v13 = vmul.f32 %v2581_v14, %v3722_v37 }
 0x742   :  { %v2585_v22 = vpop.eup %2584 }
 0x743   :  { %v3770_v30 = vadd.f32 %v1914_v35, %v1912_v13  ;;  %v1915_v36 = vmul.f32 %v2585_v22, %v2583_v17 }
 0x744   :  { %v2587_v26 = vpop.eup %2586 }
 0x745   :  { %v1913_v9 = vmul.f32 %v2587_v26, %v3726_v8  ;;  %2590 = vtanh.f32 %v3770_v30  ;;  %v2589_v61 = vpop.eup %2588  ;;  %v16_v8 = vstv %s3817_s7 }
 0x746   :  { %2592 = vrcp.f32 %v1897_v43  ;;  %17 = vst [vmem:[#allocation5] sm:$0x1] %v16_v8 }
 0x747   :  { %v3774_v20 = vadd.f32 %v1915_v36, %v1913_v9 }
 0x749   :  { %2594 = vtanh.f32 %v3774_v20 }
 0x74d   :  { %v2264_v8 = vld [vmem:[#allocation5] ss:$0 sm:$0xff] }
 0x752   :  { %v2591_v12 = vpop.eup %2590 }
 0x753   :  { %v2593_v37 = vpop.eup %2592  ;;  %v1920_v7 = vmul.f32 %v2591_v12, %v2589_v61  ;;  %v2263_v12 = vld [vmem:[%s3819_s6] ss:$0 sm:$0xff] }
 0x756   :  { %v2595_v11 = vpop.eup %2594 }
 0x757   :  { %v1921_v38 = vmul.f32 %v2595_v11, %v2593_v37 }
 0x759   :  { %v1939_v32 = vpack.c.bf16 %v1921_v38, %v1920_v7 }
 0x75b   :  { %1973 = vmatmul.mubr.bf16.vlgmr.msra.gmra.mxu0 %v1939_v32  ;;  %2016 = vmatmul.mubr.bf16.vlgmr.msra.gmra.mxu1 %v1939_v32 }
 0x81b   :  { %v1974_v25 = vpop.f32.mrf.mxu0  ;;  %v2017_v40 = vpop.f32.mrf.mxu1 }
 0x81c   :  { %v2026_v29 = vadd.f32 %v1974_v25, %v3919_v31  ;;  %v2028_v56 = vadd.f32 %v2017_v40, %v3923_v55 }
 0x81d   :  { %v1976_v1 = vpop.f32.mrf.mxu0  ;;  %v2019_v49 = vpop.f32.mrf.mxu1 }
 0x81e   :  { %v2257_v39 = vmul.f32 -1.442695, %v2026_v29  ;;  %v2027_v42 = vadd.f32 %v1976_v1, %v3920_v41  ;;  %v2259_v60 = vmul.f32 -1.442695, %v2028_v56  ;;  %v2029_v63 = vadd.f32 %v2019_v49, %v3925_v62 }
 0x81f   :  { %v1978_v44 = vpop.f32.mrf.mxu0  ;;  %v2021_v57 = vpop.f32.mrf.mxu1 }
 0x820   :  { %2596 = vpow2.f32 %v2257_v39  ;;  %v2258_v45 = vmul.f32 -1.442695, %v2027_v42  ;;  %v2030_v47 = vadd.f32 %v1978_v44, %v3921_v46  ;;  %v2032_v59 = vadd.f32 %v2021_v57, %v3924_v58 }
 0x821   :  { %v1980_v48 = vpop.f32.mrf.mxu0  ;;  %v2023_v0 = vpop.f32.mrf.mxu1 }
 0x822   :  { %2598 = vpow2.f32 %v2258_v45  ;;  %v2260_v50 = vmul.f32 -1.442695, %v2030_v47  ;;  %v2031_v53 = vadd.f32 %v1980_v48, %v3922_v51  ;;  %v2262_v3 = vmul.f32 -1.442695, %v2032_v59 }
 0x823   :  { %v2033_v16 = vadd.f32 %v2023_v0, %v3926_v21 }
 0x824   :  { %2600 = vpow2.f32 %v2260_v50  ;;  %v2261_v54 = vmul.f32 -1.442695, %v2031_v53 }
 0x826   :  { %2602 = vpow2.f32 %v2261_v54 }
 0x827   :  { %2604 = vpow2.f32 %v2259_v60 }
 0x828   :  { %2606 = vtanh.f32 %v2029_v63 }
 0x82d   :  { %v2597_v2 = vpop.eup %2596 }
 0x82e   :  { %v2052_v4 = vadd.f32 1.0, %v2597_v2 }
 0x82f   :  { %v2599_v5 = vpop.eup %2598 }
 0x830   :  { %2608 = vrcp.f32 %v2052_v4  ;;  %v2053_v34 = vadd.f32 1.0, %v2599_v5 }
 0x831   :  { %v2601_v24 = vpop.eup %2600  ;;  %2610 = vpow2.f32 %v2262_v3 }
 0x832   :  { %2612 = vrcp.f32 %v2053_v34  ;;  %v2055_v19 = vadd.f32 1.0, %v2601_v24 }
 0x833   :  { %v2603_v33 = vpop.eup %2602  ;;  %2614 = vtanh.f32 %v2033_v16 }
 0x834   :  { %2616 = vrcp.f32 %v2055_v19  ;;  %v2056_v18 = vadd.f32 1.0, %v2603_v33  ;;  %v2605_v23 = vpop.eup %2604 }
 0x835   :  { %v2607_v6 = vpop.eup %2606  ;;  %v2054_v35 = vadd.f32 1.0, %v2605_v23 }
 0x836   :  { %2618 = vrcp.f32 %v2056_v18 }
 0x837   :  { %2620 = vrcp.f32 %v2054_v35 }
 0x83d   :  { %v2609_v15 = vpop.eup %2608 }
 0x83e   :  { %v2611_v52 = vpop.eup %2610  ;;  %v2074_v10 = vmul.f32 %v2609_v15, %v2607_v6 }
 0x83f   :  { %v2613_v27 = vpop.eup %2612  ;;  %v2057_v26 = vadd.f32 1.0, %v2611_v52 }
 0x840   :  { %v2615_v14 = vpop.eup %2614  ;;  %v2072_v17 = vmul.f32 %v2613_v27, %v3770_v30 }
 0x841   :  { %v2617_v13 = vpop.eup %2616 }
 0x842   :  { %v2076_v22 = vadd.f32 %v2074_v10, %v2072_v17  ;;  %v2075_v28 = vmul.f32 %v2617_v13, %v2615_v14 }
 0x843   :  { %v2619_v36 = vpop.eup %2618 }
 0x844   :  { %2092 = vst [vmem:[%s3818_s10] sm:$0xff] %v2076_v22  ;;  %v2073_v43 = vmul.f32 %v2619_v36, %v3774_v20  ;;  %2622 = vtanh.f32 %v2076_v22  ;;  %v2621_v30 = vpop.eup %2620 }
 0x845   :  { %2624 = vrcp.f32 %v2057_v26 }
 0x846   :  { %v2077_v9 = vadd.f32 %v2075_v28, %v2073_v43 }
 0x848   :  { %2093 = vst [vmem:[%s3818_s10 + $0x8] sm:$0xff] %v2077_v9  ;;  %2626 = vtanh.f32 %v2077_v9 }
 0x851   :  { %v2623_v61 = vpop.eup %2622 }
 0x852   :  { %v2080_v37 = vmul.f32 %v2623_v61, %v2621_v30  ;;  %v2625_v11 = vpop.eup %2624 }
 0x854   :  { %v2101_v7 = vmul.f32 %v2263_v12, %v2080_v37  ;;  %2088 = vst [vmem:[%s3820_s9] sm:$0xff] %v2080_v37 }
 0x855   :  { %v2627_v20 = vpop.eup %2626 }
 0x856   :  { %2103 = vadd.xlane.f32.xlu0 %v2101_v7  ;;  %v2081_v38 = vmul.f32 %v2627_v20, %v2625_v11 }
 0x858   :  { %v2102_v32 = vmul.f32 %v2263_v12, %v2081_v38  ;;  %2089 = vst [vmem:[%s3820_s9 + $0x8] sm:$0xff] %v2081_v38 }
 0x85a   :  { %2105 = vadd.xlane.f32.xlu0 %v2102_v32 }
 0x8df   :  { %v2104_v25 = vpop.xlane.xlu0 %2103 }
 0x8e0   :  { %v2114_v31 = vadd.f32 %v2264_v8, %v2104_v25 }
 0x8e2   :  { %v2265_v29 = vmul.f32 -1.442695, %v2114_v31 }
 0x8e3   :  { %v2106_v1 = vpop.xlane.xlu0 %2105 }
 0x8e4   :  { %2628 = vpow2.f32 %v2265_v29  ;;  %v2115_v39 = vadd.f32 %v2264_v8, %v2106_v1 }
 0x8e6   :  { %v2266_v40 = vmul.f32 -1.442695, %v2115_v39 }
 0x8e8   :  { %2630 = vpow2.f32 %v2266_v40 }
 0x8f1   :  { %v2629_v41 = vpop.eup %2628 }
 0x8f2   :  { %v2122_v42 = vadd.f32 1.0, %v2629_v41 }
 0x8f4   :  { %2632 = vrcp.f32 %v2122_v42 }
 0x8f5   :  { %v2631_v44 = vpop.eup %2630 }
 0x8f6   :  { %v2123_v45 = vadd.f32 1.0, %v2631_v44 }
 0x8f8   :  { %2634 = vrcp.f32 %v2123_v45 }
 0x901   :  { %v2633_v46 = vpop.eup %2632 }
 0x902   :  { %2129 = vst.msk [vmem:[%s3821_s8] sm:$0xff] %vm2128_vm0, %v2633_v46 }
 0x905   :  { %v2635_v47 = vpop.eup %2634 }
 0x906   :  { %2130 = vst.msk [vmem:[%s3821_s8 + $0x8] sm:$0xff] %vm2128_vm0, %v2635_v47 }

</bundles_post_ra>
